<compile_context>
chip_gen: v6e
topology: v6e:2x2x1
jax: 0.10.0
libtpu: 0.0.40
codegen_flags: <defaults>
</compile_context>

<pallas_src>
import jax
import jax.numpy as jnp
from jax.experimental import pallas as pl
from jax.experimental.pallas import tpu as pltpu

BN_EPS = 1e-5


def _align8(n):
    return (n + 7) // 8 * 8


class _Slab:
    """Packs many small f32 tensors into one 2-D slab (one DMA per slab).

    Every tensor gets its own 8-row-aligned section starting at column 0, so
    the kernel addresses it with static ref slices.
    """

    def __init__(self):
        self._items = []
        self._rows = 0

    def add(self, arr):
        arr = jnp.asarray(arr, jnp.float32)
        off = self._rows
        self._items.append((off, arr))
        self._rows = off + _align8(arr.shape[0])
        return off

    def build(self):
        width = max(a.shape[1] for _, a in self._items)
        slab = jnp.zeros((max(self._rows, 8), width), jnp.float32)
        for off, a in self._items:
            slab = slab.at[off:off + a.shape[0], :a.shape[1]].set(a)
        return slab


def init_params(key, state, n_actions):
    ks = jax.random.split(key, 16)

    def lin(k, fi, fo):
        k1, k2 = jax.random.split(k)
        lim = 1.0 / (fi ** 0.5)
        w = jax.random.uniform(k1, (fi, fo), jnp.float32, -lim, lim)
        b = jax.random.uniform(k2, (1, fo), jnp.float32, -lim, lim)
        return w, b

    p = {}
    p['w1a'], p['b1a'] = lin(ks[0], 4, 64)
    p['w1b'], p['b1b'] = lin(ks[1], 64, state)
    p['w2a'], p['b2a'] = lin(ks[2], 2 * state, 64)
    p['w2b'], p['b2b'] = lin(ks[3], 64, state)
    p['w3a'], p['b3a'] = lin(ks[4], 2 * state, 64)
    p['w3b'], p['b3b'] = lin(ks[5], 64, state)
    for i, kk in zip((1, 2, 3), ks[6:9]):
        kg, kb = jax.random.split(kk)
        p[f'g{i}'] = 1.0 + 0.1 * jax.random.normal(kg, (state, 1), jnp.float32)
        p[f'be{i}'] = 0.1 * jax.random.normal(kb, (state, 1), jnp.float32)
    p['wm1'], p['bm1'] = lin(ks[9], state * state, 256)
    p['wm2'], p['bm2'] = lin(ks[10], 256, 256)
    p['wm3'], p['bm3'] = lin(ks[11], 256, 256)
    p['wv'], p['bv'] = lin(ks[12], 256, 1)
    was, bas = [], []
    for kk in jax.random.split(ks[13], n_actions):
        w, b = lin(kk, 256, 2)
        was.append(w)
        bas.append(b[0])
    p['wa'] = jnp.stack(was)    # [n_actions, 256, 2]
    p['bah'] = jnp.stack(bas)   # [n_actions, 2]
    return p


def gbdq_pallas(x, edge_index, p, n_actions):
    x = jnp.asarray(x, jnp.float32)
    B, N, F = x.shape
    S = N                          # per-node feature width after each conv
    HC = p['w1a'].shape[1]         # conv MLP hidden (64)
    HT = p['wm2'].shape[0]         # trunk hidden (256)
    E = edge_index.shape[1]
    src, dst = edge_index[0], edge_index[1]
    eyeB = jnp.eye(B, dtype=jnp.float32)

    # ---- graph slab: fused gather [gdst | gsrc] and scatter gdst^T ----------
    gsrc = jax.nn.one_hot(src, N, dtype=jnp.float32)          # [E, N]
    gdst = jax.nn.one_hot(dst, N, dtype=jnp.float32)          # [E, N]
    gslab = _Slab()
    o_gf = gslab.add(jnp.concatenate([gdst, gsrc], axis=1))   # [E, 2N]
    o_gt = gslab.add(gdst.T)                                  # [N, E]
    graph_slab = gslab.build()

    # ---- conv slab: Kron-expanded per-layer weights + biases + BN params ----
    # EdgeConv first linear split: [x_i, x_j - x_i] @ W == x_i@(Wi-Wd) + x_j@Wd
    cslab = _Slab()

    def pack_conv(w, ba, wb, bb, g, be, cin):
        wi, wd = w[:cin], w[cin:]
        return dict(
            wid=cslab.add(jnp.kron(wi - wd, eyeB)),       # [cin*B, HC*B]
            wd=cslab.add(jnp.kron(wd, eyeB)),             # [cin*B, HC*B]
            wb=cslab.add(jnp.kron(wb, eyeB)),             # [HC*B,  S*B]
            ba=cslab.add(jnp.repeat(ba, B, axis=1)),      # [1, HC*B]
            bb=cslab.add(jnp.repeat(bb, B, axis=1)),      # [1, S*B]
            g=cslab.add(g), be=cslab.add(be),             # [N, 1] each
        )

    conv_offs = [
        pack_conv(p['w1a'], p['b1a'], p['w1b'], p['b1b'], p['g1'], p['be1'], F),
        pack_conv(p['w2a'], p['b2a'], p['w2b'], p['b2b'], p['g2'], p['be2'], S),
        pack_conv(p['w3a'], p['b3a'], p['w3b'], p['b3b'], p['g3'], p['be3'], S),
    ]
    cins = [F, S, S]
    conv_slab = cslab.build()

    # ---- trunk slab: transposed trunk weights (trunk runs as [hidden, B]) ---
    tslab = _Slab()
    # Wm1 rows reordered to the kernel's (s, n) boundary ordering, then T.
    wm1_snh = jnp.transpose(p['wm1'].reshape(N, S, HT), (1, 0, 2)).reshape(S * N, HT)
    # Dueling head folded into one matrix: value + (adv - mean_k adv).
    wa_c = p['wa'] - p['wa'].mean(axis=2, keepdims=True)           # [n, HT, 2]
    ba_c = p['bah'] - p['bah'].mean(axis=1, keepdims=True)         # [n, 2]
    w_head = jnp.transpose(wa_c, (1, 0, 2)).reshape(HT, n_actions * 2) + p['wv']
    b_head = ba_c.reshape(1, n_actions * 2) + p['bv']

    t_offs = dict(
        wm1=tslab.add(wm1_snh.T),          # [HT, S*N]
        wm2=tslab.add(p['wm2'].T),         # [HT, HT]
        wm3=tslab.add(p['wm3'].T),         # [HT, HT]
        wh=tslab.add(w_head.T),            # [2n, HT]
        bm1=tslab.add(p['bm1'].T),         # [HT, 1]
        bm2=tslab.add(p['bm2'].T),
        bm3=tslab.add(p['bm3'].T),
        bh=tslab.add(b_head.T),            # [2n, 1]
    )
    trunk_slab = tslab.build()

    # ---- activation input: node-major, lanes ordered (channel, batch) -------
    x_nm = jnp.transpose(x, (1, 2, 0)).reshape(N, F * B)

    nout = 2 * n_actions

    def kernel(x_ref, g_ref, conv_ref, trunk_ref, q_ref):
        f32 = jnp.float32
        gf = g_ref[o_gf:o_gf + E, 0:2 * N]      # fused gather  [E, 2N]
        gt = g_ref[o_gt:o_gt + N, 0:E]          # scatter       [N, E]

        act = x_ref[...]                        # [N, Cin*B]
        for li in range(3):
            o, cin = conv_offs[li], cins[li]
            wid = conv_ref[o['wid']:o['wid'] + cin * B, :]
            wd = conv_ref[o['wd']:o['wd'] + cin * B, :]
            wb = conv_ref[o['wb']:o['wb'] + HC * B, 0:S * B]
            ba = conv_ref[o['ba']:o['ba'] + 1, :]
            bb = conv_ref[o['bb']:o['bb'] + 1, 0:S * B]
            g = conv_ref[o['g']:o['g'] + N, 0:1]
            be = conv_ref[o['be']:o['be'] + N, 0:1]

            # EdgeConv(add): node-space projections, fused edge gather,
            # hidden ReLU, second linear, scatter-add back onto nodes.
            a = jnp.dot(act, wid, preferred_element_type=f32) + ba   # [N, HC*B]
            c = jnp.dot(act, wd, preferred_element_type=f32)         # [N, HC*B]
            ac = jnp.concatenate([a, c], axis=0)                     # [2N, HC*B]
            hh = jnp.maximum(jnp.dot(gf, ac, preferred_element_type=f32), 0.0)
            m = jnp.dot(hh, wb, preferred_element_type=f32) + bb     # [E, S*B]
            out = jnp.dot(gt, m, preferred_element_type=f32)         # [N, S*B]

            # BatchNorm1d(state), training mode: per-node stats over
            # (batch, feature) == one single-pass lane reduction per row.
            mu = jnp.mean(out, axis=1, keepdims=True)
            ex2 = jnp.mean(out * out, axis=1, keepdims=True)
            var = ex2 - mu * mu
            act = jnp.maximum(
                (out - mu) * jax.lax.rsqrt(var + BN_EPS) * g + be, 0.0)

        # conv -> trunk boundary: reorder [N, (s,b)] into [(s,n), B] with S
        # static lane slices + one sublane concat (no lane<->sublane reshape),
        # then run the whole trunk transposed ([hidden, B]).
        o_cat = jnp.concatenate([act[:, s * B:(s + 1) * B] for s in range(S)],
                                axis=0)                               # [S*N, B]
        wm1 = trunk_ref[t_offs['wm1']:t_offs['wm1'] + HT, 0:S * N]
        wm2 = trunk_ref[t_offs['wm2']:t_offs['wm2'] + HT, 0:HT]
        wm3 = trunk_ref[t_offs['wm3']:t_offs['wm3'] + HT, 0:HT]
        wh = trunk_ref[t_offs['wh']:t_offs['wh'] + nout, 0:HT]
        bm1 = trunk_ref[t_offs['bm1']:t_offs['bm1'] + HT, 0:1]
        bm2 = trunk_ref[t_offs['bm2']:t_offs['bm2'] + HT, 0:1]
        bm3 = trunk_ref[t_offs['bm3']:t_offs['bm3'] + HT, 0:1]
        bh = trunk_ref[t_offs['bh']:t_offs['bh'] + nout, 0:1]

        h = jnp.maximum(jnp.dot(wm1, o_cat, preferred_element_type=f32) + bm1, 0.0)
        h = jnp.maximum(jnp.dot(wm2, h, preferred_element_type=f32) + bm2, 0.0)
        h = jnp.maximum(jnp.dot(wm3, h, preferred_element_type=f32) + bm3, 0.0)
        # Dueling combine already folded into wh/bh -> one matmul, one store.
        q_ref[...] = jnp.dot(wh, h, preferred_element_type=f32) + bh  # [2n, B]

    q_t = pl.pallas_call(
        kernel,
        out_shape=jax.ShapeDtypeStruct((nout, B), jnp.float32),
        in_specs=[pl.BlockSpec(memory_space=pltpu.MemorySpace.VMEM)] * 4,
        out_specs=pl.BlockSpec(memory_space=pltpu.MemorySpace.VMEM),
    )(x_nm, graph_slab, conv_slab, trunk_slab)
    return q_t.T.reshape(B, n_actions, 2)


def gbdq_reference(x, edge_index, p):
    # Pure-JAX reference mirroring the torch module (PyG EdgeConv semantics).
    src, dst = edge_index[0], edge_index[1]
    B, N, _ = x.shape

    def econv(h, wa, ba, wb, bb):
        xi = h[:, dst, :]
        xj = h[:, src, :]
        e = jnp.concatenate([xi, xj - xi], axis=-1)
        m = jnp.maximum(e @ wa + ba, 0.0) @ wb + bb
        return jnp.zeros((B, N, wb.shape[1]), jnp.float32).at[:, dst, :].add(m)

    def bn_relu(h, g, b):
        mu = jnp.mean(h, axis=(0, 2), keepdims=True)
        var = jnp.mean((h - mu) ** 2, axis=(0, 2), keepdims=True)
        return jnp.maximum((h - mu) / jnp.sqrt(var + BN_EPS) * g[None] + b[None], 0.0)

    o = bn_relu(econv(x, p['w1a'], p['b1a'], p['w1b'], p['b1b']), p['g1'], p['be1'])
    o = bn_relu(econv(o, p['w2a'], p['b2a'], p['w2b'], p['b2b']), p['g2'], p['be2'])
    o = bn_relu(econv(o, p['w3a'], p['b3a'], p['w3b'], p['b3b']), p['g3'], p['be3'])
    o = o.reshape(B, -1)
    h = jnp.maximum(o @ p['wm1'] + p['bm1'], 0.0)
    h = jnp.maximum(h @ p['wm2'] + p['bm2'], 0.0)
    h = jnp.maximum(h @ p['wm3'] + p['bm3'], 0.0)
    value = h @ p['wv'] + p['bv']
    adv = jnp.einsum('bh,nhk->bnk', h, p['wa']) + p['bah'][None]
    return value[:, :, None] + adv - adv.mean(axis=2, keepdims=True)


if __name__ == "__main__":
    STATE = 8        # nodes per graph == feature size after convs
    B = 4            # batch of graphs
    N_ACTIONS = 3    # number_of_actions (branching heads)

    key = jax.random.PRNGKey(0)
    kx, kp = jax.random.split(key)
    x = jax.random.normal(kx, (B, STATE, 2), jnp.float32)

    # ring graph, both directions -> E = 2*STATE edges, shared across batch
    idx = jnp.arange(STATE)
    edge_index = jnp.stack([jnp.concatenate([idx, idx]),
                            jnp.concatenate([(idx + 1) % STATE, (idx - 1) % STATE])])

    params = init_params(kp, STATE, N_ACTIONS)

    q = jax.block_until_ready(gbdq_pallas(x, edge_index, params, N_ACTIONS))
    q_ref = jax.block_until_ready(gbdq_reference(x, edge_index, params))

    assert q.shape == (B, N_ACTIONS, 2), q.shape
    err = float(jnp.max(jnp.abs(q - q_ref)))
    assert err < 1e-2, f"max abs diff {err}"
    print("KERNEL_OK")
</pallas_src>

<mosaic_0001>
module attributes {stable_mosaic.version = 11 : i64} {
  func.func @kernel(%arg0: memref<8x8xf32, #tpu.memory_space<vmem>>, %arg1: memref<24x16xf32, #tpu.memory_space<vmem>>, %arg2: memref<1008x256xf32, #tpu.memory_space<vmem>>, %arg3: memref<1552x256xf32, #tpu.memory_space<vmem>>, %arg4: memref<6x4xf32, #tpu.memory_space<vmem>>) attributes {dimension_semantics = [], scalar_prefetch = 0 : i64, scratch_operands = 0 : i64, tpu.core_type = #tpu.core_type<tc>} {
    %c0 = arith.constant 0 : index
    %c0_0 = arith.constant 0 : index
    %0 = vector.load %arg1[%c0, %c0_0] : memref<24x16xf32, #tpu.memory_space<vmem>>, vector<16x16xf32>
    %c16 = arith.constant 16 : index
    %c0_1 = arith.constant 0 : index
    %1 = vector.load %arg1[%c16, %c0_1] : memref<24x16xf32, #tpu.memory_space<vmem>>, vector<8x16xf32>
    %c0_2 = arith.constant 0 : index
    %c0_3 = arith.constant 0 : index
    %2 = vector.load %arg0[%c0_2, %c0_3] : memref<8x8xf32, #tpu.memory_space<vmem>>, vector<8x8xf32>
    %c0_4 = arith.constant 0 : index
    %c0_5 = arith.constant 0 : index
    %3 = vector.load %arg2[%c0_4, %c0_5] : memref<1008x256xf32, #tpu.memory_space<vmem>>, vector<8x256xf32>
    %c8 = arith.constant 8 : index
    %c0_6 = arith.constant 0 : index
    %4 = vector.load %arg2[%c8, %c0_6] : memref<1008x256xf32, #tpu.memory_space<vmem>>, vector<8x256xf32>
    %c16_7 = arith.constant 16 : index
    %c0_8 = arith.constant 0 : index
    %5 = vector.load %arg2[%c16_7, %c0_8] : memref<1008x256xf32, #tpu.memory_space<vmem>>, vector<256x32xf32>
    %c272 = arith.constant 272 : index
    %c0_9 = arith.constant 0 : index
    %6 = vector.load %arg2[%c272, %c0_9] : memref<1008x256xf32, #tpu.memory_space<vmem>>, vector<1x256xf32>
    %c280 = arith.constant 280 : index
    %c0_10 = arith.constant 0 : index
    %7 = vector.load %arg2[%c280, %c0_10] : memref<1008x256xf32, #tpu.memory_space<vmem>>, vector<1x32xf32>
    %c288 = arith.constant 288 : index
    %c0_11 = arith.constant 0 : index
    %8 = vector.load %arg2[%c288, %c0_11] : memref<1008x256xf32, #tpu.memory_space<vmem>>, vector<8x1xf32>
    %c296 = arith.constant 296 : index
    %c0_12 = arith.constant 0 : index
    %9 = vector.load %arg2[%c296, %c0_12] : memref<1008x256xf32, #tpu.memory_space<vmem>>, vector<8x1xf32>
    %cst = arith.constant dense<0.000000e+00> : vector<8x256xf32>
    %10 = tpu.matmul %2, %3, %cst {dimension_numbers = #tpu.dot_dimension_numbers<[1], [0], [0], [1], [0, 0, 1, 1], [], []>} : vector<8x8xf32>, vector<8x256xf32>, vector<8x256xf32> -> vector<8x256xf32>
    %11 = vector.broadcast %6 : vector<1x256xf32> to vector<8x256xf32>
    %12 = arith.addf %10, %11 : vector<8x256xf32>
    %cst_13 = arith.constant dense<0.000000e+00> : vector<8x256xf32>
    %13 = tpu.matmul %2, %4, %cst_13 {dimension_numbers = #tpu.dot_dimension_numbers<[1], [0], [0], [1], [0, 0, 1, 1], [], []>} : vector<8x8xf32>, vector<8x256xf32>, vector<8x256xf32> -> vector<8x256xf32>
    %14 = tpu.concatenate %12, %13 in 0 : vector<8x256xf32>, vector<8x256xf32> -> vector<16x256xf32>
    %cst_14 = arith.constant dense<0.000000e+00> : vector<16x256xf32>
    %15 = tpu.matmul %0, %14, %cst_14 {dimension_numbers = #tpu.dot_dimension_numbers<[1], [0], [0], [1], [0, 0, 1, 1], [], []>} : vector<16x16xf32>, vector<16x256xf32>, vector<16x256xf32> -> vector<16x256xf32>
    %cst_15 = arith.constant 0.000000e+00 : f32
    %16 = vector.broadcast %cst_15 : f32 to vector<16x256xf32>
    %17 = arith.maximumf %15, %16 : vector<16x256xf32>
    %cst_16 = arith.constant dense<0.000000e+00> : vector<16x32xf32>
    %18 = tpu.matmul %17, %5, %cst_16 {dimension_numbers = #tpu.dot_dimension_numbers<[1], [0], [0], [1], [0, 0, 1, 1], [], []>} : vector<16x256xf32>, vector<256x32xf32>, vector<16x32xf32> -> vector<16x32xf32>
    %19 = vector.broadcast %7 : vector<1x32xf32> to vector<16x32xf32>
    %20 = arith.addf %18, %19 : vector<16x32xf32>
    %cst_17 = arith.constant dense<0.000000e+00> : vector<8x32xf32>
    %21 = tpu.matmul %1, %20, %cst_17 {dimension_numbers = #tpu.dot_dimension_numbers<[1], [0], [0], [1], [0, 0, 1, 1], [], []>} : vector<8x16xf32>, vector<16x32xf32>, vector<8x32xf32> -> vector<8x32xf32>
    %cst_18 = arith.constant dense<0.000000e+00> : vector<8xf32>
    %22 = vector.multi_reduction <add>, %21, %cst_18 [1] : vector<8x32xf32> to vector<8xf32>
    %23 = vector.shape_cast %22 : vector<8xf32> to vector<8x1xf32>
    %cst_19 = arith.constant 3.200000e+01 : f32
    %24 = vector.broadcast %cst_19 : f32 to vector<8x1xf32>
    %25 = arith.divf %23, %24 : vector<8x1xf32>
    %26 = arith.mulf %21, %21 : vector<8x32xf32>
    %cst_20 = arith.constant dense<0.000000e+00> : vector<8xf32>
    %27 = vector.multi_reduction <add>, %26, %cst_20 [1] : vector<8x32xf32> to vector<8xf32>
    %28 = vector.shape_cast %27 : vector<8xf32> to vector<8x1xf32>
    %cst_21 = arith.constant 3.200000e+01 : f32
    %29 = vector.broadcast %cst_21 : f32 to vector<8x1xf32>
    %30 = arith.divf %28, %29 : vector<8x1xf32>
    %31 = arith.mulf %25, %25 : vector<8x1xf32>
    %32 = arith.subf %30, %31 : vector<8x1xf32>
    %33 = vector.broadcast %25 : vector<8x1xf32> to vector<8x32xf32>
    %34 = arith.subf %21, %33 : vector<8x32xf32>
    %cst_22 = arith.constant 9.99999974E-6 : f32
    %35 = vector.broadcast %cst_22 : f32 to vector<8x1xf32>
    %36 = arith.addf %32, %35 : vector<8x1xf32>
    %37 = math.rsqrt %36 : vector<8x1xf32>
    %38 = vector.broadcast %37 : vector<8x1xf32> to vector<8x32xf32>
    %39 = arith.mulf %34, %38 : vector<8x32xf32>
    %40 = vector.broadcast %8 : vector<8x1xf32> to vector<8x32xf32>
    %41 = arith.mulf %39, %40 : vector<8x32xf32>
    %42 = vector.broadcast %9 : vector<8x1xf32> to vector<8x32xf32>
    %43 = arith.addf %41, %42 : vector<8x32xf32>
    %cst_23 = arith.constant 0.000000e+00 : f32
    %44 = vector.broadcast %cst_23 : f32 to vector<8x32xf32>
    %45 = arith.maximumf %43, %44 : vector<8x32xf32>
    %c304 = arith.constant 304 : index
    %c0_24 = arith.constant 0 : index
    %46 = vector.load %arg2[%c304, %c0_24] : memref<1008x256xf32, #tpu.memory_space<vmem>>, vector<32x256xf32>
    %c336 = arith.constant 336 : index
    %c0_25 = arith.constant 0 : index
    %47 = vector.load %arg2[%c336, %c0_25] : memref<1008x256xf32, #tpu.memory_space<vmem>>, vector<32x256xf32>
    %c368 = arith.constant 368 : index
    %c0_26 = arith.constant 0 : index
    %48 = vector.load %arg2[%c368, %c0_26] : memref<1008x256xf32, #tpu.memory_space<vmem>>, vector<256x32xf32>
    %c624 = arith.constant 624 : index
    %c0_27 = arith.constant 0 : index
    %49 = vector.load %arg2[%c624, %c0_27] : memref<1008x256xf32, #tpu.memory_space<vmem>>, vector<1x256xf32>
    %c632 = arith.constant 632 : index
    %c0_28 = arith.constant 0 : index
    %50 = vector.load %arg2[%c632, %c0_28] : memref<1008x256xf32, #tpu.memory_space<vmem>>, vector<1x32xf32>
    %c640 = arith.constant 640 : index
    %c0_29 = arith.constant 0 : index
    %51 = vector.load %arg2[%c640, %c0_29] : memref<1008x256xf32, #tpu.memory_space<vmem>>, vector<8x1xf32>
    %c648 = arith.constant 648 : index
    %c0_30 = arith.constant 0 : index
    %52 = vector.load %arg2[%c648, %c0_30] : memref<1008x256xf32, #tpu.memory_space<vmem>>, vector<8x1xf32>
    %cst_31 = arith.constant dense<0.000000e+00> : vector<8x256xf32>
    %53 = tpu.matmul %45, %46, %cst_31 {dimension_numbers = #tpu.dot_dimension_numbers<[1], [0], [0], [1], [0, 0, 1, 1], [], []>} : vector<8x32xf32>, vector<32x256xf32>, vector<8x256xf32> -> vector<8x256xf32>
    %54 = vector.broadcast %49 : vector<1x256xf32> to vector<8x256xf32>
    %55 = arith.addf %53, %54 : vector<8x256xf32>
    %cst_32 = arith.constant dense<0.000000e+00> : vector<8x256xf32>
    %56 = tpu.matmul %45, %47, %cst_32 {dimension_numbers = #tpu.dot_dimension_numbers<[1], [0], [0], [1], [0, 0, 1, 1], [], []>} : vector<8x32xf32>, vector<32x256xf32>, vector<8x256xf32> -> vector<8x256xf32>
    %57 = tpu.concatenate %55, %56 in 0 : vector<8x256xf32>, vector<8x256xf32> -> vector<16x256xf32>
    %cst_33 = arith.constant dense<0.000000e+00> : vector<16x256xf32>
    %58 = tpu.matmul %0, %57, %cst_33 {dimension_numbers = #tpu.dot_dimension_numbers<[1], [0], [0], [1], [0, 0, 1, 1], [], []>} : vector<16x16xf32>, vector<16x256xf32>, vector<16x256xf32> -> vector<16x256xf32>
    %cst_34 = arith.constant 0.000000e+00 : f32
    %59 = vector.broadcast %cst_34 : f32 to vector<16x256xf32>
    %60 = arith.maximumf %58, %59 : vector<16x256xf32>
    %cst_35 = arith.constant dense<0.000000e+00> : vector<16x32xf32>
    %61 = tpu.matmul %60, %48, %cst_35 {dimension_numbers = #tpu.dot_dimension_numbers<[1], [0], [0], [1], [0, 0, 1, 1], [], []>} : vector<16x256xf32>, vector<256x32xf32>, vector<16x32xf32> -> vector<16x32xf32>
    %62 = vector.broadcast %50 : vector<1x32xf32> to vector<16x32xf32>
    %63 = arith.addf %61, %62 : vector<16x32xf32>
    %cst_36 = arith.constant dense<0.000000e+00> : vector<8x32xf32>
    %64 = tpu.matmul %1, %63, %cst_36 {dimension_numbers = #tpu.dot_dimension_numbers<[1], [0], [0], [1], [0, 0, 1, 1], [], []>} : vector<8x16xf32>, vector<16x32xf32>, vector<8x32xf32> -> vector<8x32xf32>
    %cst_37 = arith.constant dense<0.000000e+00> : vector<8xf32>
    %65 = vector.multi_reduction <add>, %64, %cst_37 [1] : vector<8x32xf32> to vector<8xf32>
    %66 = vector.shape_cast %65 : vector<8xf32> to vector<8x1xf32>
    %cst_38 = arith.constant 3.200000e+01 : f32
    %67 = vector.broadcast %cst_38 : f32 to vector<8x1xf32>
    %68 = arith.divf %66, %67 : vector<8x1xf32>
    %69 = arith.mulf %64, %64 : vector<8x32xf32>
    %cst_39 = arith.constant dense<0.000000e+00> : vector<8xf32>
    %70 = vector.multi_reduction <add>, %69, %cst_39 [1] : vector<8x32xf32> to vector<8xf32>
    %71 = vector.shape_cast %70 : vector<8xf32> to vector<8x1xf32>
    %cst_40 = arith.constant 3.200000e+01 : f32
    %72 = vector.broadcast %cst_40 : f32 to vector<8x1xf32>
    %73 = arith.divf %71, %72 : vector<8x1xf32>
    %74 = arith.mulf %68, %68 : vector<8x1xf32>
    %75 = arith.subf %73, %74 : vector<8x1xf32>
    %76 = vector.broadcast %68 : vector<8x1xf32> to vector<8x32xf32>
    %77 = arith.subf %64, %76 : vector<8x32xf32>
    %cst_41 = arith.constant 9.99999974E-6 : f32
    %78 = vector.broadcast %cst_41 : f32 to vector<8x1xf32>
    %79 = arith.addf %75, %78 : vector<8x1xf32>
    %80 = math.rsqrt %79 : vector<8x1xf32>
    %81 = vector.broadcast %80 : vector<8x1xf32> to vector<8x32xf32>
    %82 = arith.mulf %77, %81 : vector<8x32xf32>
    %83 = vector.broadcast %51 : vector<8x1xf32> to vector<8x32xf32>
    %84 = arith.mulf %82, %83 : vector<8x32xf32>
    %85 = vector.broadcast %52 : vector<8x1xf32> to vector<8x32xf32>
    %86 = arith.addf %84, %85 : vector<8x32xf32>
    %cst_42 = arith.constant 0.000000e+00 : f32
    %87 = vector.broadcast %cst_42 : f32 to vector<8x32xf32>
    %88 = arith.maximumf %86, %87 : vector<8x32xf32>
    %c656 = arith.constant 656 : index
    %c0_43 = arith.constant 0 : index
    %89 = vector.load %arg2[%c656, %c0_43] : memref<1008x256xf32, #tpu.memory_space<vmem>>, vector<32x256xf32>
    %c688 = arith.constant 688 : index
    %c0_44 = arith.constant 0 : index
    %90 = vector.load %arg2[%c688, %c0_44] : memref<1008x256xf32, #tpu.memory_space<vmem>>, vector<32x256xf32>
    %c720 = arith.constant 720 : index
    %c0_45 = arith.constant 0 : index
    %91 = vector.load %arg2[%c720, %c0_45] : memref<1008x256xf32, #tpu.memory_space<vmem>>, vector<256x32xf32>
    %c976 = arith.constant 976 : index
    %c0_46 = arith.constant 0 : index
    %92 = vector.load %arg2[%c976, %c0_46] : memref<1008x256xf32, #tpu.memory_space<vmem>>, vector<1x256xf32>
    %c984 = arith.constant 984 : index
    %c0_47 = arith.constant 0 : index
    %93 = vector.load %arg2[%c984, %c0_47] : memref<1008x256xf32, #tpu.memory_space<vmem>>, vector<1x32xf32>
    %c992 = arith.constant 992 : index
    %c0_48 = arith.constant 0 : index
    %94 = vector.load %arg2[%c992, %c0_48] : memref<1008x256xf32, #tpu.memory_space<vmem>>, vector<8x1xf32>
    %c1000 = arith.constant 1000 : index
    %c0_49 = arith.constant 0 : index
    %95 = vector.load %arg2[%c1000, %c0_49] : memref<1008x256xf32, #tpu.memory_space<vmem>>, vector<8x1xf32>
    %cst_50 = arith.constant dense<0.000000e+00> : vector<8x256xf32>
    %96 = tpu.matmul %88, %89, %cst_50 {dimension_numbers = #tpu.dot_dimension_numbers<[1], [0], [0], [1], [0, 0, 1, 1], [], []>} : vector<8x32xf32>, vector<32x256xf32>, vector<8x256xf32> -> vector<8x256xf32>
    %97 = vector.broadcast %92 : vector<1x256xf32> to vector<8x256xf32>
    %98 = arith.addf %96, %97 : vector<8x256xf32>
    %cst_51 = arith.constant dense<0.000000e+00> : vector<8x256xf32>
    %99 = tpu.matmul %88, %90, %cst_51 {dimension_numbers = #tpu.dot_dimension_numbers<[1], [0], [0], [1], [0, 0, 1, 1], [], []>} : vector<8x32xf32>, vector<32x256xf32>, vector<8x256xf32> -> vector<8x256xf32>
    %100 = tpu.concatenate %98, %99 in 0 : vector<8x256xf32>, vector<8x256xf32> -> vector<16x256xf32>
    %cst_52 = arith.constant dense<0.000000e+00> : vector<16x256xf32>
    %101 = tpu.matmul %0, %100, %cst_52 {dimension_numbers = #tpu.dot_dimension_numbers<[1], [0], [0], [1], [0, 0, 1, 1], [], []>} : vector<16x16xf32>, vector<16x256xf32>, vector<16x256xf32> -> vector<16x256xf32>
    %cst_53 = arith.constant 0.000000e+00 : f32
    %102 = vector.broadcast %cst_53 : f32 to vector<16x256xf32>
    %103 = arith.maximumf %101, %102 : vector<16x256xf32>
    %cst_54 = arith.constant dense<0.000000e+00> : vector<16x32xf32>
    %104 = tpu.matmul %103, %91, %cst_54 {dimension_numbers = #tpu.dot_dimension_numbers<[1], [0], [0], [1], [0, 0, 1, 1], [], []>} : vector<16x256xf32>, vector<256x32xf32>, vector<16x32xf32> -> vector<16x32xf32>
    %105 = vector.broadcast %93 : vector<1x32xf32> to vector<16x32xf32>
    %106 = arith.addf %104, %105 : vector<16x32xf32>
    %cst_55 = arith.constant dense<0.000000e+00> : vector<8x32xf32>
    %107 = tpu.matmul %1, %106, %cst_55 {dimension_numbers = #tpu.dot_dimension_numbers<[1], [0], [0], [1], [0, 0, 1, 1], [], []>} : vector<8x16xf32>, vector<16x32xf32>, vector<8x32xf32> -> vector<8x32xf32>
    %cst_56 = arith.constant dense<0.000000e+00> : vector<8xf32>
    %108 = vector.multi_reduction <add>, %107, %cst_56 [1] : vector<8x32xf32> to vector<8xf32>
    %109 = vector.shape_cast %108 : vector<8xf32> to vector<8x1xf32>
    %cst_57 = arith.constant 3.200000e+01 : f32
    %110 = vector.broadcast %cst_57 : f32 to vector<8x1xf32>
    %111 = arith.divf %109, %110 : vector<8x1xf32>
    %112 = arith.mulf %107, %107 : vector<8x32xf32>
    %cst_58 = arith.constant dense<0.000000e+00> : vector<8xf32>
    %113 = vector.multi_reduction <add>, %112, %cst_58 [1] : vector<8x32xf32> to vector<8xf32>
    %114 = vector.shape_cast %113 : vector<8xf32> to vector<8x1xf32>
    %cst_59 = arith.constant 3.200000e+01 : f32
    %115 = vector.broadcast %cst_59 : f32 to vector<8x1xf32>
    %116 = arith.divf %114, %115 : vector<8x1xf32>
    %117 = arith.mulf %111, %111 : vector<8x1xf32>
    %118 = arith.subf %116, %117 : vector<8x1xf32>
    %119 = vector.broadcast %111 : vector<8x1xf32> to vector<8x32xf32>
    %120 = arith.subf %107, %119 : vector<8x32xf32>
    %cst_60 = arith.constant 9.99999974E-6 : f32
    %121 = vector.broadcast %cst_60 : f32 to vector<8x1xf32>
    %122 = arith.addf %118, %121 : vector<8x1xf32>
    %123 = math.rsqrt %122 : vector<8x1xf32>
    %124 = vector.broadcast %123 : vector<8x1xf32> to vector<8x32xf32>
    %125 = arith.mulf %120, %124 : vector<8x32xf32>
    %126 = vector.broadcast %94 : vector<8x1xf32> to vector<8x32xf32>
    %127 = arith.mulf %125, %126 : vector<8x32xf32>
    %128 = vector.broadcast %95 : vector<8x1xf32> to vector<8x32xf32>
    %129 = arith.addf %127, %128 : vector<8x32xf32>
    %cst_61 = arith.constant 0.000000e+00 : f32
    %130 = vector.broadcast %cst_61 : f32 to vector<8x32xf32>
    %131 = arith.maximumf %129, %130 : vector<8x32xf32>
    %132 = vector.extract_strided_slice %131 {offsets = [0, 0], sizes = [8, 4], strides = [1, 1]} : vector<8x32xf32> to vector<8x4xf32>
    %133 = vector.extract_strided_slice %131 {offsets = [0, 4], sizes = [8, 4], strides = [1, 1]} : vector<8x32xf32> to vector<8x4xf32>
    %134 = vector.extract_strided_slice %131 {offsets = [0, 8], sizes = [8, 4], strides = [1, 1]} : vector<8x32xf32> to vector<8x4xf32>
    %135 = vector.extract_strided_slice %131 {offsets = [0, 12], sizes = [8, 4], strides = [1, 1]} : vector<8x32xf32> to vector<8x4xf32>
    %136 = vector.extract_strided_slice %131 {offsets = [0, 16], sizes = [8, 4], strides = [1, 1]} : vector<8x32xf32> to vector<8x4xf32>
    %137 = vector.extract_strided_slice %131 {offsets = [0, 20], sizes = [8, 4], strides = [1, 1]} : vector<8x32xf32> to vector<8x4xf32>
    %138 = vector.extract_strided_slice %131 {offsets = [0, 24], sizes = [8, 4], strides = [1, 1]} : vector<8x32xf32> to vector<8x4xf32>
    %139 = vector.extract_strided_slice %131 {offsets = [0, 28], sizes = [8, 4], strides = [1, 1]} : vector<8x32xf32> to vector<8x4xf32>
    %140 = tpu.concatenate %132, %133, %134, %135, %136, %137, %138, %139 in 0 : vector<8x4xf32>, vector<8x4xf32>, vector<8x4xf32>, vector<8x4xf32>, vector<8x4xf32>, vector<8x4xf32>, vector<8x4xf32>, vector<8x4xf32> -> vector<64x4xf32>
    %c0_62 = arith.constant 0 : index
    %c0_63 = arith.constant 0 : index
    %141 = vector.load %arg3[%c0_62, %c0_63] : memref<1552x256xf32, #tpu.memory_space<vmem>>, vector<256x64xf32>
    %c256 = arith.constant 256 : index
    %c0_64 = arith.constant 0 : index
    %142 = vector.load %arg3[%c256, %c0_64] : memref<1552x256xf32, #tpu.memory_space<vmem>>, vector<256x256xf32>
    %c512 = arith.constant 512 : index
    %c0_65 = arith.constant 0 : index
    %143 = vector.load %arg3[%c512, %c0_65] : memref<1552x256xf32, #tpu.memory_space<vmem>>, vector<256x256xf32>
    %c768 = arith.constant 768 : index
    %c0_66 = arith.constant 0 : index
    %144 = vector.load %arg3[%c768, %c0_66] : memref<1552x256xf32, #tpu.memory_space<vmem>>, vector<6x256xf32>
    %c776 = arith.constant 776 : index
    %c0_67 = arith.constant 0 : index
    %145 = vector.load %arg3[%c776, %c0_67] : memref<1552x256xf32, #tpu.memory_space<vmem>>, vector<256x1xf32>
    %c1032 = arith.constant 1032 : index
    %c0_68 = arith.constant 0 : index
    %146 = vector.load %arg3[%c1032, %c0_68] : memref<1552x256xf32, #tpu.memory_space<vmem>>, vector<256x1xf32>
    %c1288 = arith.constant 1288 : index
    %c0_69 = arith.constant 0 : index
    %147 = vector.load %arg3[%c1288, %c0_69] : memref<1552x256xf32, #tpu.memory_space<vmem>>, vector<256x1xf32>
    %c1544 = arith.constant 1544 : index
    %c0_70 = arith.constant 0 : index
    %148 = vector.load %arg3[%c1544, %c0_70] : memref<1552x256xf32, #tpu.memory_space<vmem>>, vector<6x1xf32>
    %cst_71 = arith.constant dense<0.000000e+00> : vector<256x4xf32>
    %149 = tpu.matmul %141, %140, %cst_71 {dimension_numbers = #tpu.dot_dimension_numbers<[1], [0], [0], [1], [0, 0, 1, 1], [], []>} : vector<256x64xf32>, vector<64x4xf32>, vector<256x4xf32> -> vector<256x4xf32>
    %150 = vector.broadcast %145 : vector<256x1xf32> to vector<256x4xf32>
    %151 = arith.addf %149, %150 : vector<256x4xf32>
    %cst_72 = arith.constant 0.000000e+00 : f32
    %152 = vector.broadcast %cst_72 : f32 to vector<256x4xf32>
    %153 = arith.maximumf %151, %152 : vector<256x4xf32>
    %cst_73 = arith.constant dense<0.000000e+00> : vector<256x4xf32>
    %154 = tpu.matmul %142, %153, %cst_73 {dimension_numbers = #tpu.dot_dimension_numbers<[1], [0], [0], [1], [0, 0, 1, 1], [], []>} : vector<256x256xf32>, vector<256x4xf32>, vector<256x4xf32> -> vector<256x4xf32>
    %155 = vector.broadcast %146 : vector<256x1xf32> to vector<256x4xf32>
    %156 = arith.addf %154, %155 : vector<256x4xf32>
    %cst_74 = arith.constant 0.000000e+00 : f32
    %157 = vector.broadcast %cst_74 : f32 to vector<256x4xf32>
    %158 = arith.maximumf %156, %157 : vector<256x4xf32>
    %cst_75 = arith.constant dense<0.000000e+00> : vector<256x4xf32>
    %159 = tpu.matmul %143, %158, %cst_75 {dimension_numbers = #tpu.dot_dimension_numbers<[1], [0], [0], [1], [0, 0, 1, 1], [], []>} : vector<256x256xf32>, vector<256x4xf32>, vector<256x4xf32> -> vector<256x4xf32>
    %160 = vector.broadcast %147 : vector<256x1xf32> to vector<256x4xf32>
    %161 = arith.addf %159, %160 : vector<256x4xf32>
    %cst_76 = arith.constant 0.000000e+00 : f32
    %162 = vector.broadcast %cst_76 : f32 to vector<256x4xf32>
    %163 = arith.maximumf %161, %162 : vector<256x4xf32>
    %cst_77 = arith.constant dense<0.000000e+00> : vector<6x4xf32>
    %164 = tpu.matmul %144, %163, %cst_77 {dimension_numbers = #tpu.dot_dimension_numbers<[1], [0], [0], [1], [0, 0, 1, 1], [], []>} : vector<6x256xf32>, vector<256x4xf32>, vector<6x4xf32> -> vector<6x4xf32>
    %165 = vector.broadcast %148 : vector<6x1xf32> to vector<6x4xf32>
    %166 = arith.addf %164, %165 : vector<6x4xf32>
    %c0_78 = arith.constant 0 : index
    %c0_79 = arith.constant 0 : index
    %167 = vector.load %arg4[%c0_78, %c0_79] : memref<6x4xf32, #tpu.memory_space<vmem>>, vector<6x4xf32>
    tpu.vector_store %arg4[%c0_78, %c0_79], %166 {strides = array<i32>} : memref<6x4xf32, #tpu.memory_space<vmem>>, vector<6x4xf32>,
    return
  }
}

</mosaic_0001>

<bundles_post_ra>
// kernel: tpu_custom_call.1
= control target key start
LH: loop header
LB: loop body
LE: loop exit
PB: predicated region body
PF: predicated region fallthrough
CT: control target
= control target key end

     0   :  { %9 = vsyncpa [#allocation3], 0  ;;  %s3965_s0 = inlined_call_operand.hbm [shape: f32[8,8], index: 0, kind: input, shape index: {}]   ;;  %s3966_s1 = inlined_call_operand.vmem [shape: f32[24,16], index: 1, kind: input, shape index: {}]   ;;  %s3967_s2 = inlined_call_operand.hbm [shape: f32[1008,256], index: 2, kind: input, shape index: {}]   ;;  %s3968_s3 = inlined_call_operand.hbm [shape: f32[1552,256], index: 3, kind: input, shape index: {}]   ;;  %s3969_s4 = inlined_call_operand.vmem [shape: f32[6,4], index: 4, kind: output, shape index: {}]  }
   0x1   :  { %10 = vsyncpa [#allocation5], 0  ;;  %s3579_s15 = smov [#allocation4]  }
   0x2   :  { %s28_s16 = sshll.u32 %s3579_s15, 4  ;;  %s29_s16 = int_to_ptr.vmem [resolvable:$true] %s28_s16 }
   0x3   :  { %s3523_s17 = scalar_lea.vmem %s29_s16, 32256  ;;  %p3528_p1 = scmp.lt.s32.totalorder %s29_s16, %s29_s16 }
   0x4   :  { %p3524_p0 = scmp.ne.s32.totalorder %s29_s16, %s3523_s17  ;;  %p3529_p2 = scmp.lt.s32.totalorder %s3523_s17, %s3523_s17 }
   0x6   :  { %p3530_p3 = por %p3529_p2, %p3528_p1 }
   0x8   :  { %p3531_p4 = pnand %p3530_p3, %p3524_p0 }
   0xa   :  { %3534 = shalt.err (!%p3531_p4)
}
   0xb   :  { %s3580_s18 = smov 256   ;;  %s3581_s19 = smov 16  }
   0xc   :  { %34 = dma.hbm_to_vmem [thread:$0]  %s3967_s2, 32256, %s29_s16, [#allocation5], %s3580_s18, %s3580_s18, %s3581_s19  }
   0xd   :  { %s3582_s22 = smov [#allocation2]   ;;  %s3583_s24 = smov [#allocation6]  }
   0xe   :  { %s17_s23 = sshll.u32 %s3582_s22, 4  ;;  %s40_s25 = sshll.u32 %s3583_s24, 4  ;;  %s18_s23 = int_to_ptr.vmem [resolvable:$true] %s17_s23  ;;  %s41_s25 = int_to_ptr.vmem [resolvable:$true] %s40_s25 }
   0xf   :  { %s3543_s26 = scalar_lea.vmem %s18_s23, 128  ;;  %p3548_p6 = scmp.lt.s32.totalorder %s18_s23, %s18_s23 }
  0x10   :  { %p3544_p5 = scmp.ne.s32.totalorder %s18_s23, %s3543_s26  ;;  %p3549_p7 = scmp.lt.s32.totalorder %s3543_s26, %s3543_s26 }
  0x12   :  { %p3550_p8 = por %p3549_p7, %p3548_p6 }
  0x14   :  { %p3551_p9 = pnand %p3550_p8, %p3544_p5 }
  0x16   :  { %3554 = shalt.err (!%p3551_p9)
}
  0x17   :  { %20 = dma.hbm_to_vmem [thread:$0]  %s3965_s0, 128, %s18_s23, [#allocation3]  }
  0x18   :  { %s3563_s29 = scalar_lea.vmem %s41_s25, 49664  ;;  %p3568_p11 = scmp.lt.s32.totalorder %s41_s25, %s41_s25 }
  0x19   :  { %p3564_p10 = scmp.ne.s32.totalorder %s41_s25, %s3563_s29  ;;  %p3569_p12 = scmp.lt.s32.totalorder %s3563_s29, %s3563_s29 }
  0x1b   :  { %p3570_p13 = por %p3569_p12, %p3568_p11 }
  0x1d   :  { %p3571_p0 = pnand %p3570_p13, %p3564_p10 }
  0x1f   :  { %3574 = shalt.err (!%p3571_p0)
}
  0x20   :  { %46 = dma.hbm_to_vmem [thread:$0]  %s3968_s3, 49664, %s41_s25, [#allocation5], %s3580_s18, %s3580_s18, %s3581_s19  }
  0x21   :  { %3575 = dma.done.wait [#allocation3], 128  }
  0x22   :  { %3576 = vsyncadd [#allocation3], 4294967168 }
  0x23   :  { %3577 = dma.done.wait [#allocation5], 81920  }
  0x24   :  { %3578 = vsyncadd [#allocation5], 4294885376  ;;  %v3584_v0 = vmov 0.0   ;;  %v61_v1 = vld [vmem:[#allocation4 + $0x8] sm:$0xff]  ;;  %v63_v2 = vld [vmem:[#allocation4 + $0x18] sm:$0xff]  ;;  %vm112_vm0 = vcmask 64512   ;;  %v102_v32 = vlaneseq }
  0x25   :  { %180 = vmatprep.mubr.f32.mxu0 %v3584_v0  ;;  %251 = vmatprep.mubr.f32.mxu1 %v3584_v0  ;;  %v60_v3 = vld [vmem:[#allocation4] sm:$0xff]  ;;  %v62_v4 = vld [vmem:[#allocation4 + $0x10] sm:$0xff]  ;;  %v59_v5 = vld [vmem:[#allocation2] sm:$0xff]  ;;  %vm258_vm1 = vcmask 130048   ;;  %vm3585_vm2 = vmmov 0   ;;  %vm494_vm3 = vcmask 261120  }
  0x26   :  { %146 = vmatprep.subr.mxu0 %v61_v1  ;;  %217 = vmatprep.subr.mxu1 %v63_v2  ;;  %v95_v6 = vld [vmem:[#allocation4 + $0x210] sm:$0xff]  ;;  %v94_v8 = vld [vmem:[#allocation4 + $0x200] sm:$0xff]  ;;  %v103_v33 = vshrl.u32 %v102_v32, 7  ;;  %v3640_v45 = vld [vmem:[%s3966_s1] sm:$0xff]  ;;  %s3588_s9 = smov 100   ;;  %s3589_s10 = smov 116  }
  0x27   :  { %147 = vmatpush1.msra.mxu0 %v60_v3  ;;  %218 = vmatpush1.msra.mxu1 %v62_v4  ;;  %v79_v7 = vld [vmem:[#allocation4 + $0x110] sm:$0xff]  ;;  %v78_v9 = vld [vmem:[#allocation4 + $0x100] sm:$0xff]  ;;  %s3590_s11 = smov 104   ;;  %vm1891_vm4 = vcmask 523264   ;;  %s3591_s12 = smov 124   ;;  %vm3154_vm5 = vcmask 29696  }
  0x28   :  { %3162 = vmatmul.mubr.msk.f32.vlgmr.msra.gmra.mxu0 %vm112_vm0, %v59_v5  ;;  %3163 = vmatmul.mubr.msk.f32.vlgmr.msra.gmra.mxu1 %vm112_vm0, %v59_v5  ;;  %v93_v10 = vld [vmem:[#allocation4 + $0x1f0] sm:$0xff]  ;;  %v92_v12 = vld [vmem:[#allocation4 + $0x1e0] sm:$0xff]  ;;  %v3631_v34 = vsub.s32 1, %v103_v33  ;;  %v3633_v35 = vsub.s32 0, %v103_v33  ;;  %s3592_s13 = smov 112   ;;  %s3593_s14 = smov 120  }
  0x29   :  { %329 = vmatprep.mubr.f32.mxu0 %v3584_v0  ;;  %3209 = vmatprep.subr.mxu1 %v95_v6  ;;  %v77_v11 = vld [vmem:[#allocation4 + $0xf0] sm:$0xff]  ;;  %v76_v13 = vld [vmem:[#allocation4 + $0xe0] sm:$0xff] }
  0x2a   :  { %3210 = vmatpush3.msra.mxu1 %v79_v7  ;;  %v91_v14 = vld [vmem:[#allocation4 + $0x1d0] sm:$0xff]  ;;  %v90_v16 = vld [vmem:[#allocation4 + $0x1c0] sm:$0xff]  ;;  %v3661_v7 = vld [vmem:[%s3966_s1 + $0x10] sm:$0xff] }
  0x2b   :  { %3211 = vmatprep.subr.mxu1 %v94_v8  ;;  %v75_v15 = vld [vmem:[#allocation4 + $0xd0] sm:$0xff]  ;;  %v74_v17 = vld [vmem:[#allocation4 + $0xc0] sm:$0xff] }
  0x2c   :  { %3212 = vmatpush3.msra.mxu1 %v78_v9  ;;  %v89_v18 = vld [vmem:[#allocation4 + $0x1b0] sm:$0xff]  ;;  %v88_v20 = vld [vmem:[#allocation4 + $0x1a0] sm:$0xff]  ;;  %v3586_v9 = vmov 0  }
  0x2d   :  { %3213 = vmatprep.subr.mxu1 %v93_v10  ;;  %v73_v19 = vld [vmem:[#allocation4 + $0xb0] sm:$0xff]  ;;  %v72_v21 = vld [vmem:[#allocation4 + $0xa0] sm:$0xff]  ;;  %3507 = vset.pattern.permute.xlu1 %v3586_v9 }
  0x2e   :  { %3214 = vmatpush3.msra.mxu1 %v77_v11  ;;  %v87_v22 = vld [vmem:[#allocation4 + $0x190] sm:$0xff]  ;;  %v86_v24 = vld [vmem:[#allocation4 + $0x180] sm:$0xff]  ;;  %3508 = vset.pattern.permute.xlu0 %v3586_v9 }
  0x2f   :  { %3215 = vmatprep.subr.mxu1 %v92_v12  ;;  %v71_v23 = vld [vmem:[#allocation4 + $0x90] sm:$0xff]  ;;  %v70_v25 = vld [vmem:[#allocation4 + $0x80] sm:$0xff] }
  0x30   :  { %3216 = vmatpush3.msra.mxu1 %v76_v13  ;;  %v85_v26 = vld [vmem:[#allocation4 + $0x170] sm:$0xff]  ;;  %v84_v28 = vld [vmem:[#allocation4 + $0x160] sm:$0xff] }
  0x31   :  { %3217 = vmatprep.subr.mxu1 %v91_v14  ;;  %v69_v27 = vld [vmem:[#allocation4 + $0x70] sm:$0xff]  ;;  %v68_v29 = vld [vmem:[#allocation4 + $0x60] sm:$0xff] }
  0x32   :  { %3218 = vmatpush3.msra.mxu1 %v75_v15  ;;  %v83_v30 = vld [vmem:[#allocation4 + $0x150] sm:$0xff]  ;;  %v97_v36 = vld [vmem:[#allocation4 + $0x220] ss:$8 sm:$0x3] }
  0x33   :  { %3219 = vmatprep.subr.mxu1 %v90_v16  ;;  %v67_v31 = vld [vmem:[#allocation4 + $0x50] sm:$0xff]  ;;  %v109_v37 = vrot.slane %v97_v36, %v3631_v34  ;;  %v105_v38 = vrot.slane %v97_v36, %v3633_v35  ;;  %v3649_v46 = vld [vmem:[%s3966_s1 + $0x8] sm:$0xff]  ;;  %v531_v16 = vld [vmem:[#allocation4 + $0x298] sm:$0xff]  ;;  %s3587_s1 = smov 108  }
  0x34   :  { %3220 = vmatpush3.msra.mxu1 %v74_v17  ;;  %v82_v47 = vld [vmem:[#allocation4 + $0x140] sm:$0xff]  ;;  %v81_v49 = vld [vmem:[#allocation4 + $0x130] sm:$0xff] }
  0x35   :  { %3221 = vmatprep.subr.mxu1 %v89_v18  ;;  %v66_v48 = vld [vmem:[#allocation4 + $0x40] sm:$0xff]  ;;  %v65_v50 = vld [vmem:[#allocation4 + $0x30] sm:$0xff]  ;;  %v529_v18 = vld [vmem:[#allocation4 + $0x288] sm:$0xff] }
  0x36   :  { %3222 = vmatpush3.msra.mxu1 %v73_v19  ;;  %v80_v51 = vld [vmem:[#allocation4 + $0x120] sm:$0xff]  ;;  %v98_v4 = vld [vmem:[#allocation4 + $0x230] ss:$0 sm:$0xff] }
  0x37   :  { %3223 = vmatprep.subr.mxu1 %v88_v20  ;;  %v64_v52 = vld [vmem:[#allocation4 + $0x20] sm:$0xff]  ;;  %v100_v10 = vld [vmem:[#allocation4 + $0x250] sm:$0xff]  ;;  %v527_v20 = vld [vmem:[#allocation4 + $0x278] sm:$0xff] }
  0x38   :  { %3224 = vmatpush3.msra.mxu1 %v72_v21  ;;  %v99_v8 = vld [vmem:[#allocation4 + $0x240] sm:$0xff]  ;;  %v530_v17 = vld [vmem:[#allocation4 + $0x290] sm:$0xff] }
  0x39   :  { %3225 = vmatprep.subr.mxu1 %v87_v22  ;;  %513 = vperm.xlu1 %3507, %v99_v8   ;;  %v528_v19 = vld [vmem:[#allocation4 + $0x280] sm:$0xff]  ;;  %v526_v21 = vld [vmem:[#allocation4 + $0x270] sm:$0xff]  ;;  %v525_v22 = vld [vmem:[#allocation4 + $0x268] sm:$0xff] }
  0x3a   :  { %3226 = vmatpush3.msra.mxu1 %v71_v23  ;;  %v524_v23 = vld [vmem:[#allocation4 + $0x260] sm:$0xff] }
  0x3b   :  { %3227 = vmatprep.subr.mxu1 %v86_v24  ;;  %v539_v24 = vld [vmem:[#allocation4 + $0x2d8] sm:$0xff]  ;;  %v566_v8 = vld [vmem:[#allocation4 + $0x480] sm:$0xff] }
  0x3c   :  { %3228 = vmatpush3.msra.mxu1 %v70_v25  ;;  %v550_v9 = vld [vmem:[#allocation4 + $0x380] sm:$0xff] }
  0x3d   :  { %3229 = vmatprep.subr.mxu1 %v85_v26  ;;  %519 = vperm.xlu1 %3507, %v100_v10   ;;  %v565_v10 = vld [vmem:[#allocation4 + $0x470] sm:$0xff] }
  0x3e   :  { %3230 = vmatpush3.msra.mxu1 %v69_v27 }
  0x3f   :  { %3231 = vmatprep.subr.mxu1 %v84_v28 }
  0x40   :  { %3232 = vmatpush3.msra.mxu1 %v68_v29 }
  0x41   :  { %3233 = vmatprep.subr.mxu1 %v83_v30 }
  0x42   :  { %3234 = vmatpush3.msra.mxu1 %v67_v31 }
  0x43   :  { %3235 = vmatprep.subr.mxu1 %v82_v47  ;;  %v535_v47 = vld [vmem:[#allocation4 + $0x2b8] sm:$0xff] }
  0x44   :  { %3236 = vmatpush3.msra.mxu1 %v66_v48  ;;  %v534_v48 = vld [vmem:[#allocation4 + $0x2b0] sm:$0xff] }
  0x45   :  { %3237 = vmatprep.subr.mxu1 %v81_v49  ;;  %v533_v49 = vld [vmem:[#allocation4 + $0x2a8] sm:$0xff] }
  0x46   :  { %3238 = vmatpush3.msra.mxu1 %v65_v50  ;;  %v532_v50 = vld [vmem:[#allocation4 + $0x2a0] sm:$0xff] }
  0x47   :  { %3239 = vmatprep.subr.mxu1 %v80_v51 }
  0x48   :  { %3240 = vmatpush3.msra.mxu1 %v64_v52  ;;  %v573_v52 = vld [vmem:[#allocation4 + $0x4e0] ss:$8 sm:$0x3] }
  0x49   :  { %3414 = vmatprep.subr.mxu1 %v3584_v0 }
  0xb4   :  { %v514_v32 = vpop.permute.xlu1 %513 }
  0xe8   :  { %v182_v39 = vpop.f32.mrf.mxu0  ;;  %v253_v40 = vpop.f32.mrf.mxu1 }
  0xe9   :  { %v183_v44 = vadd.f32 %v182_v39, %v105_v38  ;;  %v520_v39 = vpop.permute.xlu1 %519 }
  0xea   :  { %v184_v41 = vpop.f32.mrf.mxu0  ;;  %v255_v42 = vpop.f32.mrf.mxu1 }
  0xeb   :  { %v185_v43 = vadd.f32 %v184_v41, %v109_v37  ;;  %293 = vmatprep.subr.mxu0 %v255_v42  ;;  %v538_v42 = vld [vmem:[#allocation4 + $0x2d0] sm:$0xff] }
  0xec   :  { %294 = vmatpush1.msra.mxu0 %v253_v40 }
  0xed   :  { %295 = vmatprep.subr.mxu0 %v185_v43  ;;  %v537_v43 = vld [vmem:[#allocation4 + $0x2c8] sm:$0xff] }
  0xee   :  { %296 = vmatpush1.msra.mxu0 %v183_v44  ;;  %v536_v44 = vld [vmem:[#allocation4 + $0x2c0] sm:$0xff] }
  0xef   :  { %3164 = vmatmul.mubr.msk.f32.vlgmr.msra.gmra.mxu0 %vm258_vm1, %v3640_v45  ;;  %3407 = vmatprep.subr.mxu0 %v3584_v0 }
  0xf0   :  { %335 = vmatprep.mubr.f32.mxu0 %v3584_v0 }
  0xf3   :  { %3165 = vmatmul.mubr.msk.f32.gmra.mxu0 %vm258_vm1, %v3649_v46 }
  0xf4   :  { %3411 = vmatprep.mubr.msk.f32.mxu0 %vm3585_vm2, %v3584_v0 }
 0x1af   :  { %v331_v53 = vpop.f32.mrf.mxu0 }
 0x1b0   :  { %v342_v56 = vmax.f32 %v331_v53, 0.0 }
 0x1b1   :  { %v333_v54 = vpop.f32.mrf.mxu0 }
 0x1b2   :  { %v343_v55 = vmax.f32 %v333_v54, 0.0  ;;  %v585_v54 = vrot.slane %v573_v52, %v3631_v34 }
 0x1b3   :  { %v337_v57 = vpop.f32.mrf.mxu0 }
 0x1b4   :  { %410 = vmatprep.mubr.f32.mxu1 %v343_v55  ;;  %v344_v60 = vmax.f32 %v337_v57, 0.0  ;;  %v581_v55 = vrot.slane %v573_v52, %v3633_v35 }
 0x1b5   :  { %v339_v58 = vpop.f32.mrf.mxu0  ;;  %411 = vmatmul.mubr.f32.vlgmr.msra.gmra.mxu1 %v342_v56 }
 0x1b6   :  { %v345_v59 = vmax.f32 %v339_v58, 0.0 }
 0x1b8   :  { %415 = vmatprep.mubr.f32.mxu1 %v345_v59 }
 0x1b9   :  { %416 = vmatmul.mubr.f32.gmra.mxu1 %v344_v60  ;;  %v571_v60 = vld [vmem:[#allocation4 + $0x4d0] sm:$0xff] }
 0x1ba   :  { %3418 = vmatprep.mubr.msk.f32.mxu1 %vm3585_vm2, %v3584_v0 }
 0x275   :  { %v3241_v61 = vpop.f32.mrf.mxu1 }
 0x277   :  { %v3242_v62 = vpop.f32.mrf.mxu1 }
 0x278   :  { %v3243_v2 = vadd.f32 %v3242_v62, %v3241_v61  ;;  %v555_v61 = vld [vmem:[#allocation4 + $0x3d0] sm:$0xff]  ;;  %v570_v62 = vld [vmem:[#allocation4 + $0x4c0] sm:$0xff] }
 0x279   :  { %v3244_v63 = vpop.f32.mrf.mxu1 }
 0x27a   :  { %v413_v6 = vadd.f32 %v3243_v2, %v98_v4  ;;  %v553_v2 = vld [vmem:[#allocation4 + $0x3b0] sm:$0xff] }
 0x27b   :  { %v3245_v1 = vpop.f32.mrf.mxu1 }
 0x27c   :  { %v3246_v3 = vadd.f32 %v3245_v1, %v3244_v63  ;;  %v554_v63 = vld [vmem:[#allocation4 + $0x3c0] sm:$0xff]  ;;  %v569_v1 = vld [vmem:[#allocation4 + $0x4b0] sm:$0xff] }
 0x27e   :  { %v418_v5 = vadd.f32 %v3246_v3, %v98_v4  ;;  %v568_v3 = vld [vmem:[#allocation4 + $0x4a0] sm:$0xff] }
 0x27f   :  { %v552_v4 = vld [vmem:[#allocation4 + $0x3a0] sm:$0xff] }
 0x280   :  { %3408 = vmatpush3.msra.mxu0 %v418_v5  ;;  %v567_v5 = vld [vmem:[#allocation4 + $0x490] sm:$0xff] }
 0x281   :  { %3409 = vmatprep.subr.mxu0 %v3584_v0 }
 0x282   :  { %3410 = vmatpush3.msra.mxu0 %v413_v6  ;;  %v551_v6 = vld [vmem:[#allocation4 + $0x390] sm:$0xff] }
 0x283   :  { %3412 = vmatmul.mubr.msk.f32.vlgmr.msra.gmra.mxu0 %vm258_vm1, %v3661_v7  ;;  %615 = vmatprep.subr.mxu0 %v531_v16  ;;  %v562_v16 = vld [vmem:[#allocation4 + $0x440] sm:$0xff] }
 0x284   :  { %655 = vmatprep.mubr.f32.mxu0 %v3584_v0  ;;  %616 = vmatpush1.msra.mxu0 %v530_v17  ;;  %v546_v17 = vld [vmem:[#allocation4 + $0x340] sm:$0xff] }
 0x285   :  { %617 = vmatprep.subr.mxu0 %v529_v18  ;;  %v561_v18 = vld [vmem:[#allocation4 + $0x430] sm:$0xff] }
 0x286   :  { %618 = vmatpush1.msra.mxu0 %v528_v19  ;;  %v545_v19 = vld [vmem:[#allocation4 + $0x330] sm:$0xff] }
 0x287   :  { %619 = vmatprep.subr.mxu0 %v527_v20  ;;  %v560_v20 = vld [vmem:[#allocation4 + $0x420] sm:$0xff] }
 0x288   :  { %620 = vmatpush1.msra.mxu0 %v526_v21  ;;  %v544_v21 = vld [vmem:[#allocation4 + $0x320] sm:$0xff] }
 0x289   :  { %621 = vmatprep.subr.mxu0 %v525_v22  ;;  %v559_v22 = vld [vmem:[#allocation4 + $0x410] sm:$0xff] }
 0x28a   :  { %622 = vmatpush1.msra.mxu0 %v524_v23  ;;  %v543_v23 = vld [vmem:[#allocation4 + $0x310] sm:$0xff] }
 0x28b   :  { %686 = vmatprep.subr.mxu0 %v539_v24  ;;  %v558_v24 = vld [vmem:[#allocation4 + $0x400] sm:$0xff] }
 0x343   :  { %v490_v11 = vpop.f32.mrf.mxu0 }
 0x344   :  { %v495_v12 = vsel %vm494_vm3, %v490_v11, 0.0  ;;  %v500_v13 = vmul.f32 %v490_v11, %v490_v11 }
 0x345   :  { %496 = vadd.xlane.f32.xlu0 %v495_v12  ;;  %v3413_v14 = vpop.f32.mrf.mxu0  ;;  %v564_v12 = vld [vmem:[#allocation4 + $0x460] sm:$0xff] }
 0x346   :  { %v501_v15 = vsel %vm494_vm3, %v500_v13, 0.0  ;;  %v548_v13 = vld [vmem:[#allocation4 + $0x360] sm:$0xff]  ;;  %v563_v14 = vld [vmem:[#allocation4 + $0x450] sm:$0xff] }
 0x349   :  { %502 = vadd.xlane.f32.xlu0 %v501_v15  ;;  %v547_v15 = vld [vmem:[#allocation4 + $0x350] sm:$0xff] }
 0x3ce   :  { %v497_v25 = vpop.xlane.xlu0 %496 }
 0x3cf   :  { %v499_v26 = vmul.f32 0.03125, %v497_v25  ;;  %v542_v25 = vld [vmem:[#allocation4 + $0x300] sm:$0xff] }
 0x3d1   :  { %v505_v28 = vmul.f32 %v499_v26, %v499_v26  ;;  %v507_v33 = vsub.f32 %v490_v11, %v499_v26  ;;  %v549_v11 = vld [vmem:[#allocation4 + $0x370] sm:$0xff] }
 0x3d2   :  { %v503_v27 = vpop.xlane.xlu0 %502  ;;  %v557_v26 = vld [vmem:[#allocation4 + $0x3f0] sm:$0xff] }
 0x3d3   :  { %v504_v29 = vmul.f32 0.03125, %v503_v27  ;;  %v541_v27 = vld [vmem:[#allocation4 + $0x2f0] sm:$0xff] }
 0x3d5   :  { %v506_v30 = vsub.f32 %v504_v29, %v505_v28  ;;  %v556_v28 = vld [vmem:[#allocation4 + $0x3e0] sm:$0xff] }
 0x3d6   :  { %v540_v29 = vld [vmem:[#allocation4 + $0x2e0] sm:$0xff] }
 0x3d7   :  { %v508_v31 = vadd.f32 1e-05, %v506_v30 }
 0x3d9   :  { %3509 = vrsqrt.f32 %v508_v31 }
 0x3e6   :  { %v3510_v36 = vpop.eup %3509 }
 0x3e7   :  { %v510_v37 = vmul.f32 %v3510_v36, %v507_v33 }
 0x3e9   :  { %v516_v38 = vmul.f32 %v514_v32, %v510_v37 }
 0x3eb   :  { %v522_v40 = vadd.f32 %v520_v39, %v516_v38 }
 0x3ed   :  { %v523_v41 = vmax.f32 %v522_v40, 0.0 }
 0x3ef   :  { %3167 = vmatmul.mubr.msk.f32.vlgmr.msra.gmra.mxu0 %vm494_vm3, %v523_v41 }
 0x3f0   :  { %687 = vmatpush1.msra.mxu0 %v538_v42  ;;  %726 = vmatprep.mubr.f32.mxu0 %v3584_v0 }
 0x3f1   :  { %688 = vmatprep.subr.mxu0 %v537_v43 }
 0x3f2   :  { %689 = vmatpush1.msra.mxu0 %v536_v44 }
 0x3f3   :  { %690 = vmatprep.subr.mxu0 %v535_v47 }
 0x3f4   :  { %691 = vmatpush1.msra.mxu0 %v534_v48  ;;  %v574_v48 = vld [vmem:[#allocation4 + $0x4f0] ss:$0 sm:$0xff] }
 0x3f5   :  { %692 = vmatprep.subr.mxu0 %v533_v49 }
 0x3f6   :  { %693 = vmatpush1.msra.mxu0 %v532_v50 }
 0x3f7   :  { %3168 = vmatmul.mubr.msk.f32.vlgmr.msra.gmra.mxu0 %vm494_vm3, %v523_v41 }
 0x3f8   :  { %797 = vmatprep.mubr.f32.mxu0 %v3584_v0 }
 0x4af   :  { %v657_v51 = vpop.f32.mrf.mxu0 }
 0x4b0   :  { %v658_v59 = vadd.f32 %v657_v51, %v581_v55 }
 0x4b1   :  { %v659_v53 = vpop.f32.mrf.mxu0 }
 0x4b2   :  { %v660_v58 = vadd.f32 %v659_v53, %v585_v54 }
 0x4b7   :  { %v728_v56 = vpop.f32.mrf.mxu0 }
 0x4b9   :  { %v730_v57 = vpop.f32.mrf.mxu0 }
 0x4ba   :  { %761 = vmatprep.subr.mxu0 %v730_v57  ;;  %v994_v57 = vld [vmem:[#allocation4 + $0x558] sm:$0xff] }
 0x4bb   :  { %762 = vmatpush1.msra.mxu0 %v728_v56  ;;  %v576_v56 = vld [vmem:[#allocation4 + $0x510] sm:$0xff] }
 0x4bc   :  { %763 = vmatprep.subr.mxu0 %v660_v58  ;;  %v993_v58 = vld [vmem:[#allocation4 + $0x550] sm:$0xff] }
 0x4bd   :  { %764 = vmatpush1.msra.mxu0 %v658_v59  ;;  %v992_v59 = vld [vmem:[#allocation4 + $0x548] sm:$0xff] }
 0x4be   :  { %3169 = vmatmul.mubr.msk.f32.vlgmr.msra.gmra.mxu0 %vm258_vm1, %v3640_v45  ;;  %3250 = vmatprep.subr.mxu0 %v571_v60  ;;  %v575_v60 = vld [vmem:[#allocation4 + $0x500] sm:$0xff] }
 0x4bf   :  { %803 = vmatprep.mubr.f32.mxu0 %v3584_v0  ;;  %3251 = vmatpush3.msra.mxu0 %v555_v61  ;;  %v991_v61 = vld [vmem:[#allocation4 + $0x540] sm:$0xff] }
 0x4c0   :  { %3252 = vmatprep.subr.mxu0 %v570_v62  ;;  %v990_v62 = vld [vmem:[#allocation4 + $0x538] sm:$0xff] }
 0x4c1   :  { %3253 = vmatpush3.msra.mxu0 %v554_v63  ;;  %v989_v63 = vld [vmem:[#allocation4 + $0x530] sm:$0xff] }
 0x4c2   :  { %3170 = vmatmul.mubr.msk.f32.gmra.mxu0 %vm258_vm1, %v3649_v46  ;;  %3254 = vmatprep.subr.mxu0 %v569_v1  ;;  %v988_v1 = vld [vmem:[#allocation4 + $0x528] sm:$0xff] }
 0x4c3   :  { %3255 = vmatpush3.msra.mxu0 %v553_v2  ;;  %v987_v2 = vld [vmem:[#allocation4 + $0x520] sm:$0xff] }
 0x4c4   :  { %3256 = vmatprep.subr.mxu0 %v568_v3  ;;  %v1002_v3 = vld [vmem:[#allocation4 + $0x598] sm:$0xff] }
 0x4c5   :  { %3257 = vmatpush3.msra.mxu0 %v552_v4 }
 0x4c6   :  { %3258 = vmatprep.subr.mxu0 %v567_v5 }
 0x4c7   :  { %3259 = vmatpush3.msra.mxu0 %v551_v6 }
 0x4c8   :  { %3260 = vmatprep.subr.mxu0 %v566_v8 }
 0x4c9   :  { %3261 = vmatpush3.msra.mxu0 %v550_v9 }
 0x4ca   :  { %3262 = vmatprep.subr.mxu0 %v565_v10 }
 0x4cb   :  { %3263 = vmatpush3.msra.mxu0 %v549_v11 }
 0x4cc   :  { %3264 = vmatprep.subr.mxu0 %v564_v12 }
 0x4cd   :  { %3265 = vmatpush3.msra.mxu0 %v548_v13 }
 0x4ce   :  { %3266 = vmatprep.subr.mxu0 %v563_v14 }
 0x4cf   :  { %3267 = vmatpush3.msra.mxu0 %v547_v15 }
 0x4d0   :  { %3268 = vmatprep.subr.mxu0 %v562_v16 }
 0x4d1   :  { %3269 = vmatpush3.msra.mxu0 %v546_v17 }
 0x4d2   :  { %3270 = vmatprep.subr.mxu0 %v561_v18 }
 0x4d3   :  { %3271 = vmatpush3.msra.mxu0 %v545_v19 }
 0x4d4   :  { %3272 = vmatprep.subr.mxu0 %v560_v20  ;;  %v1001_v20 = vld [vmem:[#allocation4 + $0x590] sm:$0xff] }
 0x4d5   :  { %3273 = vmatpush3.msra.mxu0 %v544_v21  ;;  %v1000_v21 = vld [vmem:[#allocation4 + $0x588] sm:$0xff] }
 0x4d6   :  { %3274 = vmatprep.subr.mxu0 %v559_v22  ;;  %v999_v22 = vld [vmem:[#allocation4 + $0x580] sm:$0xff] }
 0x4d7   :  { %3275 = vmatpush3.msra.mxu0 %v543_v23  ;;  %v998_v23 = vld [vmem:[#allocation4 + $0x578] sm:$0xff] }
 0x4d8   :  { %3276 = vmatprep.subr.mxu0 %v558_v24  ;;  %v997_v24 = vld [vmem:[#allocation4 + $0x570] sm:$0xff] }
 0x4d9   :  { %3277 = vmatpush3.msra.mxu0 %v542_v25  ;;  %v996_v25 = vld [vmem:[#allocation4 + $0x568] sm:$0xff] }
 0x4da   :  { %3278 = vmatprep.subr.mxu0 %v557_v26  ;;  %v995_v26 = vld [vmem:[#allocation4 + $0x560] sm:$0xff] }
 0x4db   :  { %3279 = vmatpush3.msra.mxu0 %v541_v27 }
 0x4dc   :  { %3280 = vmatprep.subr.mxu0 %v556_v28  ;;  %v1036_v28 = vld [vmem:[#allocation4 + $0x7a0] ss:$8 sm:$0x3] }
 0x4dd   :  { %3281 = vmatpush3.msra.mxu0 %v540_v29 }
 0x4de   :  { %3421 = vmatprep.subr.mxu0 %v3584_v0 }
 0x57e   :  { %v799_v30 = vpop.f32.mrf.mxu0 }
 0x57f   :  { %v810_v33 = vmax.f32 %v799_v30, 0.0  ;;  %v1048_v30 = vrot.slane %v1036_v28, %v3631_v34  ;;  %v1032_v34 = vld [vmem:[#allocation4 + $0x770] sm:$0xff] }
 0x580   :  { %v801_v31 = vpop.f32.mrf.mxu0 }
 0x581   :  { %v811_v32 = vmax.f32 %v801_v31, 0.0  ;;  %v1044_v31 = vrot.slane %v1036_v28, %v3633_v35  ;;  %v1016_v35 = vld [vmem:[#allocation4 + $0x670] sm:$0xff] }
 0x582   :  { %v805_v36 = vpop.f32.mrf.mxu0  ;;  %v1039_v28 = vld [vmem:[#allocation4 + $0x7d0] sm:$0xff] }
 0x583   :  { %878 = vmatprep.mubr.f32.mxu0 %v811_v32  ;;  %v812_v39 = vmax.f32 %v805_v36, 0.0 }
 0x584   :  { %v807_v37 = vpop.f32.mrf.mxu0  ;;  %879 = vmatmul.mubr.f32.vlgmr.msra.gmra.mxu0 %v810_v33 }
 0x585   :  { %v813_v38 = vmax.f32 %v807_v37, 0.0 }
 0x587   :  { %883 = vmatprep.mubr.f32.mxu0 %v813_v38  ;;  %v1034_v38 = vld [vmem:[#allocation4 + $0x790] sm:$0xff] }
 0x588   :  { %884 = vmatmul.mubr.f32.gmra.mxu0 %v812_v39  ;;  %v1018_v39 = vld [vmem:[#allocation4 + $0x690] sm:$0xff] }
 0x589   :  { %3425 = vmatprep.mubr.msk.f32.mxu0 %vm3585_vm2, %v3584_v0 }
 0x644   :  { %v3282_v40 = vpop.f32.mrf.mxu0 }
 0x646   :  { %v3283_v41 = vpop.f32.mrf.mxu0 }
 0x647   :  { %v3284_v44 = vadd.f32 %v3283_v41, %v3282_v40  ;;  %v1033_v40 = vld [vmem:[#allocation4 + $0x780] sm:$0xff] }
 0x648   :  { %v3285_v42 = vpop.f32.mrf.mxu0  ;;  %v1017_v41 = vld [vmem:[#allocation4 + $0x680] sm:$0xff] }
 0x649   :  { %v881_v50 = vadd.f32 %v3284_v44, %v574_v48  ;;  %v1030_v44 = vld [vmem:[#allocation4 + $0x750] sm:$0xff] }
 0x64a   :  { %v3286_v43 = vpop.f32.mrf.mxu0 }
 0x64b   :  { %v3287_v47 = vadd.f32 %v3286_v43, %v3285_v42  ;;  %v1031_v42 = vld [vmem:[#allocation4 + $0x760] sm:$0xff] }
 0x64c   :  { %v1015_v43 = vld [vmem:[#allocation4 + $0x660] sm:$0xff] }
 0x64d   :  { %v886_v49 = vadd.f32 %v3287_v47, %v574_v48  ;;  %v1014_v47 = vld [vmem:[#allocation4 + $0x650] sm:$0xff]  ;;  %v1013_v48 = vld [vmem:[#allocation4 + $0x640] sm:$0xff] }
 0x64f   :  { %3415 = vmatpush3.msra.mxu1 %v886_v49  ;;  %v1028_v49 = vld [vmem:[#allocation4 + $0x730] sm:$0xff] }
 0x650   :  { %3416 = vmatprep.subr.mxu1 %v3584_v0 }
 0x651   :  { %3417 = vmatpush3.msra.mxu1 %v881_v50  ;;  %v1012_v50 = vld [vmem:[#allocation4 + $0x630] sm:$0xff] }
 0x652   :  { %3419 = vmatmul.mubr.msk.f32.vlgmr.msra.gmra.mxu1 %vm258_vm1, %v3661_v7  ;;  %1078 = vmatprep.subr.mxu1 %v994_v57  ;;  %v1008_v57 = vld [vmem:[#allocation4 + $0x5f0] sm:$0xff] }
 0x653   :  { %1118 = vmatprep.mubr.f32.mxu1 %v3584_v0  ;;  %1079 = vmatpush1.msra.mxu1 %v993_v58  ;;  %v1023_v58 = vld [vmem:[#allocation4 + $0x6e0] sm:$0xff] }
 0x654   :  { %1080 = vmatprep.subr.mxu1 %v992_v59  ;;  %v1007_v59 = vld [vmem:[#allocation4 + $0x5e0] sm:$0xff] }
 0x655   :  { %1081 = vmatpush1.msra.mxu1 %v991_v61  ;;  %v1006_v61 = vld [vmem:[#allocation4 + $0x5d0] sm:$0xff] }
 0x656   :  { %1082 = vmatprep.subr.mxu1 %v990_v62  ;;  %v1021_v62 = vld [vmem:[#allocation4 + $0x6c0] sm:$0xff] }
 0x657   :  { %1083 = vmatpush1.msra.mxu1 %v989_v63  ;;  %v1005_v63 = vld [vmem:[#allocation4 + $0x5c0] sm:$0xff] }
 0x658   :  { %1084 = vmatprep.subr.mxu1 %v988_v1  ;;  %v1020_v1 = vld [vmem:[#allocation4 + $0x6b0] sm:$0xff] }
 0x659   :  { %1085 = vmatpush1.msra.mxu1 %v987_v2  ;;  %v1004_v2 = vld [vmem:[#allocation4 + $0x5b0] sm:$0xff] }
 0x65a   :  { %1149 = vmatprep.subr.mxu1 %v1002_v3  ;;  %v1019_v3 = vld [vmem:[#allocation4 + $0x6a0] sm:$0xff] }
 0x712   :  { %v955_v51 = vpop.f32.mrf.mxu1 }
 0x713   :  { %v959_v52 = vsel %vm494_vm3, %v955_v51, 0.0  ;;  %v963_v53 = vmul.f32 %v955_v51, %v955_v51 }
 0x714   :  { %960 = vadd.xlane.f32.xlu0 %v959_v52  ;;  %v3420_v54 = vpop.f32.mrf.mxu1  ;;  %v1011_v52 = vld [vmem:[#allocation4 + $0x620] sm:$0xff] }
 0x715   :  { %v964_v55 = vsel %vm494_vm3, %v963_v53, 0.0  ;;  %v1010_v53 = vld [vmem:[#allocation4 + $0x610] sm:$0xff]  ;;  %v1025_v54 = vld [vmem:[#allocation4 + $0x700] sm:$0xff] }
 0x716   :  { %965 = vadd.xlane.f32.xlu1 %v964_v55  ;;  %v1009_v55 = vld [vmem:[#allocation4 + $0x600] sm:$0xff] }
 0x727   :  { %982 = vperm.xlu1 %3507, %v576_v56   ;;  %v1024_v56 = vld [vmem:[#allocation4 + $0x6f0] sm:$0xff] }
 0x72a   :  { %976 = vperm.xlu0 %3508, %v575_v60   ;;  %v1022_v60 = vld [vmem:[#allocation4 + $0x6d0] sm:$0xff] }
 0x79d   :  { %v961_v4 = vpop.xlane.xlu0 %960 }
 0x79e   :  { %v962_v5 = vmul.f32 0.03125, %v961_v4  ;;  %v1003_v4 = vld [vmem:[#allocation4 + $0x5a0] sm:$0xff] }
 0x79f   :  { %v966_v6 = vpop.xlane.xlu1 %965 }
 0x7a0   :  { %v968_v8 = vmul.f32 %v962_v5, %v962_v5  ;;  %v967_v9 = vmul.f32 0.03125, %v966_v6  ;;  %v970_v12 = vsub.f32 %v955_v51, %v962_v5  ;;  %v1027_v51 = vld [vmem:[#allocation4 + $0x720] sm:$0xff] }
 0x7a2   :  { %v969_v10 = vsub.f32 %v967_v9, %v968_v8 }
 0x7a3   :  { %v983_v17 = vpop.permute.xlu1 %982 }
 0x7a4   :  { %v971_v11 = vadd.f32 1e-05, %v969_v10 }
 0x7a5   :  { %v977_v14 = vpop.permute.xlu0 %976 }
 0x7a6   :  { %3511 = vrsqrt.f32 %v971_v11 }
 0x7b3   :  { %v3512_v13 = vpop.eup %3511 }
 0x7b4   :  { %v973_v15 = vmul.f32 %v3512_v13, %v970_v12 }
 0x7b6   :  { %v979_v16 = vmul.f32 %v977_v14, %v973_v15 }
 0x7b8   :  { %v985_v18 = vadd.f32 %v983_v17, %v979_v16 }
 0x7ba   :  { %v986_v19 = vmax.f32 %v985_v18, 0.0 }
 0x7bc   :  { %3172 = vmatmul.mubr.msk.f32.vlgmr.msra.gmra.mxu1 %vm494_vm3, %v986_v19 }
 0x7bd   :  { %1150 = vmatpush1.msra.mxu1 %v1001_v20  ;;  %1189 = vmatprep.mubr.f32.mxu1 %v3584_v0  ;;  %v1037_v20 = vld [vmem:[#allocation4 + $0x7b0] ss:$0 sm:$0xff] }
 0x7be   :  { %1151 = vmatprep.subr.mxu1 %v1000_v21 }
 0x7bf   :  { %1152 = vmatpush1.msra.mxu1 %v999_v22 }
 0x7c0   :  { %1153 = vmatprep.subr.mxu1 %v998_v23 }
 0x7c1   :  { %1154 = vmatpush1.msra.mxu1 %v997_v24 }
 0x7c2   :  { %1155 = vmatprep.subr.mxu1 %v996_v25 }
 0x7c3   :  { %1156 = vmatpush1.msra.mxu1 %v995_v26 }
 0x7c4   :  { %3173 = vmatmul.mubr.msk.f32.vlgmr.msra.gmra.mxu1 %vm494_vm3, %v986_v19 }
 0x7c5   :  { %1260 = vmatprep.mubr.f32.mxu1 %v3584_v0 }
 0x87c   :  { %v1120_v27 = vpop.f32.mrf.mxu1 }
 0x87d   :  { %v1121_v37 = vadd.f32 %v1120_v27, %v1044_v31 }
 0x87e   :  { %v1122_v29 = vpop.f32.mrf.mxu1 }
 0x87f   :  { %v1123_v36 = vadd.f32 %v1122_v29, %v1048_v30  ;;  %v1038_v29 = vld [vmem:[#allocation4 + $0x7c0] sm:$0xff] }
 0x884   :  { %v1191_v32 = vpop.f32.mrf.mxu1 }
 0x886   :  { %v1193_v33 = vpop.f32.mrf.mxu1 }
 0x887   :  { %1224 = vmatprep.subr.mxu1 %v1193_v33 }
 0x888   :  { %1225 = vmatpush1.msra.mxu1 %v1191_v32 }
 0x889   :  { %1226 = vmatprep.subr.mxu1 %v1123_v36 }
 0x88a   :  { %1227 = vmatpush1.msra.mxu1 %v1121_v37 }
 0x88b   :  { %3174 = vmatmul.mubr.msk.f32.vlgmr.msra.gmra.mxu1 %vm258_vm1, %v3640_v45  ;;  %3291 = vmatprep.subr.mxu1 %v1034_v38  ;;  %v1029_v45 = vld [vmem:[#allocation4 + $0x740] sm:$0xff] }
 0x88c   :  { %1266 = vmatprep.mubr.f32.mxu1 %v3584_v0  ;;  %3292 = vmatpush3.msra.mxu1 %v1018_v39 }
 0x88d   :  { %3293 = vmatprep.subr.mxu1 %v1033_v40 }
 0x88e   :  { %3294 = vmatpush3.msra.mxu1 %v1017_v41 }
 0x88f   :  { %3175 = vmatmul.mubr.msk.f32.gmra.mxu1 %vm258_vm1, %v3649_v46  ;;  %3295 = vmatprep.subr.mxu1 %v1032_v34  ;;  %v1026_v46 = vld [vmem:[#allocation4 + $0x710] sm:$0xff] }
 0x890   :  { %3296 = vmatpush3.msra.mxu1 %v1016_v35 }
 0x891   :  { %3297 = vmatprep.subr.mxu1 %v1031_v42 }
 0x892   :  { %3298 = vmatpush3.msra.mxu1 %v1015_v43 }
 0x893   :  { %3299 = vmatprep.subr.mxu1 %v1030_v44  ;;  %v1472_v44 = vld [vmem:[#allocation6] sm:$0xff] }
 0x894   :  { %3300 = vmatpush3.msra.mxu1 %v1014_v47  ;;  %v1648_v47 = vld [vmem:[#allocation6 + $0x6f0] sm:$0xff] }
 0x895   :  { %3301 = vmatprep.subr.mxu1 %v1029_v45  ;;  %v1646_v45 = vld [vmem:[#allocation6 + $0x6d0] sm:$0xff] }
 0x896   :  { %3302 = vmatpush3.msra.mxu1 %v1013_v48  ;;  %v1649_v48 = vld [vmem:[#allocation6 + $0x700] sm:$0xff] }
 0x897   :  { %3303 = vmatprep.subr.mxu1 %v1028_v49  ;;  %v1644_v49 = vld [vmem:[#allocation6 + $0x6b0] sm:$0xff] }
 0x898   :  { %3304 = vmatpush3.msra.mxu1 %v1012_v50  ;;  %v1647_v50 = vld [vmem:[#allocation6 + $0x6e0] sm:$0xff] }
 0x899   :  { %3305 = vmatprep.subr.mxu1 %v1027_v51  ;;  %v1642_v51 = vld [vmem:[#allocation6 + $0x690] sm:$0xff] }
 0x89a   :  { %3306 = vmatpush3.msra.mxu1 %v1011_v52  ;;  %v1645_v52 = vld [vmem:[#allocation6 + $0x6c0] sm:$0xff] }
 0x89b   :  { %3307 = vmatprep.subr.mxu1 %v1026_v46  ;;  %v1640_v46 = vld [vmem:[#allocation6 + $0x670] sm:$0xff] }
 0x89c   :  { %3308 = vmatpush3.msra.mxu1 %v1010_v53  ;;  %v1643_v53 = vld [vmem:[#allocation6 + $0x6a0] sm:$0xff] }
 0x89d   :  { %3309 = vmatprep.subr.mxu1 %v1025_v54  ;;  %v1638_v54 = vld [vmem:[#allocation6 + $0x650] sm:$0xff] }
 0x89e   :  { %3310 = vmatpush3.msra.mxu1 %v1009_v55  ;;  %v1641_v55 = vld [vmem:[#allocation6 + $0x680] sm:$0xff] }
 0x89f   :  { %3311 = vmatprep.subr.mxu1 %v1024_v56  ;;  %v1636_v56 = vld [vmem:[#allocation6 + $0x630] sm:$0xff] }
 0x8a0   :  { %3312 = vmatpush3.msra.mxu1 %v1008_v57  ;;  %v1639_v57 = vld [vmem:[#allocation6 + $0x660] sm:$0xff] }
 0x8a1   :  { %3313 = vmatprep.subr.mxu1 %v1023_v58  ;;  %v1634_v58 = vld [vmem:[#allocation6 + $0x610] sm:$0xff] }
 0x8a2   :  { %3314 = vmatpush3.msra.mxu1 %v1007_v59  ;;  %v1637_v59 = vld [vmem:[#allocation6 + $0x640] sm:$0xff] }
 0x8a3   :  { %3315 = vmatprep.subr.mxu1 %v1022_v60  ;;  %v1664_v60 = vld [vmem:[#allocation6 + $0x7f0] sm:$0xff] }
 0x8a4   :  { %3316 = vmatpush3.msra.mxu1 %v1006_v61  ;;  %v1635_v61 = vld [vmem:[#allocation6 + $0x620] sm:$0xff] }
 0x8a5   :  { %3317 = vmatprep.subr.mxu1 %v1021_v62  ;;  %v1662_v62 = vld [vmem:[#allocation6 + $0x7d0] sm:$0xff] }
 0x8a6   :  { %3318 = vmatpush3.msra.mxu1 %v1005_v63  ;;  %v1665_v63 = vld [vmem:[#allocation6 + $0x800] sm:$0xff] }
 0x8a7   :  { %3319 = vmatprep.subr.mxu1 %v1020_v1  ;;  %v1660_v1 = vld [vmem:[#allocation6 + $0x7b0] sm:$0xff] }
 0x8a8   :  { %3320 = vmatpush3.msra.mxu1 %v1004_v2  ;;  %v1663_v2 = vld [vmem:[#allocation6 + $0x7e0] sm:$0xff] }
 0x8a9   :  { %3321 = vmatprep.subr.mxu1 %v1019_v3  ;;  %v1658_v3 = vld [vmem:[#allocation6 + $0x790] sm:$0xff] }
 0x8aa   :  { %3322 = vmatpush3.msra.mxu1 %v1003_v4  ;;  %v1661_v4 = vld [vmem:[#allocation6 + $0x7c0] sm:$0xff] }
 0x8ab   :  { %2822 = vmatprep.subr.mxu1 %v3584_v0 }
 0x94b   :  { %v1262_v5 = vpop.f32.mrf.mxu1 }
 0x94c   :  { %v1273_v9 = vmax.f32 %v1262_v5, 0.0  ;;  %v1656_v5 = vld [vmem:[#allocation6 + $0x770] sm:$0xff] }
 0x94d   :  { %v1264_v6 = vpop.f32.mrf.mxu1 }
 0x94e   :  { %v1274_v8 = vmax.f32 %v1264_v6, 0.0  ;;  %v1659_v6 = vld [vmem:[#allocation6 + $0x7a0] sm:$0xff] }
 0x94f   :  { %v1268_v10 = vpop.f32.mrf.mxu1 }
 0x950   :  { %1341 = vmatprep.mubr.f32.mxu1 %v1274_v8  ;;  %v1275_v13 = vmax.f32 %v1268_v10, 0.0  ;;  %v1654_v8 = vld [vmem:[#allocation6 + $0x750] sm:$0xff] }
 0x951   :  { %v1270_v11 = vpop.f32.mrf.mxu1  ;;  %1342 = vmatmul.mubr.f32.vlgmr.msra.gmra.mxu1 %v1273_v9  ;;  %v1657_v9 = vld [vmem:[#allocation6 + $0x780] sm:$0xff]  ;;  %v1652_v10 = vld [vmem:[#allocation6 + $0x730] sm:$0xff] }
 0x952   :  { %v1276_v12 = vmax.f32 %v1270_v11, 0.0  ;;  %v1655_v11 = vld [vmem:[#allocation6 + $0x760] sm:$0xff] }
 0x954   :  { %1346 = vmatprep.mubr.f32.mxu1 %v1276_v12  ;;  %v1650_v12 = vld [vmem:[#allocation6 + $0x710] sm:$0xff] }
 0x955   :  { %1347 = vmatmul.mubr.f32.gmra.mxu1 %v1275_v13  ;;  %v1653_v13 = vld [vmem:[#allocation6 + $0x740] sm:$0xff] }
 0xa11   :  { %v3323_v14 = vpop.f32.mrf.mxu1 }
 0xa13   :  { %v3324_v15 = vpop.f32.mrf.mxu1 }
 0xa14   :  { %v3325_v18 = vadd.f32 %v3324_v15, %v3323_v14  ;;  %v1680_v14 = vld [vmem:[#allocation6 + $0x8f0] sm:$0xff]  ;;  %v1651_v15 = vld [vmem:[#allocation6 + $0x720] sm:$0xff] }
 0xa15   :  { %v3326_v16 = vpop.f32.mrf.mxu1 }
 0xa16   :  { %v1344_v22 = vadd.f32 %v3325_v18, %v1037_v20  ;;  %v1676_v18 = vld [vmem:[#allocation6 + $0x8b0] sm:$0xff] }
 0xa17   :  { %v3327_v17 = vpop.f32.mrf.mxu1 }
 0xa18   :  { %v3328_v19 = vadd.f32 %v3327_v17, %v3326_v16  ;;  %v1678_v16 = vld [vmem:[#allocation6 + $0x8d0] sm:$0xff]  ;;  %v1681_v17 = vld [vmem:[#allocation6 + $0x900] sm:$0xff] }
 0xa1a   :  { %v1349_v21 = vadd.f32 %v3328_v19, %v1037_v20  ;;  %v1679_v19 = vld [vmem:[#allocation6 + $0x8e0] sm:$0xff]  ;;  %v1674_v20 = vld [vmem:[#allocation6 + $0x890] sm:$0xff] }
 0xa1c   :  { %3422 = vmatpush3.msra.mxu0 %v1349_v21  ;;  %v1677_v21 = vld [vmem:[#allocation6 + $0x8c0] sm:$0xff] }
 0xa1d   :  { %3423 = vmatprep.subr.mxu0 %v3584_v0 }
 0xa1e   :  { %3424 = vmatpush3.msra.mxu0 %v1344_v22  ;;  %v1672_v22 = vld [vmem:[#allocation6 + $0x870] sm:$0xff] }
 0xa1f   :  { %3426 = vmatmul.mubr.msk.f32.vlgmr.msra.gmra.mxu0 %vm258_vm1, %v3661_v7 }
 0xa20   :  { %3444 = vmatprep.mubr.msk.f32.mxu0 %vm1891_vm4, %v1472_v44 }
 0xadf   :  { %v1418_v23 = vpop.f32.mrf.mxu0 }
 0xae0   :  { %v1422_v24 = vsel %vm494_vm3, %v1418_v23, 0.0  ;;  %v1426_v25 = vmul.f32 %v1418_v23, %v1418_v23 }
 0xae1   :  { %1423 = vadd.xlane.f32.xlu0 %v1422_v24  ;;  %v3427_v26 = vpop.f32.mrf.mxu0  ;;  %v1670_v24 = vld [vmem:[#allocation6 + $0x850] sm:$0xff] }
 0xae2   :  { %v1427_v27 = vsel %vm494_vm3, %v1426_v25, 0.0  ;;  %v1673_v25 = vld [vmem:[#allocation6 + $0x880] sm:$0xff]  ;;  %v1668_v26 = vld [vmem:[#allocation6 + $0x830] sm:$0xff] }
 0xae3   :  { %1428 = vadd.xlane.f32.xlu1 %v1427_v27  ;;  %v1671_v27 = vld [vmem:[#allocation6 + $0x860] sm:$0xff] }
 0xaf4   :  { %1445 = vperm.xlu1 %3507, %v1039_v28   ;;  %v1666_v28 = vld [vmem:[#allocation6 + $0x810] sm:$0xff] }
 0xaf7   :  { %1439 = vperm.xlu0 %3508, %v1038_v29   ;;  %v1669_v29 = vld [vmem:[#allocation6 + $0x840] sm:$0xff] }
 0xb6a   :  { %v1424_v30 = vpop.xlane.xlu0 %1423 }
 0xb6b   :  { %v1425_v31 = vmul.f32 0.03125, %v1424_v30  ;;  %v1696_v30 = vld [vmem:[#allocation6 + $0x9f0] sm:$0xff] }
 0xb6c   :  { %v1429_v32 = vpop.xlane.xlu1 %1428 }
 0xb6d   :  { %v1431_v33 = vmul.f32 %v1425_v31, %v1425_v31  ;;  %v1430_v36 = vmul.f32 0.03125, %v1429_v32  ;;  %v1433_v38 = vsub.f32 %v1418_v23, %v1425_v31  ;;  %v1675_v23 = vld [vmem:[#allocation6 + $0x8a0] sm:$0xff]  ;;  %v1694_v32 = vld [vmem:[#allocation6 + $0x9d0] sm:$0xff] }
 0xb6e   :  { %v1667_v31 = vld [vmem:[#allocation6 + $0x820] sm:$0xff] }
 0xb6f   :  { %v1432_v37 = vsub.f32 %v1430_v36, %v1431_v33  ;;  %v1697_v33 = vld [vmem:[#allocation6 + $0xa00] sm:$0xff]  ;;  %v1692_v36 = vld [vmem:[#allocation6 + $0x9b0] sm:$0xff] }
 0xb70   :  { %v1446_v35 = vpop.permute.xlu1 %1445 }
 0xb71   :  { %v1434_v7 = vadd.f32 1e-05, %v1432_v37  ;;  %v1695_v37 = vld [vmem:[#allocation6 + $0x9e0] sm:$0xff] }
 0xb72   :  { %v1440_v41 = vpop.permute.xlu0 %1439 }
 0xb73   :  { %3513 = vrsqrt.f32 %v1434_v7 }
 0xb80   :  { %v3514_v39 = vpop.eup %3513 }
 0xb81   :  { %v1436_v40 = vmul.f32 %v3514_v39, %v1433_v38  ;;  %v1690_v39 = vld [vmem:[#allocation6 + $0x990] sm:$0xff] }
 0xb83   :  { %v1442_v34 = vmul.f32 %v1440_v41, %v1436_v40  ;;  %v1693_v40 = vld [vmem:[#allocation6 + $0x9c0] sm:$0xff] }
 0xb85   :  { %v1448_v42 = vadd.f32 %v1446_v35, %v1442_v34  ;;  %v1688_v34 = vld [vmem:[#allocation6 + $0x970] sm:$0xff] }
 0xb87   :  { %v3706_v43 = vmax.f32 %v1448_v42, 0.0  ;;  %v1691_v42 = vld [vmem:[#allocation6 + $0x9a0] sm:$0xff] }
 0xb89   :  { %1463 = vrot.lane.b32.xlu1 %v3706_v43, %s3587_s1  ;;  %1469 = vrot.lane.b32.xlu0 %v3706_v43, %s3588_s9 }
 0xb8d   :  { %1457 = vrot.lane.b32.xlu1 %v3706_v43, %s3589_s10  ;;  %1466 = vrot.lane.b32.xlu0 %v3706_v43, %s3590_s11 }
 0xb91   :  { %1451 = vrot.lane.b32.xlu1 %v3706_v43, %s3591_s12  ;;  %1460 = vrot.lane.b32.xlu0 %v3706_v43, %s3592_s13 }
 0xb95   :  { %1803 = vperm.xlu1 %3507, %v1648_v47   ;;  %1454 = vrot.lane.b32.xlu0 %v3706_v43, %s3593_s14  ;;  %v1686_v47 = vld [vmem:[#allocation6 + $0x950] sm:$0xff] }
 0xb99   :  { %1793 = vperm.xlu1 %3507, %v1646_v45   ;;  %1808 = vperm.xlu0 %3508, %v1649_v48   ;;  %v1689_v48 = vld [vmem:[#allocation6 + $0x980] sm:$0xff] }
 0xb9d   :  { %1783 = vperm.xlu1 %3507, %v1644_v49   ;;  %1798 = vperm.xlu0 %3508, %v1647_v50   ;;  %v1684_v50 = vld [vmem:[#allocation6 + $0x930] sm:$0xff] }
 0xba1   :  { %1773 = vperm.xlu1 %3507, %v1642_v51   ;;  %1788 = vperm.xlu0 %3508, %v1645_v52   ;;  %v1687_v51 = vld [vmem:[#allocation6 + $0x960] sm:$0xff]  ;;  %v1473_v52 = vld [vmem:[#allocation6 + $0x10] sm:$0xff] }
 0xba5   :  { %1763 = vperm.xlu1 %3507, %v1640_v46   ;;  %1778 = vperm.xlu0 %3508, %v1643_v53   ;;  %v1474_v46 = vld [vmem:[#allocation6 + $0x20] sm:$0xff]  ;;  %v1682_v53 = vld [vmem:[#allocation6 + $0x910] sm:$0xff] }
 0xba9   :  { %1753 = vperm.xlu1 %3507, %v1638_v54   ;;  %1768 = vperm.xlu0 %3508, %v1641_v55   ;;  %v1685_v54 = vld [vmem:[#allocation6 + $0x940] sm:$0xff]  ;;  %v1475_v55 = vld [vmem:[#allocation6 + $0x30] sm:$0xff] }
 0xbad   :  { %1743 = vperm.xlu1 %3507, %v1636_v56   ;;  %1758 = vperm.xlu0 %3508, %v1639_v57   ;;  %v1476_v56 = vld [vmem:[#allocation6 + $0x40] sm:$0xff] }
 0xbae   :  { %v1713_v57 = vld [vmem:[#allocation6 + $0xb00] sm:$0xff] }
 0xbb1   :  { %1733 = vperm.xlu1 %3507, %v1634_v58   ;;  %1748 = vperm.xlu0 %3508, %v1637_v59   ;;  %v1683_v58 = vld [vmem:[#allocation6 + $0x920] sm:$0xff]  ;;  %v1477_v59 = vld [vmem:[#allocation6 + $0x50] sm:$0xff] }
 0xbb5   :  { %1883 = vperm.xlu1 %3507, %v1664_v60   ;;  %1738 = vperm.xlu0 %3508, %v1635_v61   ;;  %v1712_v60 = vld [vmem:[#allocation6 + $0xaf0] sm:$0xff]  ;;  %v1729_v61 = vld [vmem:[#allocation6 + $0xc00] sm:$0xff] }
 0xbb9   :  { %1873 = vperm.xlu1 %3507, %v1662_v62   ;;  %1888 = vperm.xlu0 %3508, %v1665_v63   ;;  %v1479_v62 = vld [vmem:[#allocation6 + $0x70] sm:$0xff]  ;;  %v1480_v63 = vld [vmem:[#allocation6 + $0x80] sm:$0xff] }
 0xbbd   :  { %1863 = vperm.xlu1 %3507, %v1660_v1   ;;  %1878 = vperm.xlu0 %3508, %v1663_v2   ;;  %v1711_v1 = vld [vmem:[#allocation6 + $0xae0] sm:$0xff]  ;;  %v1728_v2 = vld [vmem:[#allocation6 + $0xbf0] sm:$0xff] }
 0xbc1   :  { %1853 = vperm.xlu1 %3507, %v1658_v3   ;;  %1868 = vperm.xlu0 %3508, %v1661_v4   ;;  %v1481_v3 = vld [vmem:[#allocation6 + $0x90] sm:$0xff]  ;;  %v1482_v4 = vld [vmem:[#allocation6 + $0xa0] sm:$0xff] }
 0xbc5   :  { %1843 = vperm.xlu1 %3507, %v1656_v5   ;;  %1858 = vperm.xlu0 %3508, %v1659_v6   ;;  %v1710_v5 = vld [vmem:[#allocation6 + $0xad0] sm:$0xff]  ;;  %v1727_v6 = vld [vmem:[#allocation6 + $0xbe0] sm:$0xff] }
 0xbc9   :  { %1833 = vperm.xlu1 %3507, %v1654_v8   ;;  %1848 = vperm.xlu0 %3508, %v1657_v9   ;;  %v1483_v8 = vld [vmem:[#allocation6 + $0xb0] sm:$0xff]  ;;  %v1484_v9 = vld [vmem:[#allocation6 + $0xc0] sm:$0xff] }
 0xbcd   :  { %1823 = vperm.xlu1 %3507, %v1652_v10   ;;  %1838 = vperm.xlu0 %3508, %v1655_v11   ;;  %v1709_v10 = vld [vmem:[#allocation6 + $0xac0] sm:$0xff]  ;;  %v1726_v11 = vld [vmem:[#allocation6 + $0xbd0] sm:$0xff] }
 0xbd1   :  { %1813 = vperm.xlu1 %3507, %v1650_v12   ;;  %1828 = vperm.xlu0 %3508, %v1653_v13   ;;  %v1485_v12 = vld [vmem:[#allocation6 + $0xd0] sm:$0xff]  ;;  %v1486_v13 = vld [vmem:[#allocation6 + $0xe0] sm:$0xff] }
 0xbd5   :  { %2317 = vperm.xlu1 %3507, %v1680_v14   ;;  %1818 = vperm.xlu0 %3508, %v1651_v15   ;;  %v1708_v14 = vld [vmem:[#allocation6 + $0xab0] sm:$0xff]  ;;  %v1725_v15 = vld [vmem:[#allocation6 + $0xbc0] sm:$0xff] }
 0xbd9   :  { %2307 = vperm.xlu1 %3507, %v1678_v16   ;;  %2322 = vperm.xlu0 %3508, %v1681_v17   ;;  %v1487_v16 = vld [vmem:[#allocation6 + $0xf0] sm:$0xff]  ;;  %v1488_v17 = vld [vmem:[#allocation6 + $0x100] sm:$0xff] }
 0xbdd   :  { %2297 = vperm.xlu1 %3507, %v1676_v18   ;;  %2312 = vperm.xlu0 %3508, %v1679_v19   ;;  %v1707_v18 = vld [vmem:[#allocation6 + $0xaa0] sm:$0xff]  ;;  %v1724_v19 = vld [vmem:[#allocation6 + $0xbb0] sm:$0xff] }
 0xbe1   :  { %2287 = vperm.xlu1 %3507, %v1674_v20   ;;  %2302 = vperm.xlu0 %3508, %v1677_v21   ;;  %v1489_v20 = vld [vmem:[#allocation6 + $0x110] sm:$0xff]  ;;  %v1490_v21 = vld [vmem:[#allocation6 + $0x120] sm:$0xff] }
 0xbe5   :  { %2277 = vperm.xlu1 %3507, %v1672_v22   ;;  %2292 = vperm.xlu0 %3508, %v1675_v23   ;;  %v1706_v22 = vld [vmem:[#allocation6 + $0xa90] sm:$0xff]  ;;  %v1723_v23 = vld [vmem:[#allocation6 + $0xba0] sm:$0xff] }
 0xbe9   :  { %2267 = vperm.xlu1 %3507, %v1670_v24   ;;  %2282 = vperm.xlu0 %3508, %v1673_v25   ;;  %v1491_v24 = vld [vmem:[#allocation6 + $0x130] sm:$0xff]  ;;  %v1492_v25 = vld [vmem:[#allocation6 + $0x140] sm:$0xff] }
 0xbed   :  { %2257 = vperm.xlu1 %3507, %v1668_v26   ;;  %2272 = vperm.xlu0 %3508, %v1671_v27   ;;  %v1705_v26 = vld [vmem:[#allocation6 + $0xa80] sm:$0xff]  ;;  %v1722_v27 = vld [vmem:[#allocation6 + $0xb90] sm:$0xff] }
 0xbf1   :  { %2247 = vperm.xlu1 %3507, %v1666_v28   ;;  %2262 = vperm.xlu0 %3508, %v1669_v29   ;;  %v1493_v28 = vld [vmem:[#allocation6 + $0x150] sm:$0xff]  ;;  %v1494_v29 = vld [vmem:[#allocation6 + $0x160] sm:$0xff] }
 0xbf5   :  { %2397 = vperm.xlu1 %3507, %v1696_v30   ;;  %2252 = vperm.xlu0 %3508, %v1667_v31   ;;  %v1704_v30 = vld [vmem:[#allocation6 + $0xa70] sm:$0xff]  ;;  %v1721_v31 = vld [vmem:[#allocation6 + $0xb80] sm:$0xff] }
 0xbf9   :  { %2387 = vperm.xlu1 %3507, %v1694_v32   ;;  %2402 = vperm.xlu0 %3508, %v1697_v33   ;;  %v1495_v32 = vld [vmem:[#allocation6 + $0x170] sm:$0xff]  ;;  %v1496_v33 = vld [vmem:[#allocation6 + $0x180] sm:$0xff] }
 0xbfb   :  { %v1470_v7 = vpop.permute.xlu0 %1469  ;;  %v1464_v38 = vpop.permute.xlu1 %1463 }
 0xbfc   :  { %3428 = vmatprep.subr.mxu0 %v1470_v7 }
 0xbfd   :  { %2377 = vperm.xlu1 %3507, %v1692_v36   ;;  %2392 = vperm.xlu0 %3508, %v1695_v37   ;;  %v1703_v36 = vld [vmem:[#allocation6 + $0xa60] sm:$0xff]  ;;  %v1720_v37 = vld [vmem:[#allocation6 + $0xb70] sm:$0xff] }
 0xbfe   :  { %3429 = vmatpush3.msra.mxu0 %v1470_v7  ;;  %v1497_v7 = vld [vmem:[#allocation6 + $0x190] sm:$0xff] }
 0xbff   :  { %v1467_v41 = vpop.permute.xlu0 %1466  ;;  %v1458_v44 = vpop.permute.xlu1 %1457 }
 0xc00   :  { %3430 = vmatprep.subr.mxu0 %v1467_v41 }
 0xc01   :  { %2367 = vperm.xlu1 %3507, %v1690_v39   ;;  %2382 = vperm.xlu0 %3508, %v1693_v40   ;;  %v1702_v39 = vld [vmem:[#allocation6 + $0xa50] sm:$0xff]  ;;  %v1719_v40 = vld [vmem:[#allocation6 + $0xb60] sm:$0xff] }
 0xc02   :  { %3431 = vmatpush3.msra.mxu0 %v1467_v41  ;;  %v1499_v41 = vld [vmem:[#allocation6 + $0x1b0] sm:$0xff] }
 0xc03   :  { %3432 = vmatprep.subr.mxu0 %v1464_v38  ;;  %v1461_v35 = vpop.permute.xlu0 %1460  ;;  %v1452_v49 = vpop.permute.xlu1 %1451 }
 0xc04   :  { %3433 = vmatpush3.msra.mxu0 %v1464_v38  ;;  %v1498_v38 = vld [vmem:[#allocation6 + $0x1a0] sm:$0xff] }
 0xc05   :  { %3434 = vmatprep.subr.mxu0 %v1461_v35  ;;  %2357 = vperm.xlu1 %3507, %v1688_v34   ;;  %v1500_v34 = vld [vmem:[#allocation6 + $0x1c0] sm:$0xff] }
 0xc06   :  { %2372 = vperm.xlu0 %3508, %v1691_v42   ;;  %3435 = vmatpush3.msra.mxu0 %v1461_v35  ;;  %v1701_v35 = vld [vmem:[#allocation6 + $0xa40] sm:$0xff]  ;;  %v1718_v42 = vld [vmem:[#allocation6 + $0xb50] sm:$0xff] }
 0xc07   :  { %3436 = vmatprep.subr.mxu0 %v1458_v44  ;;  %v1455_v45 = vpop.permute.xlu0 %1454 }
 0xc08   :  { %3437 = vmatpush3.msra.mxu0 %v1458_v44  ;;  %v1501_v44 = vld [vmem:[#allocation6 + $0x1d0] sm:$0xff] }
 0xc09   :  { %3438 = vmatprep.subr.mxu0 %v1455_v45  ;;  %2347 = vperm.xlu1 %3507, %v1686_v47   ;;  %v1502_v47 = vld [vmem:[#allocation6 + $0x1e0] sm:$0xff] }
 0xc0a   :  { %2362 = vperm.xlu0 %3508, %v1689_v48   ;;  %3439 = vmatpush3.msra.mxu0 %v1455_v45  ;;  %v1700_v45 = vld [vmem:[#allocation6 + $0xa30] sm:$0xff]  ;;  %v1717_v48 = vld [vmem:[#allocation6 + $0xb40] sm:$0xff] }
 0xc0b   :  { %3440 = vmatprep.subr.mxu0 %v1452_v49 }
 0xc0c   :  { %3441 = vmatpush3.msra.mxu0 %v1452_v49  ;;  %v1503_v49 = vld [vmem:[#allocation6 + $0x1f0] sm:$0xff] }
 0xc0d   :  { %3442 = vmatprep.subr.mxu0 %v3706_v43  ;;  %2337 = vperm.xlu1 %3507, %v1684_v50   ;;  %v1699_v50 = vld [vmem:[#allocation6 + $0xa20] sm:$0xff] }
 0xc0e   :  { %2352 = vperm.xlu0 %3508, %v1687_v51   ;;  %3443 = vmatpush3.msra.mxu0 %v3706_v43  ;;  %v1478_v43 = vld [vmem:[#allocation6 + $0x60] sm:$0xff]  ;;  %v1716_v51 = vld [vmem:[#allocation6 + $0xb30] sm:$0xff] }
 0xc0f   :  { %3445 = vmatmul.mubr.msk.f32.vlgmr.msra.gmra.mxu0 %vm1891_vm4, %v1473_v52  ;;  %2405 = vmatprep.subr.mxu0 %v3584_v0  ;;  %v1698_v52 = vld [vmem:[#allocation6 + $0xa10] sm:$0xff] }
 0xc10   :  { %3447 = vmatprep.mubr.msk.f32.mxu0 %vm1891_vm4, %v1474_v46  ;;  %v1715_v46 = vld [vmem:[#allocation6 + $0xb20] sm:$0xff] }
 0xc11   :  { %2327 = vperm.xlu1 %3507, %v1682_v53   ;;  %v1714_v53 = vld [vmem:[#allocation6 + $0xb10] sm:$0xff] }
 0xc12   :  { %2342 = vperm.xlu0 %3508, %v1685_v54   ;;  %v1730_v54 = vld [vmem:[#allocation6 + $0xc10] sm:$0x3f] }
 0xc13   :  { %3448 = vmatmul.mubr.msk.f32.gmra.mxu0 %vm1891_vm4, %v1475_v55  ;;  %v1505_v55 = vld [vmem:[#allocation6 + $0x208] sm:$0xff] }
 0xc14   :  { %3450 = vmatprep.mubr.msk.f32.mxu0 %vm1891_vm4, %v1476_v56  ;;  %v1809_v56 = vpop.permute.xlu0 %1808 }
 0xc15   :  { %2739 = vperm.xlu1 %3507, %v1713_v57   ;;  %v1804_v57 = vpop.permute.xlu1 %1803 }
 0xc16   :  { %2332 = vperm.xlu0 %3508, %v1683_v58  }
 0xc17   :  { %3451 = vmatmul.mubr.msk.f32.gmra.mxu0 %vm1891_vm4, %v1477_v59 }
 0xc18   :  { %3453 = vmatprep.mubr.msk.f32.mxu0 %vm1891_vm4, %v1478_v43  ;;  %v1799_v59 = vpop.permute.xlu0 %1798 }
 0xc19   :  { %2734 = vperm.xlu1 %3507, %v1712_v60   ;;  %v1794_v60 = vpop.permute.xlu1 %1793 }
 0xc1a   :  { %2819 = vperm.xlu0 %3508, %v1729_v61  }
 0xc1b   :  { %3454 = vmatmul.mubr.msk.f32.gmra.mxu0 %vm1891_vm4, %v1479_v62 }
 0xc1c   :  { %3456 = vmatprep.mubr.msk.f32.mxu0 %vm1891_vm4, %v1480_v63  ;;  %v1789_v63 = vpop.permute.xlu0 %1788 }
 0xc1d   :  { %2729 = vperm.xlu1 %3507, %v1711_v1  }
 0xc1e   :  { %2814 = vperm.xlu0 %3508, %v1728_v2   ;;  %v1784_v2 = vpop.permute.xlu1 %1783 }
 0xc1f   :  { %3457 = vmatmul.mubr.msk.f32.gmra.mxu0 %vm1891_vm4, %v1481_v3 }
 0xc20   :  { %3459 = vmatprep.mubr.msk.f32.mxu0 %vm1891_vm4, %v1482_v4 }
 0xc21   :  { %2724 = vperm.xlu1 %3507, %v1710_v5   ;;  %v1779_v5 = vpop.permute.xlu0 %1778 }
 0xc22   :  { %2809 = vperm.xlu0 %3508, %v1727_v6  }
 0xc23   :  { %3460 = vmatmul.mubr.msk.f32.gmra.mxu0 %vm1891_vm4, %v1483_v8  ;;  %v1774_v8 = vpop.permute.xlu1 %1773 }
 0xc24   :  { %3462 = vmatprep.mubr.msk.f32.mxu0 %vm1891_vm4, %v1484_v9 }
 0xc25   :  { %2719 = vperm.xlu1 %3507, %v1709_v10  }
 0xc26   :  { %2804 = vperm.xlu0 %3508, %v1726_v11   ;;  %v1769_v11 = vpop.permute.xlu0 %1768 }
 0xc27   :  { %3463 = vmatmul.mubr.msk.f32.gmra.mxu0 %vm1891_vm4, %v1485_v12 }
 0xc28   :  { %3465 = vmatprep.mubr.msk.f32.mxu0 %vm1891_vm4, %v1486_v13  ;;  %v1764_v13 = vpop.permute.xlu1 %1763 }
 0xc29   :  { %2714 = vperm.xlu1 %3507, %v1708_v14  }
 0xc2a   :  { %2799 = vperm.xlu0 %3508, %v1725_v15  }
 0xc2b   :  { %3466 = vmatmul.mubr.msk.f32.gmra.mxu0 %vm1891_vm4, %v1487_v16  ;;  %v1759_v16 = vpop.permute.xlu0 %1758 }
 0xc2c   :  { %3468 = vmatprep.mubr.msk.f32.mxu0 %vm1891_vm4, %v1488_v17 }
 0xc2d   :  { %2709 = vperm.xlu1 %3507, %v1707_v18   ;;  %v1754_v18 = vpop.permute.xlu1 %1753 }
 0xc2e   :  { %2794 = vperm.xlu0 %3508, %v1724_v19  }
 0xc2f   :  { %3469 = vmatmul.mubr.msk.f32.gmra.mxu0 %vm1891_vm4, %v1489_v20 }
 0xc30   :  { %3471 = vmatprep.mubr.msk.f32.mxu0 %vm1891_vm4, %v1490_v21 }
 0xc31   :  { %2704 = vperm.xlu1 %3507, %v1706_v22  }
 0xc32   :  { %2789 = vperm.xlu0 %3508, %v1723_v23  }
 0xc33   :  { %3472 = vmatmul.mubr.msk.f32.gmra.mxu0 %vm1891_vm4, %v1491_v24 }
 0xc34   :  { %3474 = vmatprep.mubr.msk.f32.mxu0 %vm1891_vm4, %v1492_v25  ;;  %v1749_v25 = vpop.permute.xlu0 %1748 }
 0xc35   :  { %2699 = vperm.xlu1 %3507, %v1705_v26  }
 0xc36   :  { %2784 = vperm.xlu0 %3508, %v1722_v27  }
 0xc37   :  { %3475 = vmatmul.mubr.msk.f32.gmra.mxu0 %vm1891_vm4, %v1493_v28 }
 0xc38   :  { %3477 = vmatprep.mubr.msk.f32.mxu0 %vm1891_vm4, %v1494_v29  ;;  %v1744_v29 = vpop.permute.xlu1 %1743 }
 0xc39   :  { %2694 = vperm.xlu1 %3507, %v1704_v30  }
 0xc3a   :  { %2779 = vperm.xlu0 %3508, %v1721_v31  }
 0xc3b   :  { %3478 = vmatmul.mubr.msk.f32.gmra.mxu0 %vm1891_vm4, %v1495_v32 }
 0xc3c   :  { %3480 = vmatprep.mubr.msk.f32.mxu0 %vm1891_vm4, %v1496_v33 }
 0xc3d   :  { %2689 = vperm.xlu1 %3507, %v1703_v36  }
 0xc3e   :  { %2774 = vperm.xlu0 %3508, %v1720_v37  }
 0xc3f   :  { %3481 = vmatmul.mubr.msk.f32.gmra.mxu0 %vm1891_vm4, %v1497_v7  ;;  %v1739_v7 = vpop.permute.xlu0 %1738 }
 0xc40   :  { %3483 = vmatprep.mubr.msk.f32.mxu0 %vm1891_vm4, %v1498_v38 }
 0xc41   :  { %2684 = vperm.xlu1 %3507, %v1702_v39  }
 0xc42   :  { %2769 = vperm.xlu0 %3508, %v1719_v40  }
 0xc43   :  { %3484 = vmatmul.mubr.msk.f32.gmra.mxu0 %vm1891_vm4, %v1499_v41  ;;  %v1734_v41 = vpop.permute.xlu1 %1733 }
 0xc44   :  { %3486 = vmatprep.mubr.msk.f32.mxu0 %vm1891_vm4, %v1500_v34 }
 0xc45   :  { %2679 = vperm.xlu1 %3507, %v1701_v35  }
 0xc46   :  { %2764 = vperm.xlu0 %3508, %v1718_v42  }
 0xc47   :  { %3487 = vmatmul.mubr.msk.f32.gmra.mxu0 %vm1891_vm4, %v1501_v44 }
 0xc48   :  { %3489 = vmatprep.mubr.msk.f32.mxu0 %vm1891_vm4, %v1502_v47 }
 0xc49   :  { %2674 = vperm.xlu1 %3507, %v1700_v45  }
 0xc4a   :  { %2759 = vperm.xlu0 %3508, %v1717_v48   ;;  %v1889_v48 = vpop.permute.xlu0 %1888 }
 0xc4b   :  { %3490 = vmatmul.mubr.msk.f32.gmra.mxu0 %vm1891_vm4, %v1503_v49 }
 0xc4c   :  { %2469 = vmatprep.mubr.f32.mxu0 %v1505_v55 }
 0xc4d   :  { %2669 = vperm.xlu1 %3507, %v1699_v50  }
 0xc4e   :  { %2754 = vperm.xlu0 %3508, %v1716_v51  }
 0xc51   :  { %2664 = vperm.xlu1 %3507, %v1698_v52   ;;  %v1884_v52 = vpop.permute.xlu1 %1883 }
 0xc52   :  { %2749 = vperm.xlu0 %3508, %v1715_v46  }
 0xc56   :  { %2744 = vperm.xlu0 %3508, %v1714_v53  }
 0xc5a   :  { %3081 = vperm.xlu0 %3508, %v1730_v54  }
 0xccf   :  { %v3750_v58 = vpop.f32.mrf.mxu0 }
 0xcd1   :  { %v3752_v43 = vpop.f32.mrf.mxu0 }
 0xcd3   :  { %v3754_v61 = vpop.f32.mrf.mxu0 }
 0xcd5   :  { %v3756_v62 = vpop.f32.mrf.mxu0 }
 0xcd7   :  { %v3758_v1 = vpop.f32.mrf.mxu0 }
 0xcd8   :  { %v2080_v53 = vadd.f32 %v3758_v1, %v1759_v16  ;;  %v2065_v1 = vadd.f32 %v3756_v62, %v1744_v29 }
 0xcd9   :  { %v3760_v3 = vpop.f32.mrf.mxu0 }
 0xcdb   :  { %v3455_v4 = vpop.f32.mrf.mxu0 }
 0xcdc   :  { %v2090_v47 = vadd.f32 %v3455_v4, %v1769_v11  ;;  %v1874_v4 = vpop.permute.xlu1 %1873 }
 0xcdd   :  { %v2084_v6 = vpop.f32.mrf.mxu0 }
 0xcde   :  { %v2085_v50 = vadd.f32 %v2084_v6, %v1764_v13  ;;  %v2220_v54 = vmax.f32 %v2090_v47, 0.0 }
 0xcdf   :  { %v3458_v9 = vpop.f32.mrf.mxu0 }
 0xce0   :  { %v2100_v39 = vadd.f32 %v3458_v9, %v1779_v5  ;;  %v1864_v13 = vpop.permute.xlu1 %1863 }
 0xce1   :  { %v2094_v10 = vpop.f32.mrf.mxu0 }
 0xce2   :  { %v2095_v35 = vadd.f32 %v2094_v10, %v1774_v8  ;;  %v2222_v45 = vmax.f32 %v2100_v39, 0.0 }
 0xce3   :  { %v3461_v12 = vpop.f32.mrf.mxu0 }
 0xce4   :  { %v2110_v31 = vadd.f32 %v3461_v12, %v1789_v63  ;;  %v2221_v51 = vmax.f32 %v2095_v35, 0.0  ;;  %v2070_v63 = vadd.f32 %v3754_v61, %v1749_v25  ;;  %v2055_v61 = vadd.f32 %v3752_v43, %v1734_v41 }
 0xce5   :  { %v2104_v14 = vpop.f32.mrf.mxu0  ;;  %v2215_v12 = vmax.f32 %v2065_v1, 0.0  ;;  %v1510_v1 = vld [vmem:[#allocation6 + $0x230] sm:$0xff] }
 0xce6   :  { %v2105_v36 = vadd.f32 %v2104_v14, %v1784_v2  ;;  %v2224_v40 = vmax.f32 %v2110_v31, 0.0  ;;  %v2218_v2 = vmax.f32 %v2080_v53, 0.0  ;;  %v2216_v9 = vmax.f32 %v2070_v63, 0.0  ;;  %v1504_v63 = vld [vmem:[#allocation6 + $0x200] sm:$0xff] }
 0xce7   :  { %v3464_v15 = vpop.f32.mrf.mxu0 }
 0xce8   :  { %v2120_v22 = vadd.f32 %v3464_v15, %v1799_v59  ;;  %v2223_v42 = vmax.f32 %v2105_v36, 0.0  ;;  %v1879_v59 = vpop.permute.xlu0 %1878 }
 0xce9   :  { %v2114_v17 = vpop.f32.mrf.mxu0 }
 0xcea   :  { %v2115_v27 = vadd.f32 %v2114_v17, %v1794_v60  ;;  %v2226_v32 = vmax.f32 %v2120_v22, 0.0 }
 0xceb   :  { %v3467_v19 = vpop.f32.mrf.mxu0 }
 0xcec   :  { %v2130_v20 = vadd.f32 %v3467_v19, %v1809_v56  ;;  %v2225_v37 = vmax.f32 %v2115_v27, 0.0  ;;  %v2075_v56 = vadd.f32 %v3760_v3, %v1754_v18  ;;  %v2060_v3 = vadd.f32 %v3750_v58, %v1739_v7  ;;  %v1869_v10 = vpop.permute.xlu0 %1868 }
 0xced   :  { %v2124_v21 = vpop.f32.mrf.mxu0  ;;  %v2213_v58 = vmax.f32 %v2055_v61, 0.0  ;;  %v1519_v61 = vld [vmem:[#allocation6 + $0x278] sm:$0xff] }
 0xcee   :  { %v2228_v23 = vmax.f32 %v2130_v20, 0.0  ;;  %v2125_v24 = vadd.f32 %v2124_v21, %v1804_v57  ;;  %v2219_v57 = vmax.f32 %v2085_v50, 0.0  ;;  %v2217_v6 = vmax.f32 %v2075_v56, 0.0  ;;  %v1854_v21 = vpop.permute.xlu1 %1853 }
 0xcef   :  { %v3762_v26 = vpop.f32.mrf.mxu0  ;;  %v2214_v62 = vmax.f32 %v2060_v3, 0.0  ;;  %v1515_v3 = vld [vmem:[#allocation6 + $0x258] sm:$0xff] }
 0xcf0   :  { %v2227_v28 = vmax.f32 %v2125_v24, 0.0  ;;  %2406 = vmatpush1.msra.mxu0 %v2228_v23  ;;  %v1859_v17 = vpop.permute.xlu0 %1858 }
 0xcf1   :  { %v3764_v30 = vpop.f32.mrf.mxu0  ;;  %2407 = vmatprep.subr.mxu0 %v3584_v0 }
 0xcf2   :  { %2408 = vmatpush1.msra.mxu0 %v2227_v28  ;;  %v1844_v31 = vpop.permute.xlu1 %1843 }
 0xcf3   :  { %v3767_v33 = vpop.f32.mrf.mxu0  ;;  %2409 = vmatprep.subr.mxu0 %v3584_v0 }
 0xcf4   :  { %2410 = vmatpush1.msra.mxu0 %v2226_v32  ;;  %v1849_v27 = vpop.permute.xlu0 %1848 }
 0xcf5   :  { %v3770_v38 = vpop.f32.mrf.mxu0  ;;  %2411 = vmatprep.subr.mxu0 %v3584_v0 }
 0xcf6   :  { %2412 = vmatpush1.msra.mxu0 %v2225_v37  ;;  %v1834_v35 = vpop.permute.xlu1 %1833 }
 0xcf7   :  { %v3773_v34 = vpop.f32.mrf.mxu0  ;;  %2413 = vmatprep.subr.mxu0 %v3584_v0 }
 0xcf8   :  { %2414 = vmatpush1.msra.mxu0 %v2224_v40  ;;  %v1839_v39 = vpop.permute.xlu0 %1838 }
 0xcf9   :  { %v3776_v44 = vpop.f32.mrf.mxu0  ;;  %2415 = vmatprep.subr.mxu0 %v3584_v0 }
 0xcfa   :  { %2416 = vmatpush1.msra.mxu0 %v2223_v42 }
 0xcfb   :  { %v3779_v49 = vpop.f32.mrf.mxu0  ;;  %2417 = vmatprep.subr.mxu0 %v3584_v0 }
 0xcfc   :  { %2418 = vmatpush1.msra.mxu0 %v2222_v45  ;;  %v2170_v40 = vadd.f32 %v3779_v49, %v1849_v27  ;;  %v2160_v45 = vadd.f32 %v3773_v34, %v1839_v39  ;;  %v1829_v50 = vpop.permute.xlu0 %1828  ;;  %v2155_v49 = vadd.f32 %v3776_v44, %v1834_v35  ;;  %v1537_v27 = vld [vmem:[#allocation6 + $0x308] sm:$0xff]  ;;  %v1546_v35 = vld [vmem:[#allocation6 + $0x350] sm:$0xff] }
 0xcfd   :  { %v3782_v46 = vpop.f32.mrf.mxu0  ;;  %2419 = vmatprep.subr.mxu0 %v3584_v0  ;;  %v1545_v39 = vld [vmem:[#allocation6 + $0x348] sm:$0xff] }
 0xcfe   :  { %2420 = vmatpush1.msra.mxu0 %v2221_v51  ;;  %v2165_v42 = vadd.f32 %v3782_v46, %v1844_v31  ;;  %v2150_v46 = vadd.f32 %v3767_v33, %v1829_v50  ;;  %v2234_v53 = vmax.f32 %v2160_v45, 0.0  ;;  %v1538_v31 = vld [vmem:[#allocation6 + $0x310] sm:$0xff]  ;;  %v1551_v45 = vld [vmem:[#allocation6 + $0x378] sm:$0xff]  ;;  %v1553_v50 = vld [vmem:[#allocation6 + $0x388] sm:$0xff] }
 0xcff   :  { %v3482_v55 = vpop.f32.mrf.mxu0  ;;  %2421 = vmatprep.subr.mxu0 %v3584_v0 }
 0xd00   :  { %2422 = vmatpush1.msra.mxu0 %v2220_v54  ;;  %v2180_v32 = vadd.f32 %v3482_v55, %v1859_v17  ;;  %v2235_v51 = vmax.f32 %v2165_v42, 0.0  ;;  %v2233_v54 = vmax.f32 %v2155_v49, 0.0  ;;  %v1819_v55 = vpop.permute.xlu0 %1818  ;;  %v2232_v56 = vmax.f32 %v2150_v46, 0.0  ;;  %v1527_v17 = vld [vmem:[#allocation6 + $0x2b8] sm:$0xff]  ;;  %v1549_v42 = vld [vmem:[#allocation6 + $0x368] sm:$0xff]  ;;  %v1552_v49 = vld [vmem:[#allocation6 + $0x380] sm:$0xff] }
 0xd01   :  { %v2174_v60 = vpop.f32.mrf.mxu0  ;;  %2423 = vmatprep.subr.mxu0 %v3584_v0  ;;  %v2140_v44 = vadd.f32 %v3762_v26, %v1819_v55  ;;  %v1507_v26 = vld [vmem:[#allocation6 + $0x218] sm:$0xff]  ;;  %v1557_v46 = vld [vmem:[#allocation6 + $0x3a8] sm:$0xff] }
 0xd02   :  { %2424 = vmatpush1.msra.mxu0 %v2219_v57  ;;  %v2175_v37 = vadd.f32 %v2174_v60, %v1854_v21  ;;  %v2238_v41 = vmax.f32 %v2180_v32, 0.0  ;;  %v1530_v21 = vld [vmem:[#allocation6 + $0x2d0] sm:$0xff]  ;;  %v1541_v32 = vld [vmem:[#allocation6 + $0x328] sm:$0xff] }
 0xd03   :  { %v3485_v5 = vpop.f32.mrf.mxu0  ;;  %2425 = vmatprep.subr.mxu0 %v3584_v0  ;;  %v2230_v60 = vmax.f32 %v2140_v44, 0.0  ;;  %v1561_v55 = vld [vmem:[#allocation6 + $0x3c8] sm:$0xff]  ;;  %v1560_v44 = vld [vmem:[#allocation6 + $0x3c0] sm:$0xff] }
 0xd04   :  { %2426 = vmatpush1.msra.mxu0 %v2218_v2  ;;  %v2190_v24 = vadd.f32 %v3485_v5, %v1869_v10  ;;  %v2237_v47 = vmax.f32 %v2175_v37, 0.0  ;;  %v1506_v2 = vld [vmem:[#allocation6 + $0x210] sm:$0xff]  ;;  %v1511_v5 = vld [vmem:[#allocation6 + $0x238] sm:$0xff]  ;;  %v1517_v10 = vld [vmem:[#allocation6 + $0x268] sm:$0xff] }
 0xd05   :  { %v2184_v8 = vpop.f32.mrf.mxu0  ;;  %2427 = vmatprep.subr.mxu0 %v3584_v0  ;;  %v1543_v37 = vld [vmem:[#allocation6 + $0x338] sm:$0xff] }
 0xd06   :  { %2428 = vmatpush1.msra.mxu0 %v2217_v6  ;;  %v2185_v28 = vadd.f32 %v2184_v8, %v1864_v13  ;;  %v2240_v36 = vmax.f32 %v2190_v24, 0.0  ;;  %v1513_v6 = vld [vmem:[#allocation6 + $0x248] sm:$0xff]  ;;  %v1512_v8 = vld [vmem:[#allocation6 + $0x240] sm:$0xff]  ;;  %v1535_v24 = vld [vmem:[#allocation6 + $0x2f8] sm:$0xff] }
 0xd07   :  { %v3488_v11 = vpop.f32.mrf.mxu0  ;;  %2429 = vmatprep.subr.mxu0 %v3584_v0  ;;  %v1521_v13 = vld [vmem:[#allocation6 + $0x288] sm:$0xff] }
 0xd08   :  { %2430 = vmatpush1.msra.mxu0 %v2216_v9  ;;  %v2200_v19 = vadd.f32 %v3488_v11, %v1879_v59  ;;  %v2239_v7 = vmax.f32 %v2185_v28, 0.0  ;;  %v1514_v9 = vld [vmem:[#allocation6 + $0x250] sm:$0xff]  ;;  %v1516_v11 = vld [vmem:[#allocation6 + $0x260] sm:$0xff] }
 0xd09   :  { %v2194_v14 = vpop.f32.mrf.mxu0  ;;  %2431 = vmatprep.subr.mxu0 %v3584_v0  ;;  %v1536_v28 = vld [vmem:[#allocation6 + $0x300] sm:$0xff] }
 0xd0a   :  { %2432 = vmatpush1.msra.mxu0 %v2215_v12  ;;  %v2195_v22 = vadd.f32 %v2194_v14, %v1874_v4  ;;  %v2242_v25 = vmax.f32 %v2200_v19, 0.0  ;;  %v1509_v4 = vld [vmem:[#allocation6 + $0x228] sm:$0xff]  ;;  %v1518_v12 = vld [vmem:[#allocation6 + $0x270] sm:$0xff]  ;;  %v1520_v14 = vld [vmem:[#allocation6 + $0x280] sm:$0xff] }
 0xd0b   :  { %v3491_v15 = vpop.f32.mrf.mxu0  ;;  %2433 = vmatprep.subr.mxu0 %v3584_v0  ;;  %v1529_v19 = vld [vmem:[#allocation6 + $0x2c8] sm:$0xff] }
 0xd0c   :  { %v2210_v16 = vadd.f32 %v3491_v15, %v1889_v48  ;;  %2434 = vmatpush1.msra.mxu0 %v2214_v62  ;;  %v2241_v29 = vmax.f32 %v2195_v22, 0.0  ;;  %v2236_v48 = vmax.f32 %v2170_v40, 0.0  ;;  %v1523_v62 = vld [vmem:[#allocation6 + $0x298] sm:$0xff]  ;;  %v1522_v15 = vld [vmem:[#allocation6 + $0x290] sm:$0xff]  ;;  %v1533_v22 = vld [vmem:[#allocation6 + $0x2e8] sm:$0xff] }
 0xd0d   :  { %v2204_v18 = vpop.f32.mrf.mxu0  ;;  %2435 = vmatprep.subr.mxu0 %v3584_v0  ;;  %v1544_v40 = vld [vmem:[#allocation6 + $0x340] sm:$0xff] }
 0xd0e   :  { %v2244_v43 = vmax.f32 %v2210_v16, 0.0  ;;  %v2205_v20 = vadd.f32 %v2204_v18, %v1884_v52  ;;  %2436 = vmatpush1.msra.mxu0 %v2213_v58  ;;  %v1824_v52 = vpop.permute.xlu1 %1823  ;;  %v1525_v58 = vld [vmem:[#allocation6 + $0x2a8] sm:$0xff]  ;;  %v1524_v16 = vld [vmem:[#allocation6 + $0x2a0] sm:$0xff]  ;;  %v1526_v18 = vld [vmem:[#allocation6 + $0x2b0] sm:$0xff] }
 0xd0f   :  { %2437 = vmatprep.subr.mxu0 %v3584_v0  ;;  %v2145_v34 = vadd.f32 %v3770_v38, %v1824_v52  ;;  %v1554_v52 = vld [vmem:[#allocation6 + $0x390] sm:$0xff] }
 0xd10   :  { %v2243_v23 = vmax.f32 %v2205_v20, 0.0  ;;  %2438 = vmatpush2.msra.mxu0 %v2244_v43  ;;  %v1528_v43 = vld [vmem:[#allocation6 + $0x2c0] sm:$0xff]  ;;  %v1531_v20 = vld [vmem:[#allocation6 + $0x2d8] sm:$0xff] }
 0xd11   :  { %2439 = vmatprep.subr.mxu0 %v3584_v0  ;;  %v2231_v59 = vmax.f32 %v2145_v34, 0.0  ;;  %v1559_v34 = vld [vmem:[#allocation6 + $0x3b8] sm:$0xff] }
 0xd12   :  { %2440 = vmatpush2.msra.mxu0 %v2243_v23  ;;  %v1814_v57 = vpop.permute.xlu1 %1813  ;;  %v1532_v23 = vld [vmem:[#allocation6 + $0x2e0] sm:$0xff] }
 0xd13   :  { %2441 = vmatprep.subr.mxu0 %v3584_v0  ;;  %v2135_v33 = vadd.f32 %v3764_v30, %v1814_v57  ;;  %v1508_v30 = vld [vmem:[#allocation6 + $0x220] sm:$0xff]  ;;  %v1562_v57 = vld [vmem:[#allocation6 + $0x3d0] sm:$0xff] }
 0xd14   :  { %2442 = vmatpush2.msra.mxu0 %v2242_v25  ;;  %v1534_v25 = vld [vmem:[#allocation6 + $0x2f0] sm:$0xff] }
 0xd15   :  { %2443 = vmatprep.subr.mxu0 %v3584_v0  ;;  %v2229_v38 = vmax.f32 %v2135_v33, 0.0  ;;  %v1565_v33 = vld [vmem:[#allocation6 + $0x3e8] sm:$0xff] }
 0xd16   :  { %2444 = vmatpush2.msra.mxu0 %v2241_v29  ;;  %v1539_v29 = vld [vmem:[#allocation6 + $0x318] sm:$0xff] }
 0xd17   :  { %2445 = vmatprep.subr.mxu0 %v3584_v0 }
 0xd18   :  { %2446 = vmatpush2.msra.mxu0 %v2240_v36  ;;  %v1540_v36 = vld [vmem:[#allocation6 + $0x320] sm:$0xff] }
 0xd19   :  { %2447 = vmatprep.subr.mxu0 %v3584_v0 }
 0xd1a   :  { %2448 = vmatpush2.msra.mxu0 %v2239_v7  ;;  %v1542_v7 = vld [vmem:[#allocation6 + $0x330] sm:$0xff] }
 0xd1b   :  { %2449 = vmatprep.subr.mxu0 %v3584_v0 }
 0xd1c   :  { %2450 = vmatpush2.msra.mxu0 %v2238_v41  ;;  %v1547_v41 = vld [vmem:[#allocation6 + $0x358] sm:$0xff] }
 0xd1d   :  { %2451 = vmatprep.subr.mxu0 %v3584_v0 }
 0xd1e   :  { %2452 = vmatpush2.msra.mxu0 %v2237_v47  ;;  %v1548_v47 = vld [vmem:[#allocation6 + $0x360] sm:$0xff] }
 0xd1f   :  { %2453 = vmatprep.subr.mxu0 %v3584_v0 }
 0xd20   :  { %2454 = vmatpush2.msra.mxu0 %v2236_v48  ;;  %v1550_v48 = vld [vmem:[#allocation6 + $0x370] sm:$0xff] }
 0xd21   :  { %2455 = vmatprep.subr.mxu0 %v3584_v0 }
 0xd22   :  { %2456 = vmatpush2.msra.mxu0 %v2235_v51  ;;  %v1555_v51 = vld [vmem:[#allocation6 + $0x398] sm:$0xff] }
 0xd23   :  { %2457 = vmatprep.subr.mxu0 %v3584_v0 }
 0xd24   :  { %2458 = vmatpush2.msra.mxu0 %v2234_v53  ;;  %v1556_v53 = vld [vmem:[#allocation6 + $0x3a0] sm:$0xff] }
 0xd25   :  { %2459 = vmatprep.subr.mxu0 %v3584_v0 }
 0xd26   :  { %2460 = vmatpush2.msra.mxu0 %v2233_v54  ;;  %v1558_v54 = vld [vmem:[#allocation6 + $0x3b0] sm:$0xff] }
 0xd27   :  { %2461 = vmatprep.subr.mxu0 %v3584_v0 }
 0xd28   :  { %2462 = vmatpush2.msra.mxu0 %v2232_v56  ;;  %v1563_v56 = vld [vmem:[#allocation6 + $0x3d8] sm:$0xff] }
 0xd29   :  { %2463 = vmatprep.subr.mxu0 %v3584_v0 }
 0xd2a   :  { %2464 = vmatpush2.msra.mxu0 %v2231_v59  ;;  %v1564_v59 = vld [vmem:[#allocation6 + $0x3e0] sm:$0xff] }
 0xd2b   :  { %2465 = vmatprep.subr.mxu0 %v3584_v0 }
 0xd2c   :  { %2466 = vmatpush2.msra.mxu0 %v2230_v60  ;;  %v1567_v60 = vld [vmem:[#allocation6 + $0x3f8] sm:$0xff] }
 0xd2d   :  { %2467 = vmatprep.subr.mxu0 %v3584_v0 }
 0xd2e   :  { %2468 = vmatpush2.msra.mxu0 %v2229_v38  ;;  %v1566_v38 = vld [vmem:[#allocation6 + $0x3f0] sm:$0xff] }
 0xd2f   :  { %2470 = vmatmul.mubr.f32.vlgmr.msra.gmra.mxu0 %v1504_v63 }
 0xd30   :  { %2474 = vmatprep.mubr.f32.mxu0 %v1507_v26 }
 0xd33   :  { %2475 = vmatmul.mubr.f32.gmra.mxu0 %v1506_v2 }
 0xd34   :  { %2479 = vmatprep.mubr.f32.mxu0 %v1509_v4 }
 0xd37   :  { %2480 = vmatmul.mubr.f32.gmra.mxu0 %v1508_v30 }
 0xd38   :  { %2484 = vmatprep.mubr.f32.mxu0 %v1511_v5 }
 0xd3b   :  { %2485 = vmatmul.mubr.f32.gmra.mxu0 %v1510_v1 }
 0xd3c   :  { %2489 = vmatprep.mubr.f32.mxu0 %v1513_v6 }
 0xd3f   :  { %2490 = vmatmul.mubr.f32.gmra.mxu0 %v1512_v8 }
 0xd40   :  { %2494 = vmatprep.mubr.f32.mxu0 %v1515_v3 }
 0xd43   :  { %2495 = vmatmul.mubr.f32.gmra.mxu0 %v1514_v9 }
 0xd44   :  { %2499 = vmatprep.mubr.f32.mxu0 %v1517_v10 }
 0xd47   :  { %2500 = vmatmul.mubr.f32.gmra.mxu0 %v1516_v11 }
 0xd48   :  { %2504 = vmatprep.mubr.f32.mxu0 %v1519_v61 }
 0xd4b   :  { %2505 = vmatmul.mubr.f32.gmra.mxu0 %v1518_v12 }
 0xd4c   :  { %2509 = vmatprep.mubr.f32.mxu0 %v1521_v13 }
 0xd4f   :  { %2510 = vmatmul.mubr.f32.gmra.mxu0 %v1520_v14  ;;  %v1569_v14 = vld [vmem:[#allocation6 + $0x408] sm:$0xff] }
 0xd50   :  { %2514 = vmatprep.mubr.f32.mxu0 %v1523_v62  ;;  %2886 = vmatprep.mubr.f32.mxu1 %v1569_v14 }
 0xd53   :  { %2515 = vmatmul.mubr.f32.gmra.mxu0 %v1522_v15 }
 0xd54   :  { %2519 = vmatprep.mubr.f32.mxu0 %v1525_v58 }
 0xd57   :  { %2520 = vmatmul.mubr.f32.gmra.mxu0 %v1524_v16 }
 0xd58   :  { %2524 = vmatprep.mubr.f32.mxu0 %v1527_v17 }
 0xd5b   :  { %2525 = vmatmul.mubr.f32.gmra.mxu0 %v1526_v18 }
 0xd5c   :  { %2529 = vmatprep.mubr.f32.mxu0 %v1529_v19  ;;  %v2323_v19 = vpop.permute.xlu0 %2322 }
 0xd5f   :  { %2530 = vmatmul.mubr.f32.gmra.mxu0 %v1528_v43 }
 0xd60   :  { %2534 = vmatprep.mubr.f32.mxu0 %v1531_v20  ;;  %v2318_v20 = vpop.permute.xlu1 %2317 }
 0xd63   :  { %2535 = vmatmul.mubr.f32.gmra.mxu0 %v1530_v21 }
 0xd64   :  { %2539 = vmatprep.mubr.f32.mxu0 %v1533_v22 }
 0xd67   :  { %2540 = vmatmul.mubr.f32.gmra.mxu0 %v1532_v23  ;;  %v2313_v23 = vpop.permute.xlu0 %2312 }
 0xd68   :  { %2544 = vmatprep.mubr.f32.mxu0 %v1535_v24 }
 0xd6b   :  { %2545 = vmatmul.mubr.f32.gmra.mxu0 %v1534_v25  ;;  %v2308_v25 = vpop.permute.xlu1 %2307 }
 0xd6c   :  { %2549 = vmatprep.mubr.f32.mxu0 %v1537_v27 }
 0xd6f   :  { %2550 = vmatmul.mubr.f32.gmra.mxu0 %v1536_v28 }
 0xd70   :  { %2554 = vmatprep.mubr.f32.mxu0 %v1539_v29  ;;  %v2303_v29 = vpop.permute.xlu0 %2302 }
 0xd73   :  { %2555 = vmatmul.mubr.f32.gmra.mxu0 %v1538_v31 }
 0xd74   :  { %2559 = vmatprep.mubr.f32.mxu0 %v1541_v32  ;;  %v2298_v32 = vpop.permute.xlu1 %2297 }
 0xd77   :  { %2560 = vmatmul.mubr.f32.gmra.mxu0 %v1540_v36 }
 0xd78   :  { %2564 = vmatprep.mubr.f32.mxu0 %v1543_v37 }
 0xd7b   :  { %2565 = vmatmul.mubr.f32.gmra.mxu0 %v1542_v7 }
 0xd7c   :  { %2569 = vmatprep.mubr.f32.mxu0 %v1545_v39 }
 0xd7f   :  { %2570 = vmatmul.mubr.f32.gmra.mxu0 %v1544_v40  ;;  %v2293_v40 = vpop.permute.xlu0 %2292 }
 0xd80   :  { %2574 = vmatprep.mubr.f32.mxu0 %v1547_v41 }
 0xd83   :  { %2575 = vmatmul.mubr.f32.gmra.mxu0 %v1546_v35 }
 0xd84   :  { %2579 = vmatprep.mubr.f32.mxu0 %v1549_v42 }
 0xd87   :  { %2580 = vmatmul.mubr.f32.gmra.mxu0 %v1548_v47  ;;  %v2288_v47 = vpop.permute.xlu1 %2287 }
 0xd88   :  { %2584 = vmatprep.mubr.f32.mxu0 %v1551_v45 }
 0xd8b   :  { %2585 = vmatmul.mubr.f32.gmra.mxu0 %v1550_v48 }
 0xd8c   :  { %2589 = vmatprep.mubr.f32.mxu0 %v1553_v50 }
 0xd8f   :  { %2590 = vmatmul.mubr.f32.gmra.mxu0 %v1552_v49 }
 0xd90   :  { %2594 = vmatprep.mubr.f32.mxu0 %v1555_v51 }
 0xd93   :  { %2595 = vmatmul.mubr.f32.gmra.mxu0 %v1554_v52 }
 0xd94   :  { %2599 = vmatprep.mubr.f32.mxu0 %v1557_v46  ;;  %v2283_v46 = vpop.permute.xlu0 %2282 }
 0xd97   :  { %2600 = vmatmul.mubr.f32.gmra.mxu0 %v1556_v53 }
 0xd98   :  { %2604 = vmatprep.mubr.f32.mxu0 %v1559_v34 }
 0xd9b   :  { %2605 = vmatmul.mubr.f32.gmra.mxu0 %v1558_v54 }
 0xd9c   :  { %2609 = vmatprep.mubr.f32.mxu0 %v1561_v55  ;;  %v2278_v55 = vpop.permute.xlu1 %2277 }
 0xd9f   :  { %2610 = vmatmul.mubr.f32.gmra.mxu0 %v1560_v44 }
 0xda0   :  { %2614 = vmatprep.mubr.f32.mxu0 %v1563_v56 }
 0xda3   :  { %2615 = vmatmul.mubr.f32.gmra.mxu0 %v1562_v57 }
 0xda4   :  { %2619 = vmatprep.mubr.f32.mxu0 %v1565_v33 }
 0xda7   :  { %2620 = vmatmul.mubr.f32.gmra.mxu0 %v1564_v59 }
 0xda8   :  { %2624 = vmatprep.mubr.f32.mxu0 %v1567_v60 }
 0xdab   :  { %2625 = vmatmul.mubr.f32.gmra.mxu0 %v1566_v38  ;;  %v2273_v38 = vpop.permute.xlu0 %2272 }
 0xdef   :  { %v3823_v63 = vpop.f32.mrf.mxu0 }
 0xdf1   :  { %v2473_v26 = vpop.f32.mrf.mxu0 }
 0xdf3   :  { %v3825_v2 = vpop.f32.mrf.mxu0 }
 0xdf5   :  { %v2478_v4 = vpop.f32.mrf.mxu0 }
 0xdf7   :  { %v3827_v30 = vpop.f32.mrf.mxu0 }
 0xdf9   :  { %v2483_v5 = vpop.f32.mrf.mxu0 }
 0xdfb   :  { %v3829_v1 = vpop.f32.mrf.mxu0 }
 0xdfd   :  { %v2488_v6 = vpop.f32.mrf.mxu0 }
 0xdfe   :  { %v2268_v6 = vpop.permute.xlu1 %2267 }
 0xdff   :  { %v3831_v8 = vpop.f32.mrf.mxu0 }
 0xe01   :  { %v2493_v3 = vpop.f32.mrf.mxu0 }
 0xe03   :  { %v3833_v9 = vpop.f32.mrf.mxu0 }
 0xe04   :  { %v2497_v14 = vadd.f32 %v3833_v9, %v2273_v38 }
 0xe05   :  { %v2498_v10 = vpop.f32.mrf.mxu0 }
 0xe07   :  { %v3835_v11 = vpop.f32.mrf.mxu0 }
 0xe08   :  { %v2502_v10 = vadd.f32 %v3835_v11, %v2278_v55 }
 0xe09   :  { %v2503_v61 = vpop.f32.mrf.mxu0 }
 0xe0b   :  { %v2506_v12 = vpop.f32.mrf.mxu0 }
 0xe0c   :  { %v2507_v4 = vadd.f32 %v2506_v12, %v2283_v46 }
 0xe0d   :  { %v2508_v13 = vpop.f32.mrf.mxu0 }
 0xe0f   :  { %v2511_v62 = vpop.f32.mrf.mxu0 }
 0xe10   :  { %v2512_v59 = vadd.f32 %v2511_v62, %v2288_v47  ;;  %v2637_v62 = vmax.f32 %v2507_v4, 0.0 }
 0xe11   :  { %v2513_v15 = vpop.f32.mrf.mxu0 }
 0xe12   :  { %v2638_v61 = vmax.f32 %v2512_v59, 0.0  ;;  %v2263_v15 = vpop.permute.xlu0 %2262 }
 0xe13   :  { %v2516_v58 = vpop.f32.mrf.mxu0 }
 0xe14   :  { %v2517_v56 = vadd.f32 %v2516_v58, %v2293_v40  ;;  %v2492_v58 = vadd.f32 %v3831_v8, %v2268_v6 }
 0xe15   :  { %v2518_v16 = vpop.f32.mrf.mxu0 }
 0xe16   :  { %v2639_v5 = vmax.f32 %v2517_v56, 0.0  ;;  %v2636_v16 = vmax.f32 %v2502_v10, 0.0 }
 0xe17   :  { %v2521_v17 = vpop.f32.mrf.mxu0 }
 0xe18   :  { %v2522_v34 = vadd.f32 %v2521_v17, %v2298_v32  ;;  %v2258_v17 = vpop.permute.xlu1 %2257 }
 0xe19   :  { %v2523_v18 = vpop.f32.mrf.mxu0 }
 0xe1a   :  { %v2640_v60 = vmax.f32 %v2522_v34, 0.0  ;;  %v2487_v18 = vadd.f32 %v3829_v1, %v2263_v15 }
 0xe1b   :  { %v2526_v43 = vpop.f32.mrf.mxu0 }
 0xe1c   :  { %v2527_v51 = vadd.f32 %v2526_v43, %v2303_v29  ;;  %v2482_v43 = vadd.f32 %v3827_v30, %v2258_v17 }
 0xe1d   :  { %v2528_v21 = vpop.f32.mrf.mxu0 }
 0xe1e   :  { %v2641_v57 = vmax.f32 %v2527_v51, 0.0  ;;  %v2253_v21 = vpop.permute.xlu0 %2252 }
 0xe1f   :  { %v2531_v22 = vpop.f32.mrf.mxu0 }
 0xe20   :  { %v2532_v48 = vadd.f32 %v2531_v22, %v2308_v25  ;;  %v2477_v22 = vadd.f32 %v3825_v2, %v2253_v21 }
 0xe21   :  { %v2533_v24 = vpop.f32.mrf.mxu0 }
 0xe22   :  { %v2642_v54 = vmax.f32 %v2532_v48, 0.0  ;;  %v2248_v24 = vpop.permute.xlu1 %2247  ;;  %v2403_v40 = vpop.permute.xlu0 %2402 }
 0xe23   :  { %v2536_v27 = vpop.f32.mrf.mxu0  ;;  %v2472_v25 = vadd.f32 %v3823_v63, %v2248_v24 }
 0xe24   :  { %v2537_v35 = vadd.f32 %v2536_v27, %v2313_v23  ;;  %v2633_v23 = vmax.f32 %v2487_v18, 0.0  ;;  %v2632_v27 = vmax.f32 %v2482_v43, 0.0 }
 0xe25   :  { %v2538_v28 = vpop.f32.mrf.mxu0  ;;  %v2630_v2 = vmax.f32 %v2472_v25, 0.0 }
 0xe26   :  { %v2643_v52 = vmax.f32 %v2537_v35, 0.0  ;;  %v2631_v28 = vmax.f32 %v2477_v22, 0.0  ;;  %v2398_v35 = vpop.permute.xlu1 %2397  ;;  %v2393_v48 = vpop.permute.xlu0 %2392 }
 0xe27   :  { %v2541_v31 = vpop.f32.mrf.mxu0 }
 0xe28   :  { %v2542_v7 = vadd.f32 %v2541_v31, %v2318_v20  ;;  %v2634_v20 = vmax.f32 %v2492_v58, 0.0 }
 0xe29   :  { %v2543_v36 = vpop.f32.mrf.mxu0 }
 0xe2a   :  { %v2644_v50 = vmax.f32 %v2542_v7, 0.0  ;;  %v2383_v46 = vpop.permute.xlu0 %2382 }
 0xe2b   :  { %v2546_v37 = vpop.f32.mrf.mxu0 }
 0xe2c   :  { %v2547_v39 = vadd.f32 %v2546_v37, %v2323_v19  ;;  %v2635_v19 = vmax.f32 %v2497_v14, 0.0 }
 0xe2d   :  { %v2548_v41 = vpop.f32.mrf.mxu0 }
 0xe2e   :  { %v2645_v42 = vmax.f32 %v2547_v39, 0.0  ;;  %v2373_v59 = vpop.permute.xlu0 %2372 }
 0xe2f   :  { %v3837_v45 = vpop.f32.mrf.mxu0 }
 0xe30   :  { %2823 = vmatpush1.msra.mxu1 %v2645_v42 }
 0xe31   :  { %v2553_v49 = vpop.f32.mrf.mxu0  ;;  %2824 = vmatprep.subr.mxu1 %v3584_v0 }
 0xe32   :  { %2825 = vmatpush1.msra.mxu1 %v2644_v50  ;;  %v2388_v49 = vpop.permute.xlu1 %2387 }
 0xe33   :  { %v3840_v53 = vpop.f32.mrf.mxu0  ;;  %2826 = vmatprep.subr.mxu1 %v3584_v0 }
 0xe34   :  { %2827 = vmatpush1.msra.mxu1 %v2643_v52 }
 0xe35   :  { %v2558_v44 = vpop.f32.mrf.mxu0  ;;  %2828 = vmatprep.subr.mxu1 %v3584_v0 }
 0xe36   :  { %2829 = vmatpush1.msra.mxu1 %v2642_v54  ;;  %v2378_v54 = vpop.permute.xlu1 %2377 }
 0xe37   :  { %v3844_v33 = vpop.f32.mrf.mxu0  ;;  %2830 = vmatprep.subr.mxu1 %v3584_v0 }
 0xe38   :  { %2831 = vmatpush1.msra.mxu1 %v2641_v57 }
 0xe39   :  { %v2563_v26 = vpop.f32.mrf.mxu0  ;;  %2832 = vmatprep.subr.mxu1 %v3584_v0 }
 0xe3a   :  { %2833 = vmatpush1.msra.mxu1 %v2640_v60  ;;  %v2368_v4 = vpop.permute.xlu1 %2367 }
 0xe3b   :  { %v3848_v3 = vpop.f32.mrf.mxu0  ;;  %2834 = vmatprep.subr.mxu1 %v3584_v0 }
 0xe3c   :  { %2835 = vmatpush1.msra.mxu1 %v2639_v5 }
 0xe3d   :  { %v2568_v13 = vpop.f32.mrf.mxu0  ;;  %2836 = vmatprep.subr.mxu1 %v3584_v0 }
 0xe3e   :  { %2837 = vmatpush1.msra.mxu1 %v2638_v61  ;;  %v2363_v13 = vpop.permute.xlu0 %2362  ;;  %v2358_v15 = vpop.permute.xlu1 %2357 }
 0xe3f   :  { %v3854_v12 = vpop.f32.mrf.mxu0  ;;  %2838 = vmatprep.subr.mxu1 %v3584_v0 }
 0xe40   :  { %2839 = vmatpush1.msra.mxu1 %v2637_v62 }
 0xe41   :  { %v2573_v11 = vpop.f32.mrf.mxu0  ;;  %2840 = vmatprep.subr.mxu1 %v3584_v0 }
 0xe42   :  { %2841 = vmatpush1.msra.mxu1 %v2636_v16  ;;  %v2353_v18 = vpop.permute.xlu0 %2352 }
 0xe43   :  { %v3860_v9 = vpop.f32.mrf.mxu0  ;;  %2842 = vmatprep.subr.mxu1 %v3584_v0 }
 0xe44   :  { %2843 = vmatpush1.msra.mxu1 %v2635_v19  ;;  %v2577_v22 = vadd.f32 %v3860_v9, %v2353_v18  ;;  %v1608_v18 = vld [vmem:[#allocation6 + $0x540] sm:$0xff] }
 0xe45   :  { %v2578_v8 = vpop.f32.mrf.mxu0  ;;  %2844 = vmatprep.subr.mxu1 %v3584_v0 }
 0xe46   :  { %2845 = vmatpush1.msra.mxu1 %v2634_v20  ;;  %v2348_v20 = vpop.permute.xlu1 %2347  ;;  %v2343_v24 = vpop.permute.xlu0 %2342 }
 0xe47   :  { %v3866_v1 = vpop.f32.mrf.mxu0  ;;  %2846 = vmatprep.subr.mxu1 %v3584_v0  ;;  %v2572_v25 = vadd.f32 %v3854_v12, %v2348_v20  ;;  %v1613_v20 = vld [vmem:[#allocation6 + $0x568] sm:$0xff] }
 0xe48   :  { %2847 = vmatpush1.msra.mxu1 %v2633_v23  ;;  %v2582_v21 = vadd.f32 %v3866_v1, %v2358_v15  ;;  %v2567_v1 = vadd.f32 %v3848_v3, %v2343_v24  ;;  %v1605_v15 = vld [vmem:[#allocation6 + $0x528] sm:$0xff]  ;;  %v1616_v24 = vld [vmem:[#allocation6 + $0x580] sm:$0xff] }
 0xe49   :  { %v2583_v30 = vpop.f32.mrf.mxu0  ;;  %2848 = vmatprep.subr.mxu1 %v3584_v0 }
 0xe4a   :  { %2849 = vmatpush1.msra.mxu1 %v2632_v27  ;;  %v2652_v27 = vmax.f32 %v2582_v21, 0.0  ;;  %v2338_v30 = vpop.permute.xlu1 %2337  ;;  %v1612_v21 = vld [vmem:[#allocation6 + $0x560] sm:$0xff] }
 0xe4b   :  { %v2586_v29 = vpop.f32.mrf.mxu0  ;;  %2850 = vmatprep.subr.mxu1 %v3584_v0  ;;  %v2562_v9 = vadd.f32 %v3844_v33, %v2338_v30  ;;  %v1621_v30 = vld [vmem:[#allocation6 + $0x5a8] sm:$0xff] }
 0xe4c   :  { %2851 = vmatpush1.msra.mxu1 %v2631_v28  ;;  %v2587_v19 = vadd.f32 %v2586_v29, %v2363_v13  ;;  %v2651_v28 = vmax.f32 %v2577_v22, 0.0  ;;  %v2650_v29 = vmax.f32 %v2572_v25, 0.0  ;;  %v1600_v13 = vld [vmem:[#allocation6 + $0x500] sm:$0xff]  ;;  %v1614_v22 = vld [vmem:[#allocation6 + $0x570] sm:$0xff]  ;;  %v1619_v25 = vld [vmem:[#allocation6 + $0x598] sm:$0xff] }
 0xe4d   :  { %v2588_v31 = vpop.f32.mrf.mxu0  ;;  %2852 = vmatprep.subr.mxu1 %v3584_v0 }
 0xe4e   :  { %2853 = vmatpush1.msra.mxu1 %v2630_v2  ;;  %v2653_v23 = vmax.f32 %v2587_v19, 0.0  ;;  %v2333_v2 = vpop.permute.xlu0 %2332  ;;  %v2649_v31 = vmax.f32 %v2567_v1, 0.0  ;;  %v1611_v19 = vld [vmem:[#allocation6 + $0x558] sm:$0xff]  ;;  %v1620_v1 = vld [vmem:[#allocation6 + $0x5a0] sm:$0xff] }
 0xe4f   :  { %v2591_v32 = vpop.f32.mrf.mxu0  ;;  %2854 = vmatprep.subr.mxu1 %v3584_v0  ;;  %v2557_v12 = vadd.f32 %v3840_v53, %v2333_v2  ;;  %v1571_v53 = vld [vmem:[#allocation6 + $0x418] sm:$0xff]  ;;  %v1624_v2 = vld [vmem:[#allocation6 + $0x5c0] sm:$0xff] }
 0xe50   :  { %v2592_v17 = vadd.f32 %v2591_v32, %v2368_v4  ;;  %v2328_v32 = vpop.permute.xlu1 %2327  ;;  %v1597_v4 = vld [vmem:[#allocation6 + $0x4e8] sm:$0xff] }
 0xe51   :  { %v2593_v63 = vpop.f32.mrf.mxu0  ;;  %v2552_v3 = vadd.f32 %v3837_v45, %v2328_v32  ;;  %v1572_v45 = vld [vmem:[#allocation6 + $0x420] sm:$0xff]  ;;  %v1629_v32 = vld [vmem:[#allocation6 + $0x5e8] sm:$0xff] }
 0xe52   :  { %v2654_v8 = vmax.f32 %v2592_v17, 0.0  ;;  %v2648_v63 = vmax.f32 %v2562_v9, 0.0  ;;  %v1606_v17 = vld [vmem:[#allocation6 + $0x530] sm:$0xff] }
 0xe53   :  { %v2596_v36 = vpop.f32.mrf.mxu0  ;;  %v2646_v33 = vmax.f32 %v2552_v3, 0.0  ;;  %v1622_v9 = vld [vmem:[#allocation6 + $0x5b0] sm:$0xff]  ;;  %v1628_v3 = vld [vmem:[#allocation6 + $0x5e0] sm:$0xff] }
 0xe54   :  { %v2597_v58 = vadd.f32 %v2596_v36, %v2373_v59  ;;  %v2647_v36 = vmax.f32 %v2557_v12, 0.0  ;;  %v1593_v59 = vld [vmem:[#allocation6 + $0x4c8] sm:$0xff]  ;;  %v1627_v12 = vld [vmem:[#allocation6 + $0x5d8] sm:$0xff] }
 0xe55   :  { %v2598_v37 = vpop.f32.mrf.mxu0 }
 0xe56   :  { %v2655_v43 = vmax.f32 %v2597_v58, 0.0  ;;  %v1568_v37 = vld [vmem:[#allocation6 + $0x400] sm:$0xff] }
 0xe57   :  { %v2601_v7 = vpop.f32.mrf.mxu0  ;;  %v1604_v58 = vld [vmem:[#allocation6 + $0x520] sm:$0xff] }
 0xe58   :  { %v2602_v14 = vadd.f32 %v2601_v7, %v2378_v54  ;;  %v1570_v7 = vld [vmem:[#allocation6 + $0x410] sm:$0xff] }
 0xe59   :  { %v2603_v39 = vpop.f32.mrf.mxu0  ;;  %v1586_v54 = vld [vmem:[#allocation6 + $0x490] sm:$0xff] }
 0xe5a   :  { %v2656_v11 = vmax.f32 %v2602_v14, 0.0  ;;  %v1573_v39 = vld [vmem:[#allocation6 + $0x428] sm:$0xff]  ;;  %v1603_v14 = vld [vmem:[#allocation6 + $0x518] sm:$0xff] }
 0xe5b   :  { %v2606_v41 = vpop.f32.mrf.mxu0 }
 0xe5c   :  { %v2607_v10 = vadd.f32 %v2606_v41, %v2383_v46  ;;  %v1574_v41 = vld [vmem:[#allocation6 + $0x430] sm:$0xff]  ;;  %v1584_v46 = vld [vmem:[#allocation6 + $0x480] sm:$0xff] }
 0xe5d   :  { %v2608_v42 = vpop.f32.mrf.mxu0 }
 0xe5e   :  { %v2657_v16 = vmax.f32 %v2607_v10, 0.0  ;;  %v1576_v42 = vld [vmem:[#allocation6 + $0x440] sm:$0xff]  ;;  %v1598_v10 = vld [vmem:[#allocation6 + $0x4f0] sm:$0xff] }
 0xe5f   :  { %v2611_v47 = vpop.f32.mrf.mxu0 }
 0xe60   :  { %v2612_v5 = vadd.f32 %v2611_v47, %v2388_v49  ;;  %v1579_v47 = vld [vmem:[#allocation6 + $0x458] sm:$0xff] }
 0xe61   :  { %v2613_v50 = vpop.f32.mrf.mxu0  ;;  %v1583_v49 = vld [vmem:[#allocation6 + $0x478] sm:$0xff] }
 0xe62   :  { %v2658_v62 = vmax.f32 %v2612_v5, 0.0  ;;  %v1580_v50 = vld [vmem:[#allocation6 + $0x460] sm:$0xff] }
 0xe63   :  { %v2616_v51 = vpop.f32.mrf.mxu0  ;;  %v1596_v5 = vld [vmem:[#allocation6 + $0x4e0] sm:$0xff] }
 0xe64   :  { %v2617_v38 = vadd.f32 %v2616_v51, %v2393_v48  ;;  %v1581_v48 = vld [vmem:[#allocation6 + $0x468] sm:$0xff]  ;;  %v1582_v51 = vld [vmem:[#allocation6 + $0x470] sm:$0xff] }
 0xe65   :  { %v2618_v52 = vpop.f32.mrf.mxu0 }
 0xe66   :  { %v2659_v61 = vmax.f32 %v2617_v38, 0.0  ;;  %v1585_v52 = vld [vmem:[#allocation6 + $0x488] sm:$0xff]  ;;  %v1595_v38 = vld [vmem:[#allocation6 + $0x4d8] sm:$0xff] }
 0xe67   :  { %v2621_v34 = vpop.f32.mrf.mxu0 }
 0xe68   :  { %v2622_v56 = vadd.f32 %v2621_v34, %v2398_v35  ;;  %v1577_v35 = vld [vmem:[#allocation6 + $0x448] sm:$0xff]  ;;  %v1587_v34 = vld [vmem:[#allocation6 + $0x498] sm:$0xff] }
 0xe69   :  { %v2623_v55 = vpop.f32.mrf.mxu0 }
 0xe6a   :  { %v2660_v6 = vmax.f32 %v2622_v56, 0.0  ;;  %v1589_v55 = vld [vmem:[#allocation6 + $0x4a8] sm:$0xff]  ;;  %v1591_v56 = vld [vmem:[#allocation6 + $0x4b8] sm:$0xff] }
 0xe6b   :  { %v2626_v44 = vpop.f32.mrf.mxu0 }
 0xe6c   :  { %v2627_v57 = vadd.f32 %v2626_v44, %v2403_v40  ;;  %v1575_v40 = vld [vmem:[#allocation6 + $0x438] sm:$0xff]  ;;  %v1588_v44 = vld [vmem:[#allocation6 + $0x4a0] sm:$0xff] }
 0xe6d   :  { %v2628_v60 = vpop.f32.mrf.mxu0 }
 0xe6e   :  { %v2661_v26 = vmax.f32 %v2627_v57, 0.0  ;;  %v1590_v57 = vld [vmem:[#allocation6 + $0x4b0] sm:$0xff]  ;;  %v1592_v60 = vld [vmem:[#allocation6 + $0x4c0] sm:$0xff] }
 0xe70   :  { %2855 = vmatpush2.msra.mxu1 %v2661_v26  ;;  %v1594_v26 = vld [vmem:[#allocation6 + $0x4d0] sm:$0xff] }
 0xe71   :  { %2856 = vmatprep.subr.mxu1 %v3584_v0 }
 0xe72   :  { %2857 = vmatpush2.msra.mxu1 %v2660_v6  ;;  %v1599_v6 = vld [vmem:[#allocation6 + $0x4f8] sm:$0xff] }
 0xe73   :  { %2858 = vmatprep.subr.mxu1 %v3584_v0 }
 0xe74   :  { %2859 = vmatpush2.msra.mxu1 %v2659_v61  ;;  %v1601_v61 = vld [vmem:[#allocation6 + $0x508] sm:$0xff] }
 0xe75   :  { %2860 = vmatprep.subr.mxu1 %v3584_v0 }
 0xe76   :  { %2861 = vmatpush2.msra.mxu1 %v2658_v62  ;;  %v1602_v62 = vld [vmem:[#allocation6 + $0x510] sm:$0xff] }
 0xe77   :  { %2862 = vmatprep.subr.mxu1 %v3584_v0 }
 0xe78   :  { %2863 = vmatpush2.msra.mxu1 %v2657_v16  ;;  %v1607_v16 = vld [vmem:[#allocation6 + $0x538] sm:$0xff] }
 0xe79   :  { %2864 = vmatprep.subr.mxu1 %v3584_v0 }
 0xe7a   :  { %2865 = vmatpush2.msra.mxu1 %v2656_v11  ;;  %v1609_v11 = vld [vmem:[#allocation6 + $0x548] sm:$0xff] }
 0xe7b   :  { %2866 = vmatprep.subr.mxu1 %v3584_v0 }
 0xe7c   :  { %2867 = vmatpush2.msra.mxu1 %v2655_v43  ;;  %v1610_v43 = vld [vmem:[#allocation6 + $0x550] sm:$0xff] }
 0xe7d   :  { %2868 = vmatprep.subr.mxu1 %v3584_v0 }
 0xe7e   :  { %2869 = vmatpush2.msra.mxu1 %v2654_v8  ;;  %v1615_v8 = vld [vmem:[#allocation6 + $0x578] sm:$0xff] }
 0xe7f   :  { %2870 = vmatprep.subr.mxu1 %v3584_v0 }
 0xe80   :  { %2871 = vmatpush2.msra.mxu1 %v2653_v23  ;;  %v1617_v23 = vld [vmem:[#allocation6 + $0x588] sm:$0xff] }
 0xe81   :  { %2872 = vmatprep.subr.mxu1 %v3584_v0 }
 0xe82   :  { %2873 = vmatpush2.msra.mxu1 %v2652_v27  ;;  %v1618_v27 = vld [vmem:[#allocation6 + $0x590] sm:$0xff] }
 0xe83   :  { %2874 = vmatprep.subr.mxu1 %v3584_v0 }
 0xe84   :  { %2875 = vmatpush2.msra.mxu1 %v2651_v28  ;;  %v1623_v28 = vld [vmem:[#allocation6 + $0x5b8] sm:$0xff] }
 0xe85   :  { %2876 = vmatprep.subr.mxu1 %v3584_v0 }
 0xe86   :  { %2877 = vmatpush2.msra.mxu1 %v2650_v29  ;;  %v1625_v29 = vld [vmem:[#allocation6 + $0x5c8] sm:$0xff] }
 0xe87   :  { %2878 = vmatprep.subr.mxu1 %v3584_v0 }
 0xe88   :  { %2879 = vmatpush2.msra.mxu1 %v2649_v31  ;;  %v1626_v31 = vld [vmem:[#allocation6 + $0x5d0] sm:$0xff] }
 0xe89   :  { %2880 = vmatprep.subr.mxu1 %v3584_v0 }
 0xe8a   :  { %2881 = vmatpush2.msra.mxu1 %v2648_v63  ;;  %v1631_v63 = vld [vmem:[#allocation6 + $0x5f8] sm:$0xff] }
 0xe8b   :  { %2882 = vmatprep.subr.mxu1 %v3584_v0 }
 0xe8c   :  { %2883 = vmatpush2.msra.mxu1 %v2647_v36  ;;  %v1630_v36 = vld [vmem:[#allocation6 + $0x5f0] sm:$0xff] }
 0xe8d   :  { %2884 = vmatprep.subr.mxu1 %v3584_v0  ;;  %v1578_v0 = vld [vmem:[#allocation6 + $0x450] sm:$0xff] }
 0xe8e   :  { %2885 = vmatpush2.msra.mxu1 %v2646_v33 }
 0xe8f   :  { %2887 = vmatmul.mubr.f32.vlgmr.msra.gmra.mxu1 %v1568_v37 }
 0xe90   :  { %2891 = vmatprep.mubr.f32.mxu1 %v1571_v53 }
 0xe93   :  { %2892 = vmatmul.mubr.f32.gmra.mxu1 %v1570_v7 }
 0xe94   :  { %2896 = vmatprep.mubr.f32.mxu1 %v1573_v39 }
 0xe97   :  { %2897 = vmatmul.mubr.f32.gmra.mxu1 %v1572_v45 }
 0xe98   :  { %2901 = vmatprep.mubr.f32.mxu1 %v1575_v40 }
 0xe9b   :  { %2902 = vmatmul.mubr.f32.gmra.mxu1 %v1574_v41 }
 0xe9c   :  { %2906 = vmatprep.mubr.f32.mxu1 %v1577_v35 }
 0xe9f   :  { %2907 = vmatmul.mubr.f32.gmra.mxu1 %v1576_v42 }
 0xea0   :  { %2911 = vmatprep.mubr.f32.mxu1 %v1579_v47 }
 0xea3   :  { %2912 = vmatmul.mubr.f32.gmra.mxu1 %v1578_v0 }
 0xea4   :  { %2916 = vmatprep.mubr.f32.mxu1 %v1581_v48 }
 0xea7   :  { %2917 = vmatmul.mubr.f32.gmra.mxu1 %v1580_v50 }
 0xea8   :  { %2921 = vmatprep.mubr.f32.mxu1 %v1583_v49 }
 0xeab   :  { %2922 = vmatmul.mubr.f32.gmra.mxu1 %v1582_v51 }
 0xeac   :  { %2926 = vmatprep.mubr.f32.mxu1 %v1585_v52  ;;  %v1633_v52 = vld [vmem:[#allocation6 + $0x608] sm:$0x3f] }
 0xead   :  { %3148 = vmatprep.mubr.f32.mxu0 %v1633_v52 }
 0xeaf   :  { %2927 = vmatmul.mubr.f32.gmra.mxu1 %v1584_v46 }
 0xeb0   :  { %2931 = vmatprep.mubr.f32.mxu1 %v1587_v34 }
 0xeb3   :  { %2932 = vmatmul.mubr.f32.gmra.mxu1 %v1586_v54 }
 0xeb4   :  { %2936 = vmatprep.mubr.f32.mxu1 %v1589_v55 }
 0xeb7   :  { %2937 = vmatmul.mubr.f32.gmra.mxu1 %v1588_v44 }
 0xeb8   :  { %2941 = vmatprep.mubr.f32.mxu1 %v1591_v56 }
 0xebb   :  { %2942 = vmatmul.mubr.f32.gmra.mxu1 %v1590_v57 }
 0xebc   :  { %2946 = vmatprep.mubr.f32.mxu1 %v1593_v59 }
 0xebf   :  { %2947 = vmatmul.mubr.f32.gmra.mxu1 %v1592_v60 }
 0xec0   :  { %2951 = vmatprep.mubr.f32.mxu1 %v1595_v38 }
 0xec3   :  { %2952 = vmatmul.mubr.f32.gmra.mxu1 %v1594_v26 }
 0xec4   :  { %2956 = vmatprep.mubr.f32.mxu1 %v1597_v4 }
 0xec7   :  { %2957 = vmatmul.mubr.f32.gmra.mxu1 %v1596_v5 }
 0xec8   :  { %2961 = vmatprep.mubr.f32.mxu1 %v1599_v6 }
 0xecb   :  { %2962 = vmatmul.mubr.f32.gmra.mxu1 %v1598_v10 }
 0xecc   :  { %2966 = vmatprep.mubr.f32.mxu1 %v1601_v61  ;;  %v2820_v61 = vpop.permute.xlu0 %2819 }
 0xecf   :  { %2967 = vmatmul.mubr.f32.gmra.mxu1 %v1600_v13 }
 0xed0   :  { %2971 = vmatprep.mubr.f32.mxu1 %v1603_v14  ;;  %v2740_v14 = vpop.permute.xlu1 %2739 }
 0xed3   :  { %2972 = vmatmul.mubr.f32.gmra.mxu1 %v1602_v62 }
 0xed4   :  { %2976 = vmatprep.mubr.f32.mxu1 %v1605_v15 }
 0xed7   :  { %2977 = vmatmul.mubr.f32.gmra.mxu1 %v1604_v58  ;;  %v2815_v58 = vpop.permute.xlu0 %2814 }
 0xed8   :  { %2981 = vmatprep.mubr.f32.mxu1 %v1607_v16 }
 0xedb   :  { %2982 = vmatmul.mubr.f32.gmra.mxu1 %v1606_v17  ;;  %v2735_v17 = vpop.permute.xlu1 %2734 }
 0xedc   :  { %2986 = vmatprep.mubr.f32.mxu1 %v1609_v11 }
 0xedf   :  { %2987 = vmatmul.mubr.f32.gmra.mxu1 %v1608_v18 }
 0xee0   :  { %2991 = vmatprep.mubr.f32.mxu1 %v1611_v19  ;;  %v2810_v19 = vpop.permute.xlu0 %2809 }
 0xee3   :  { %2992 = vmatmul.mubr.f32.gmra.mxu1 %v1610_v43 }
 0xee4   :  { %2996 = vmatprep.mubr.f32.mxu1 %v1613_v20  ;;  %v2730_v20 = vpop.permute.xlu1 %2729 }
 0xee7   :  { %2997 = vmatmul.mubr.f32.gmra.mxu1 %v1612_v21 }
 0xee8   :  { %3001 = vmatprep.mubr.f32.mxu1 %v1615_v8 }
 0xeeb   :  { %3002 = vmatmul.mubr.f32.gmra.mxu1 %v1614_v22  ;;  %v2805_v22 = vpop.permute.xlu0 %2804 }
 0xeec   :  { %3006 = vmatprep.mubr.f32.mxu1 %v1617_v23 }
 0xeef   :  { %3007 = vmatmul.mubr.f32.gmra.mxu1 %v1616_v24  ;;  %v2725_v24 = vpop.permute.xlu1 %2724 }
 0xef0   :  { %3011 = vmatprep.mubr.f32.mxu1 %v1619_v25 }
 0xef3   :  { %3012 = vmatmul.mubr.f32.gmra.mxu1 %v1618_v27 }
 0xef4   :  { %3016 = vmatprep.mubr.f32.mxu1 %v1621_v30  ;;  %v2800_v30 = vpop.permute.xlu0 %2799 }
 0xef7   :  { %3017 = vmatmul.mubr.f32.gmra.mxu1 %v1620_v1 }
 0xef8   :  { %3021 = vmatprep.mubr.f32.mxu1 %v1623_v28  ;;  %v2720_v28 = vpop.permute.xlu1 %2719 }
 0xefb   :  { %3022 = vmatmul.mubr.f32.gmra.mxu1 %v1622_v9 }
 0xefc   :  { %3026 = vmatprep.mubr.f32.mxu1 %v1625_v29 }
 0xeff   :  { %3027 = vmatmul.mubr.f32.gmra.mxu1 %v1624_v2  ;;  %v2795_v2 = vpop.permute.xlu0 %2794 }
 0xf00   :  { %3031 = vmatprep.mubr.f32.mxu1 %v1627_v12 }
 0xf03   :  { %3032 = vmatmul.mubr.f32.gmra.mxu1 %v1626_v31  ;;  %v2715_v31 = vpop.permute.xlu1 %2714 }
 0xf04   :  { %3036 = vmatprep.mubr.f32.mxu1 %v1629_v32 }
 0xf07   :  { %3037 = vmatmul.mubr.f32.gmra.mxu1 %v1628_v3 }
 0xf08   :  { %3041 = vmatprep.mubr.f32.mxu1 %v1631_v63  ;;  %v2790_v63 = vpop.permute.xlu0 %2789 }
 0xf0b   :  { %3042 = vmatmul.mubr.f32.gmra.mxu1 %v1630_v36 }
 0xf4f   :  { %v3896_v33 = vpop.f32.mrf.mxu1 }
 0xf50   :  { %3970 = vst [vmem:[#allocation9_spill] sm:$0xff] %v3896_v33 }
 0xf51   :  { %v2890_v37 = vpop.f32.mrf.mxu1 }
 0xf52   :  { %v2710_v37 = vpop.permute.xlu1 %2709 }
 0xf53   :  { %v3898_v53 = vpop.f32.mrf.mxu1 }
 0xf54   :  { %3971 = vst [vmem:[#allocation10_spill] sm:$0xff] %v3898_v53 }
 0xf55   :  { %v2895_v7 = vpop.f32.mrf.mxu1 }
 0xf57   :  { %v3900_v39 = vpop.f32.mrf.mxu1 }
 0xf58   :  { %3972 = vst [vmem:[#allocation11_spill] sm:$0xff] %v3900_v39 }
 0xf59   :  { %v2900_v45 = vpop.f32.mrf.mxu1 }
 0xf5b   :  { %v3902_v40 = vpop.f32.mrf.mxu1 }
 0xf5d   :  { %v2905_v41 = vpop.f32.mrf.mxu1 }
 0xf5e   :  { %v2785_v41 = vpop.permute.xlu0 %2784 }
 0xf5f   :  { %v3904_v35 = vpop.f32.mrf.mxu1 }
 0xf61   :  { %v2910_v42 = vpop.f32.mrf.mxu1 }
 0xf62   :  { %v2780_v52 = vpop.permute.xlu0 %2779 }
 0xf63   :  { %v3906_v47 = vpop.f32.mrf.mxu1 }
 0xf65   :  { %v2915_v0 = vpop.f32.mrf.mxu1 }
 0xf66   :  { %v2705_v0 = vpop.permute.xlu1 %2704 }
 0xf67   :  { %v3908_v48 = vpop.f32.mrf.mxu1 }
 0xf69   :  { %v2920_v50 = vpop.f32.mrf.mxu1 }
 0xf6b   :  { %v3910_v49 = vpop.f32.mrf.mxu1 }
 0xf6d   :  { %v2925_v51 = vpop.f32.mrf.mxu1 }
 0xf6f   :  { %v3912_v46 = vpop.f32.mrf.mxu1 }
 0xf71   :  { %v2930_v34 = vpop.f32.mrf.mxu1 }
 0xf73   :  { %v3914_v54 = vpop.f32.mrf.mxu1 }
 0xf75   :  { %v2935_v55 = vpop.f32.mrf.mxu1 }
 0xf76   :  { %v2700_v55 = vpop.permute.xlu1 %2699 }
 0xf77   :  { %v3916_v44 = vpop.f32.mrf.mxu1 }
 0xf79   :  { %v2940_v56 = vpop.f32.mrf.mxu1 }
 0xf7b   :  { %v3918_v57 = vpop.f32.mrf.mxu1 }
 0xf7d   :  { %v2945_v59 = vpop.f32.mrf.mxu1 }
 0xf7f   :  { %v3920_v60 = vpop.f32.mrf.mxu1 }
 0xf81   :  { %v2950_v38 = vpop.f32.mrf.mxu1 }
 0xf82   :  { %v2775_v38 = vpop.permute.xlu0 %2774 }
 0xf83   :  { %v3922_v26 = vpop.f32.mrf.mxu1 }
 0xf85   :  { %v2955_v4 = vpop.f32.mrf.mxu1 }
 0xf87   :  { %v2958_v5 = vpop.f32.mrf.mxu1 }
 0xf89   :  { %v2960_v6 = vpop.f32.mrf.mxu1 }
 0xf8a   :  { %v2695_v6 = vpop.permute.xlu1 %2694 }
 0xf8b   :  { %v2963_v10 = vpop.f32.mrf.mxu1 }
 0xf8d   :  { %v2965_v13 = vpop.f32.mrf.mxu1 }
 0xf8f   :  { %v3924_v62 = vpop.f32.mrf.mxu1 }
 0xf90   :  { %3973 = vst [vmem:[#allocation12_spill] sm:$0xff] %v3924_v62  ;;  %v2954_v62 = vadd.f32 %v3922_v26, %v2730_v20 }
 0xf91   :  { %v2970_v15 = vpop.f32.mrf.mxu1 }
 0xf93   :  { %v3926_v16 = vpop.f32.mrf.mxu1 }
 0xf94   :  { %3974 = vst [vmem:[#allocation13_spill] sm:$0xff] %v3926_v16 }
 0xf95   :  { %v2975_v11 = vpop.f32.mrf.mxu1 }
 0xf96   :  { %v2770_v11 = vpop.permute.xlu0 %2769 }
 0xf97   :  { %v3928_v18 = vpop.f32.mrf.mxu1 }
 0xf99   :  { %v2980_v43 = vpop.f32.mrf.mxu1 }
 0xf9b   :  { %v3930_v21 = vpop.f32.mrf.mxu1 }
 0xf9d   :  { %v2985_v8 = vpop.f32.mrf.mxu1 }
 0xf9e   :  { %v2690_v8 = vpop.permute.xlu1 %2689 }
 0xf9f   :  { %v3932_v23 = vpop.f32.mrf.mxu1 }
 0xfa1   :  { %v2990_v25 = vpop.f32.mrf.mxu1 }
 0xfa2   :  { %v2964_v25 = vadd.f32 %v2963_v10, %v2740_v14  ;;  %v2685_v53 = vpop.permute.xlu1 %2684 }
 0xfa3   :  { %v3934_v27 = vpop.f32.mrf.mxu1 }
 0xfa5   :  { %v2995_v1 = vpop.f32.mrf.mxu1 }
 0xfa7   :  { %v3936_v9 = vpop.f32.mrf.mxu1 }
 0xfa9   :  { %v3000_v29 = vpop.f32.mrf.mxu1 }
 0xfab   :  { %v3938_v12 = vpop.f32.mrf.mxu1 }
 0xfad   :  { %v3005_v32 = vpop.f32.mrf.mxu1 }
 0xfaf   :  { %v3008_v3 = vpop.f32.mrf.mxu1 }
 0xfb1   :  { %v3010_v36 = vpop.f32.mrf.mxu1 }
 0xfb2   :  { %v2959_v36 = vadd.f32 %v2958_v5, %v2735_v17  ;;  %v2944_v5 = vadd.f32 %v3918_v57, %v2720_v28  ;;  %v3004_v28 = vadd.f32 %v3938_v12, %v2780_v52  ;;  %v2914_v12 = vadd.f32 %v3906_v47, %v2690_v8 }
 0xfb3   :  { %v3013_v7 = vpop.f32.mrf.mxu1 }
 0xfb5   :  { %v3015_v45 = vpop.f32.mrf.mxu1 }
 0xfb7   :  { %v3018_v42 = vpop.f32.mrf.mxu1 }
 0xfb9   :  { %v3020_v50 = vpop.f32.mrf.mxu1 }
 0xfbb   :  { %v3023_v51 = vpop.f32.mrf.mxu1 }
 0xfbc   :  { %v3024_v10 = vadd.f32 %v3023_v51, %v2800_v30  ;;  %v3058_v30 = vmax.f32 %v2944_v5, 0.0 }
 0xfbd   :  { %v3025_v34 = vpop.f32.mrf.mxu1 }
 0xfbe   :  { %v2765_v34 = vpop.permute.xlu0 %2764 }
 0xfbf   :  { %v3028_v56 = vpop.f32.mrf.mxu1 }
 0xfc0   :  { %v3029_v16 = vadd.f32 %v3028_v56, %v2805_v22  ;;  %v3014_v22 = vadd.f32 %v3013_v7, %v2790_v63 }
 0xfc1   :  { %v3030_v59 = vpop.f32.mrf.mxu1 }
 0xfc2   :  { %v3062_v59 = vmax.f32 %v2964_v25, 0.0  ;;  %v3075_v17 = vmax.f32 %v3029_v16, 0.0  ;;  %v2760_v26 = vpop.permute.xlu0 %2759 }
 0xfc3   :  { %v3033_v4 = vpop.f32.mrf.mxu1  ;;  %v2984_v56 = vadd.f32 %v3930_v21, %v2760_v26  ;;  %v3977_v21 = vld [vmem:[#allocation10_spill] sm:$0xff] }
 0xfc4   :  { %v3034_v50 = vadd.f32 %v3033_v4, %v2810_v19  ;;  %v2939_v19 = vadd.f32 %v3916_v44, %v2715_v31  ;;  %v3072_v44 = vmax.f32 %v3014_v22, 0.0  ;;  %v2924_v31 = vadd.f32 %v3910_v49, %v2700_v55 }
 0xfc5   :  { %v3035_v13 = vpop.f32.mrf.mxu1  ;;  %v2989_v49 = vadd.f32 %v3932_v23, %v2765_v34  ;;  %v3052_v4 = vmax.f32 %v2914_v12, 0.0  ;;  %v3975_v23 = vld [vmem:[#allocation11_spill] sm:$0xff]  ;;  %v3066_v8 = vmax.f32 %v2984_v56, 0.0 }
 0xfc6   :  { %v2949_v13 = vadd.f32 %v3920_v60, %v2725_v24  ;;  %v3076_v14 = vmax.f32 %v3034_v50, 0.0  ;;  %v3074_v60 = vmax.f32 %v3024_v10, 0.0  ;;  %v2934_v24 = vadd.f32 %v3914_v54, %v2710_v37 }
 0xfc7   :  { %v3038_v15 = vpop.f32.mrf.mxu1  ;;  %v3057_v16 = vmax.f32 %v2939_v19, 0.0  ;;  %v2999_v54 = vadd.f32 %v3936_v9, %v2775_v38  ;;  %v2909_v9 = vadd.f32 %v3904_v35, %v2685_v53  ;;  %v3976_v53 = vld [vmem:[#allocation13_spill] sm:$0xff] }
 0xfc8   :  { %v3039_v29 = vadd.f32 %v3038_v15, %v2815_v58  ;;  %v3019_v58 = vadd.f32 %v3018_v42, %v2795_v2  ;;  %v3059_v20 = vmax.f32 %v2949_v13, 0.0  ;;  %v2755_v2 = vpop.permute.xlu0 %2754  ;;  %v3056_v63 = vmax.f32 %v2934_v24, 0.0 }
 0xfc9   :  { %v3040_v43 = vpop.f32.mrf.mxu1  ;;  %v3070_v42 = vmax.f32 %v3004_v28, 0.0  ;;  %v3069_v51 = vmax.f32 %v2999_v54, 0.0  ;;  %v2979_v47 = vadd.f32 %v3928_v18, %v2755_v2  ;;  %v3979_v18 = vld [vmem:[#allocation9_spill] sm:$0xff] }
 0xfca   :  { %v3077_v39 = vmax.f32 %v3039_v29, 0.0  ;;  %v3061_v43 = vmax.f32 %v2959_v36, 0.0  ;;  %v3073_v57 = vmax.f32 %v3019_v58, 0.0 }
 0xfcb   :  { %v3043_v1 = vpop.f32.mrf.mxu1 }
 0xfcc   :  { %v3044_v32 = vadd.f32 %v3043_v1, %v2820_v61  ;;  %v3060_v61 = vmax.f32 %v2954_v62, 0.0  ;;  %v2929_v62 = vadd.f32 %v3912_v46, %v2705_v0  ;;  %v2994_v46 = vadd.f32 %v3934_v27, %v2770_v11  ;;  %v2750_v52 = vpop.permute.xlu0 %2749 }
 0xfcd   :  { %v3045_v45 = vpop.f32.mrf.mxu1  ;;  %v3054_v0 = vmax.f32 %v2924_v31, 0.0  ;;  %v3051_v11 = vmax.f32 %v2909_v9, 0.0  ;;  %v2974_v35 = vadd.f32 %v3976_v53, %v2750_v52 }
 0xfce   :  { %v3078_v33 = vmax.f32 %v3044_v32, 0.0  ;;  %v3068_v38 = vmax.f32 %v2994_v46, 0.0  ;;  %v3978_v32 = vld [vmem:[#allocation12_spill] sm:$0xff]  ;;  %v3065_v45 = vmax.f32 %v2979_v47, 0.0 }
 0xfd0   :  { %3372 = vmatprep.subr.mxu0 %v3078_v33  ;;  %v2680_v33 = vpop.permute.xlu1 %2679  ;;  %v2745_v25 = vpop.permute.xlu0 %2744 }
 0xfd1   :  { %3373 = vmatpush3.msra.mxu0 %v3062_v59  ;;  %v2904_v27 = vadd.f32 %v3902_v40, %v2680_v33  ;;  %v2969_v36 = vadd.f32 %v3978_v32, %v2745_v25  ;;  %v3064_v59 = vmax.f32 %v2974_v35, 0.0 }
 0xfd2   :  { %3374 = vmatprep.subr.mxu0 %v3077_v39  ;;  %v3009_v39 = vadd.f32 %v3008_v3, %v2785_v41  ;;  %v2919_v3 = vadd.f32 %v3908_v48, %v2695_v6  ;;  %v3055_v41 = vmax.f32 %v2929_v62, 0.0  ;;  %v3067_v6 = vmax.f32 %v2989_v49, 0.0 }
 0xfd3   :  { %3375 = vmatpush3.msra.mxu0 %v3061_v43  ;;  %v3050_v29 = vmax.f32 %v2904_v27, 0.0  ;;  %v3063_v43 = vmax.f32 %v2969_v36, 0.0 }
 0xfd4   :  { %3376 = vmatprep.subr.mxu0 %v3076_v14  ;;  %v2675_v7 = vpop.permute.xlu1 %2674  ;;  %v3071_v37 = vmax.f32 %v3009_v39, 0.0  ;;  %v3053_v55 = vmax.f32 %v2919_v3, 0.0  ;;  %v1632_v14 = vld [vmem:[#allocation6 + $0x600] sm:$0x3f] }
 0xfd5   :  { %3377 = vmatpush3.msra.mxu0 %v3060_v61  ;;  %v2899_v15 = vadd.f32 %v3975_v23, %v2675_v7 }
 0xfd6   :  { %3378 = vmatprep.subr.mxu0 %v3075_v17  ;;  %v3082_v17 = vpop.permute.xlu0 %3081 }
 0xfd7   :  { %3379 = vmatpush3.msra.mxu0 %v3059_v20  ;;  %v3049_v34 = vmax.f32 %v2899_v15, 0.0 }
 0xfd8   :  { %3380 = vmatprep.subr.mxu0 %v3074_v60  ;;  %v2670_v48 = vpop.permute.xlu1 %2669 }
 0xfd9   :  { %3381 = vmatpush3.msra.mxu0 %v3058_v30  ;;  %v2894_v1 = vadd.f32 %v3977_v21, %v2670_v48 }
 0xfda   :  { %3382 = vmatprep.subr.mxu0 %v3073_v57 }
 0xfdb   :  { %3383 = vmatpush3.msra.mxu0 %v3057_v16  ;;  %v3048_v13 = vmax.f32 %v2894_v1, 0.0 }
 0xfdc   :  { %3384 = vmatprep.subr.mxu0 %v3072_v44  ;;  %v2665_v40 = vpop.permute.xlu1 %2664 }
 0xfdd   :  { %3385 = vmatpush3.msra.mxu0 %v3056_v63  ;;  %v2889_v50 = vadd.f32 %v3979_v18, %v2665_v40 }
 0xfde   :  { %3386 = vmatprep.subr.mxu0 %v3071_v37 }
 0xfdf   :  { %3387 = vmatpush3.msra.mxu0 %v3055_v41  ;;  %v3047_v10 = vmax.f32 %v2889_v50, 0.0 }
 0xfe0   :  { %3388 = vmatprep.subr.mxu0 %v3070_v42 }
 0xfe1   :  { %3389 = vmatpush3.msra.mxu0 %v3054_v0 }
 0xfe2   :  { %3390 = vmatprep.subr.mxu0 %v3069_v51 }
 0xfe3   :  { %3391 = vmatpush3.msra.mxu0 %v3053_v55 }
 0xfe4   :  { %3392 = vmatprep.subr.mxu0 %v3068_v38 }
 0xfe5   :  { %3393 = vmatpush3.msra.mxu0 %v3052_v4 }
 0xfe6   :  { %3394 = vmatprep.subr.mxu0 %v3067_v6 }
 0xfe7   :  { %3395 = vmatpush3.msra.mxu0 %v3051_v11 }
 0xfe8   :  { %3396 = vmatprep.subr.mxu0 %v3066_v8 }
 0xfe9   :  { %3397 = vmatpush3.msra.mxu0 %v3050_v29 }
 0xfea   :  { %3398 = vmatprep.subr.mxu0 %v3065_v45 }
 0xfeb   :  { %3399 = vmatpush3.msra.mxu0 %v3049_v34 }
 0xfec   :  { %3400 = vmatprep.subr.mxu0 %v3064_v59 }
 0xfed   :  { %3401 = vmatpush3.msra.mxu0 %v3048_v13 }
 0xfee   :  { %3402 = vmatprep.subr.mxu0 %v3063_v43 }
 0xfef   :  { %3403 = vmatpush3.msra.mxu0 %v3047_v10 }
 0xff0   :  { %3149 = vmatmul.mubr.f32.vlgmr.msra.gmra.mxu0 %v1632_v14 }
0x10b0   :  { %v3404_v5 = vpop.f32.mrf.mxu0 }
0x10b2   :  { %v3405_v61 = vpop.f32.mrf.mxu0 }
0x10b3   :  { %v3406_v58 = vadd.f32 %v3405_v61, %v3404_v5 }
0x10b5   :  { %v3151_v26 = vadd.f32 %v3406_v58, %v3082_v17 }
0x10b7   :  { %3155 = vst.msk [vmem:[%s3969_s4] sm:$0x3f] %vm3154_vm5, %v3151_v26 }
0x10b8   :  { %3160 = vsyncpa [#allocation3], 1 }
0x10b9   :  { %3161 = vsyncpa [#allocation5], 1 }

</bundles_post_ra>
